<compile_context>
chip_gen: v5e
topology: v5e:2x2
jax: 0.10.0
libtpu: 0.0.40
codegen_flags: <defaults>
</compile_context>

<pallas_src>
import jax
import jax.numpy as jnp
from jax import lax
from jax.experimental import pallas as pl
from jax.experimental.pallas import tpu as pltpu

_LANE = 128
_SUBLANE = 8
_ROW_CHUNK = 128           # voxel rows processed per in-kernel chunk
_BLOCK_ROWS_CAP = 8192     # max voxel rows per grid block


def _round_up(x, m):
    return ((x + m - 1) // m) * m


def _vmem_budget_bytes():
    """Per-generation budget for the double-buffered I/O blocks."""
    try:
        cap = pltpu.get_tpu_info().vmem_capacity_bytes
        # ~1/4 of physical VMEM: ~32 MiB on 128-MiB parts (v5e/v6e),
        # ~16 MiB on 64-MiB parts (v7x).
        return int(min(max(cap // 4, 8 << 20), 48 << 20))
    except Exception:
        return 24 << 20


def _choose_tiles(V, PC, in_bytes, out_bytes, budget):
    """Largest VMEM-fitting block of voxel rows (multiple of the row chunk)."""
    lanes_in = _round_up(PC, _LANE)
    # Double-buffered blocks: features + (lane-padded) counts + output.
    per_row = 2 * (lanes_in * in_bytes + _LANE * 4 + _LANE * out_bytes)
    cap_rows = max(_ROW_CHUNK, (budget // per_row) // _ROW_CHUNK * _ROW_CHUNK)
    if V < _ROW_CHUNK:
        rows = _round_up(max(V, 1), _SUBLANE)
        return rows, rows, per_row
    rows = min(cap_rows, _BLOCK_ROWS_CAP, _round_up(V, _ROW_CHUNK))
    return rows, _ROW_CHUNK, per_row


def _make_kernel(PC, row_chunk, n_chunks):
    def kernel(chan_ref, f_ref, n_ref, o_ref):
        # chan_ref: (1, PC) int32  -- lane index modulo C (channel id per lane)
        # f_ref:    (BR, PC)       -- native point features, voxels on sublanes
        # n_ref:    (BR, 1)        -- points per voxel
        # o_ref:    (BR, 3)        -- mean (rho, z, extra) per voxel
        ch = chan_ref[...]
        m_rho = ch[:, : PC - 1] == 0        # x lanes (their right neighbour is y)
        m_z = ch == 2
        m_w = ch == 3
        col = lax.broadcasted_iota(jnp.int32, (1, 3), 1)

        def body(c, carry):
            r0 = pl.multiple_of(c * row_chunk, row_chunk)
            rows = pl.ds(r0, row_chunk)
            blk = f_ref[rows, :].astype(jnp.float32)                  # (rc, PC)
            nxt = f_ref[rows, pl.ds(1, PC - 1)].astype(jnp.float32)   # lane i -> i+1
            x = blk[:, : PC - 1]
            rho = jnp.sqrt(x * x + nxt * nxt)                         # valid on x lanes
            s_rho = jnp.sum(jnp.where(m_rho, rho, 0.0), axis=-1, keepdims=True)
            s_z = jnp.sum(jnp.where(m_z, blk, 0.0), axis=-1, keepdims=True)
            s_w = jnp.sum(jnp.where(m_w, blk, 0.0), axis=-1, keepdims=True)

            # clamp_min(num_voxels, 1); EUP reciprocal + one Newton step ~= f32 div.
            n = jnp.maximum(n_ref[rows, :].astype(jnp.float32), 1.0)  # (rc, 1)
            r = pl.reciprocal(n, approx=True)
            inv = r * (2.0 - n * r)

            # Assemble the (rc, 3) tile with broadcasted selects (no lane concat).
            out = jnp.where(col == 0, s_rho, jnp.where(col == 1, s_z, s_w)) * inv
            o_ref[rows, :] = out.astype(o_ref.dtype)
            return carry

        lax.fori_loop(0, n_chunks, body, 0, unroll=min(2, n_chunks))

    return kernel


def mean_vfe_cyl(features, num_voxels, coors=None, *, core_parallel=False):
    """features: (V, P, C>=4); num_voxels: (V,) -> (V, 3) in features.dtype.

    Set core_parallel=True on multi-TensorCore chips (v7x) to shard the voxel
    tile grid across cores; leave False on single-TC parts (v5e/v6e).
    """
    del coors  # unused by the mean encoder (kept for API parity with the module)
    V, P, C = features.shape
    assert C >= 4, "need x, y, z and at least one extra point feature"
    PC = P * C

    in_bytes = jnp.dtype(features.dtype).itemsize
    out_bytes = in_bytes
    budget = _vmem_budget_bytes()
    block_rows, row_chunk, per_row = _choose_tiles(V, PC, in_bytes, out_bytes, budget)
    n_chunks = block_rows // row_chunk
    grid = pl.cdiv(V, block_rows)

    # Free layout changes only: (V, P, C) -> (V, P*C) leaves the HBM bytes in place.
    flat = features.reshape(V, PC)
    nvox = num_voxels.reshape(V, 1)
    chan = (jnp.arange(PC, dtype=jnp.int32) % C).reshape(1, PC)

    # VMEM: double-buffered blocks + in-kernel f32 working set + slack.
    working = 6 * row_chunk * _round_up(PC, _LANE) * 4
    vmem_limit = int(max(4 << 20, per_row * block_rows + working + (2 << 20)))

    cost = pl.CostEstimate(
        flops=6 * V * P + 10 * V,
        transcendentals=V * P + V,
        bytes_accessed=V * PC * in_bytes + V * nvox.dtype.itemsize + 3 * V * out_bytes,
    )

    sem = (pltpu.CORE_PARALLEL,) if core_parallel else ("parallel",)

    return pl.pallas_call(
        _make_kernel(PC, row_chunk, n_chunks),
        out_shape=jax.ShapeDtypeStruct((V, 3), features.dtype),
        grid=(grid,),
        in_specs=[
            pl.BlockSpec((1, PC), lambda i: (0, 0)),            # channel ids
            pl.BlockSpec((block_rows, PC), lambda i: (i, 0)),   # features
            pl.BlockSpec((block_rows, 1), lambda i: (i, 0)),    # counts
        ],
        out_specs=pl.BlockSpec((block_rows, 3), lambda i: (i, 0)),
        compiler_params=pltpu.CompilerParams(
            dimension_semantics=sem,
            vmem_limit_bytes=vmem_limit,
        ),
        cost_estimate=cost,
    )(chan, flat, nvox)


def _reference(features, num_voxels):
    # Pure-JAX reference mirroring the PyTorch forward.
    x, y = features[..., 0], features[..., 1]
    rho = jnp.sqrt(x * x + y * y)
    sel = jnp.stack([rho, features[..., 2], features[..., 3]], axis=-1)
    s = jnp.sum(sel, axis=1)
    norm = jnp.maximum(num_voxels.astype(features.dtype), 1.0).reshape(-1, 1)
    return s / norm


if __name__ == "__main__":
    key = jax.random.PRNGKey(0)
    k1, k2 = jax.random.split(key)
    V, P, C = 200, 32, 5   # num voxels, max points per voxel, point feature dim
    features = jax.random.normal(k1, (V, P, C), dtype=jnp.float32)
    num_voxels = jax.random.randint(k2, (V,), 0, P + 1, dtype=jnp.int32)

    out = jax.block_until_ready(mean_vfe_cyl(features, num_voxels))

    ref = _reference(features, num_voxels)
    assert out.shape == (V, 3) and out.dtype == features.dtype
    assert jnp.allclose(out, ref, atol=1e-5, rtol=1e-5)
    print("KERNEL_OK")
</pallas_src>

<mosaic_0001>
module attributes {stable_mosaic.version = 11 : i64} {
  func.func @kernel(%arg0: i32, %arg1: memref<1x160xi32, #tpu.memory_space<vmem>>, %arg2: memref<256x160xf32, #tpu.memory_space<vmem>>, %arg3: memref<256x1xi32, #tpu.memory_space<vmem>>, %arg4: memref<256x3xf32, #tpu.memory_space<vmem>>) attributes {dimension_semantics = [#tpu.dimension_semantics<parallel>], iteration_bounds = array<i64: 1>, scalar_prefetch = 0 : i64, scratch_operands = 0 : i64, tpu.core_type = #tpu.core_type<tc>, window_params = [{pipeline_mode = #tpu.pipeline_mode<synchronous>, transform_indices = @transform_0, window_bounds = array<i64: 1, 160>}, {transform_indices = @transform_1, window_bounds = array<i64: 256, 160>}, {transform_indices = @transform_2, window_bounds = array<i64: 256, 1>}, {transform_indices = @transform_3, window_bounds = array<i64: 256, 3>}]} {
    %c0 = arith.constant 0 : index
    %c0_0 = arith.constant 0 : index
    %0 = vector.load %arg1[%c0, %c0_0] : memref<1x160xi32, #tpu.memory_space<vmem>>, vector<1x160xi32>
    %1 = vector.extract_strided_slice %0 {offsets = [0, 0], sizes = [1, 159], strides = [1, 1]} : vector<1x160xi32> to vector<1x159xi32>
    %c0_i32 = arith.constant 0 : i32
    %2 = vector.broadcast %c0_i32 : i32 to vector<1x159xi32>
    %3 = arith.cmpi eq, %1, %2 : vector<1x159xi32>
    %c2_i32 = arith.constant 2 : i32
    %4 = vector.broadcast %c2_i32 : i32 to vector<1x160xi32>
    %5 = arith.cmpi eq, %0, %4 : vector<1x160xi32>
    %c3_i32 = arith.constant 3 : i32
    %6 = vector.broadcast %c3_i32 : i32 to vector<1x160xi32>
    %7 = arith.cmpi eq, %0, %6 : vector<1x160xi32>
    %8 = tpu.iota {dimensions = array<i32: 1>} : vector<1x3xi32>
    %c0_i32_1 = arith.constant 0 : i32
    %c128_i32 = arith.constant 128 : i32
    %9 = arith.muli %c0_i32_1, %c128_i32 : i32
    %10 = tpu.assume_multiple %9, 128 : i32
    %11 = arith.index_cast %10 : i32 to index
    %c0_2 = arith.constant 0 : index
    %12 = vector.load %arg2[%11, %c0_2] : memref<256x160xf32, #tpu.memory_space<vmem>>, vector<128x160xf32>
    %13 = arith.index_cast %10 : i32 to index
    %c1 = arith.constant 1 : index
    %14 = vector.load %arg2[%13, %c1] : memref<256x160xf32, #tpu.memory_space<vmem>>, vector<128x159xf32>
    %15 = vector.extract_strided_slice %12 {offsets = [0, 0], sizes = [128, 159], strides = [1, 1]} : vector<128x160xf32> to vector<128x159xf32>
    %16 = arith.mulf %15, %15 : vector<128x159xf32>
    %17 = arith.mulf %14, %14 : vector<128x159xf32>
    %18 = arith.addf %16, %17 : vector<128x159xf32>
    %19 = math.sqrt %18 : vector<128x159xf32>
    %cst = arith.constant 0.000000e+00 : f32
    %20 = vector.shape_cast %3 : vector<1x159xi1> to vector<1x159xi1>
    %21 = vector.broadcast %20 : vector<1x159xi1> to vector<128x159xi1>
    %22 = vector.broadcast %cst : f32 to vector<128x159xf32>
    %23 = arith.select %21, %19, %22 : vector<128x159xi1>, vector<128x159xf32>
    %cst_3 = arith.constant dense<0.000000e+00> : vector<128xf32>
    %24 = vector.multi_reduction <add>, %23, %cst_3 [1] : vector<128x159xf32> to vector<128xf32>
    %25 = vector.shape_cast %24 : vector<128xf32> to vector<128x1xf32>
    %cst_4 = arith.constant 0.000000e+00 : f32
    %26 = vector.shape_cast %5 : vector<1x160xi1> to vector<1x160xi1>
    %27 = vector.broadcast %26 : vector<1x160xi1> to vector<128x160xi1>
    %28 = vector.broadcast %cst_4 : f32 to vector<128x160xf32>
    %29 = arith.select %27, %12, %28 : vector<128x160xi1>, vector<128x160xf32>
    %cst_5 = arith.constant dense<0.000000e+00> : vector<128xf32>
    %30 = vector.multi_reduction <add>, %29, %cst_5 [1] : vector<128x160xf32> to vector<128xf32>
    %31 = vector.shape_cast %30 : vector<128xf32> to vector<128x1xf32>
    %cst_6 = arith.constant 0.000000e+00 : f32
    %32 = vector.shape_cast %7 : vector<1x160xi1> to vector<1x160xi1>
    %33 = vector.broadcast %32 : vector<1x160xi1> to vector<128x160xi1>
    %34 = vector.broadcast %cst_6 : f32 to vector<128x160xf32>
    %35 = arith.select %33, %12, %34 : vector<128x160xi1>, vector<128x160xf32>
    %cst_7 = arith.constant dense<0.000000e+00> : vector<128xf32>
    %36 = vector.multi_reduction <add>, %35, %cst_7 [1] : vector<128x160xf32> to vector<128xf32>
    %37 = vector.shape_cast %36 : vector<128xf32> to vector<128x1xf32>
    %38 = arith.index_cast %10 : i32 to index
    %c0_8 = arith.constant 0 : index
    %39 = vector.load %arg3[%38, %c0_8] : memref<256x1xi32, #tpu.memory_space<vmem>>, vector<128x1xi32>
    %40 = arith.sitofp %39 : vector<128x1xi32> to vector<128x1xf32>
    %cst_9 = arith.constant 1.000000e+00 : f32
    %41 = vector.broadcast %cst_9 : f32 to vector<128x1xf32>
    %42 = arith.maximumf %40, %41 : vector<128x1xf32>
    %43 = tpu.reciprocal %42 {approx = true} : vector<128x1xf32> -> vector<128x1xf32>
    %44 = arith.mulf %42, %43 : vector<128x1xf32>
    %cst_10 = arith.constant 2.000000e+00 : f32
    %45 = vector.broadcast %cst_10 : f32 to vector<128x1xf32>
    %46 = arith.subf %45, %44 : vector<128x1xf32>
    %47 = arith.mulf %43, %46 : vector<128x1xf32>
    %c0_i32_11 = arith.constant 0 : i32
    %48 = vector.broadcast %c0_i32_11 : i32 to vector<1x3xi32>
    %49 = arith.cmpi eq, %8, %48 : vector<1x3xi32>
    %c1_i32 = arith.constant 1 : i32
    %50 = vector.broadcast %c1_i32 : i32 to vector<1x3xi32>
    %51 = arith.cmpi eq, %8, %50 : vector<1x3xi32>
    %52 = vector.shape_cast %51 : vector<1x3xi1> to vector<1x3xi1>
    %53 = vector.broadcast %52 : vector<1x3xi1> to vector<128x3xi1>
    %54 = vector.shape_cast %31 : vector<128x1xf32> to vector<128x1xf32>
    %55 = vector.broadcast %54 : vector<128x1xf32> to vector<128x3xf32>
    %56 = vector.shape_cast %37 : vector<128x1xf32> to vector<128x1xf32>
    %57 = vector.broadcast %56 : vector<128x1xf32> to vector<128x3xf32>
    %58 = arith.select %53, %55, %57 : vector<128x3xi1>, vector<128x3xf32>
    %59 = vector.shape_cast %49 : vector<1x3xi1> to vector<1x3xi1>
    %60 = vector.broadcast %59 : vector<1x3xi1> to vector<128x3xi1>
    %61 = vector.shape_cast %25 : vector<128x1xf32> to vector<128x1xf32>
    %62 = vector.broadcast %61 : vector<128x1xf32> to vector<128x3xf32>
    %63 = arith.select %60, %62, %58 : vector<128x3xi1>, vector<128x3xf32>
    %64 = vector.broadcast %47 : vector<128x1xf32> to vector<128x3xf32>
    %65 = arith.mulf %63, %64 : vector<128x3xf32>
    %66 = arith.index_cast %10 : i32 to index
    %c0_12 = arith.constant 0 : index
    %67 = vector.load %arg4[%66, %c0_12] : memref<256x3xf32, #tpu.memory_space<vmem>>, vector<128x3xf32>
    tpu.vector_store %arg4[%66, %c0_12], %65 {strides = array<i32>} : memref<256x3xf32, #tpu.memory_space<vmem>>, vector<128x3xf32>,
    %c1_i32_13 = arith.constant 1 : i32
    %c128_i32_14 = arith.constant 128 : i32
    %68 = arith.muli %c1_i32_13, %c128_i32_14 : i32
    %69 = tpu.assume_multiple %68, 128 : i32
    %70 = arith.index_cast %69 : i32 to index
    %c0_15 = arith.constant 0 : index
    %71 = vector.load %arg2[%70, %c0_15] : memref<256x160xf32, #tpu.memory_space<vmem>>, vector<128x160xf32>
    %72 = arith.index_cast %69 : i32 to index
    %c1_16 = arith.constant 1 : index
    %73 = vector.load %arg2[%72, %c1_16] : memref<256x160xf32, #tpu.memory_space<vmem>>, vector<128x159xf32>
    %74 = vector.extract_strided_slice %71 {offsets = [0, 0], sizes = [128, 159], strides = [1, 1]} : vector<128x160xf32> to vector<128x159xf32>
    %75 = arith.mulf %74, %74 : vector<128x159xf32>
    %76 = arith.mulf %73, %73 : vector<128x159xf32>
    %77 = arith.addf %75, %76 : vector<128x159xf32>
    %78 = math.sqrt %77 : vector<128x159xf32>
    %cst_17 = arith.constant 0.000000e+00 : f32
    %79 = vector.shape_cast %3 : vector<1x159xi1> to vector<1x159xi1>
    %80 = vector.broadcast %79 : vector<1x159xi1> to vector<128x159xi1>
    %81 = vector.broadcast %cst_17 : f32 to vector<128x159xf32>
    %82 = arith.select %80, %78, %81 : vector<128x159xi1>, vector<128x159xf32>
    %cst_18 = arith.constant dense<0.000000e+00> : vector<128xf32>
    %83 = vector.multi_reduction <add>, %82, %cst_18 [1] : vector<128x159xf32> to vector<128xf32>
    %84 = vector.shape_cast %83 : vector<128xf32> to vector<128x1xf32>
    %cst_19 = arith.constant 0.000000e+00 : f32
    %85 = vector.shape_cast %5 : vector<1x160xi1> to vector<1x160xi1>
    %86 = vector.broadcast %85 : vector<1x160xi1> to vector<128x160xi1>
    %87 = vector.broadcast %cst_19 : f32 to vector<128x160xf32>
    %88 = arith.select %86, %71, %87 : vector<128x160xi1>, vector<128x160xf32>
    %cst_20 = arith.constant dense<0.000000e+00> : vector<128xf32>
    %89 = vector.multi_reduction <add>, %88, %cst_20 [1] : vector<128x160xf32> to vector<128xf32>
    %90 = vector.shape_cast %89 : vector<128xf32> to vector<128x1xf32>
    %cst_21 = arith.constant 0.000000e+00 : f32
    %91 = vector.shape_cast %7 : vector<1x160xi1> to vector<1x160xi1>
    %92 = vector.broadcast %91 : vector<1x160xi1> to vector<128x160xi1>
    %93 = vector.broadcast %cst_21 : f32 to vector<128x160xf32>
    %94 = arith.select %92, %71, %93 : vector<128x160xi1>, vector<128x160xf32>
    %cst_22 = arith.constant dense<0.000000e+00> : vector<128xf32>
    %95 = vector.multi_reduction <add>, %94, %cst_22 [1] : vector<128x160xf32> to vector<128xf32>
    %96 = vector.shape_cast %95 : vector<128xf32> to vector<128x1xf32>
    %97 = arith.index_cast %69 : i32 to index
    %c0_23 = arith.constant 0 : index
    %98 = vector.load %arg3[%97, %c0_23] : memref<256x1xi32, #tpu.memory_space<vmem>>, vector<128x1xi32>
    %99 = arith.sitofp %98 : vector<128x1xi32> to vector<128x1xf32>
    %cst_24 = arith.constant 1.000000e+00 : f32
    %100 = vector.broadcast %cst_24 : f32 to vector<128x1xf32>
    %101 = arith.maximumf %99, %100 : vector<128x1xf32>
    %102 = tpu.reciprocal %101 {approx = true} : vector<128x1xf32> -> vector<128x1xf32>
    %103 = arith.mulf %101, %102 : vector<128x1xf32>
    %cst_25 = arith.constant 2.000000e+00 : f32
    %104 = vector.broadcast %cst_25 : f32 to vector<128x1xf32>
    %105 = arith.subf %104, %103 : vector<128x1xf32>
    %106 = arith.mulf %102, %105 : vector<128x1xf32>
    %c0_i32_26 = arith.constant 0 : i32
    %107 = vector.broadcast %c0_i32_26 : i32 to vector<1x3xi32>
    %108 = arith.cmpi eq, %8, %107 : vector<1x3xi32>
    %c1_i32_27 = arith.constant 1 : i32
    %109 = vector.broadcast %c1_i32_27 : i32 to vector<1x3xi32>
    %110 = arith.cmpi eq, %8, %109 : vector<1x3xi32>
    %111 = vector.shape_cast %110 : vector<1x3xi1> to vector<1x3xi1>
    %112 = vector.broadcast %111 : vector<1x3xi1> to vector<128x3xi1>
    %113 = vector.shape_cast %90 : vector<128x1xf32> to vector<128x1xf32>
    %114 = vector.broadcast %113 : vector<128x1xf32> to vector<128x3xf32>
    %115 = vector.shape_cast %96 : vector<128x1xf32> to vector<128x1xf32>
    %116 = vector.broadcast %115 : vector<128x1xf32> to vector<128x3xf32>
    %117 = arith.select %112, %114, %116 : vector<128x3xi1>, vector<128x3xf32>
    %118 = vector.shape_cast %108 : vector<1x3xi1> to vector<1x3xi1>
    %119 = vector.broadcast %118 : vector<1x3xi1> to vector<128x3xi1>
    %120 = vector.shape_cast %84 : vector<128x1xf32> to vector<128x1xf32>
    %121 = vector.broadcast %120 : vector<128x1xf32> to vector<128x3xf32>
    %122 = arith.select %119, %121, %117 : vector<128x3xi1>, vector<128x3xf32>
    %123 = vector.broadcast %106 : vector<128x1xf32> to vector<128x3xf32>
    %124 = arith.mulf %122, %123 : vector<128x3xf32>
    %125 = arith.index_cast %69 : i32 to index
    %c0_28 = arith.constant 0 : index
    %126 = vector.load %arg4[%125, %c0_28] : memref<256x3xf32, #tpu.memory_space<vmem>>, vector<128x3xf32>
    tpu.vector_store %arg4[%125, %c0_28], %124 {strides = array<i32>} : memref<256x3xf32, #tpu.memory_space<vmem>>, vector<128x3xf32>,
    %c2_i32_29 = arith.constant 2 : i32
    return
  }
  func.func @transform_0(%arg0: i32) -> (i32, i32) {
    %c0_i32 = arith.constant 0 : i32
    %c0_i32_0 = arith.constant 0 : i32
    %c0_i32_1 = arith.constant 0 : i32
    return %c0_i32, %c0_i32_0 : i32, i32
  }
  func.func @transform_1(%arg0: i32) -> (i32, i32) {
    %c0_i32 = arith.constant 0 : i32
    %c0_i32_0 = arith.constant 0 : i32
    return %arg0, %c0_i32 : i32, i32
  }
  func.func @transform_2(%arg0: i32) -> (i32, i32) {
    %c0_i32 = arith.constant 0 : i32
    %c0_i32_0 = arith.constant 0 : i32
    return %arg0, %c0_i32 : i32, i32
  }
  func.func @transform_3(%arg0: i32) -> (i32, i32) {
    %c0_i32 = arith.constant 0 : i32
    %c0_i32_0 = arith.constant 0 : i32
    return %arg0, %c0_i32 : i32, i32
  }
}

</mosaic_0001>

<bundles_post_ra>
// kernel: tpu_custom_call.1
= control target key start
LH: loop header
LB: loop body
LE: loop exit
PB: predicated region body
PF: predicated region fallthrough
CT: control target
= control target key end

     0   :  { %s2837_s18 = smov 127   ;;  %vm183_vm0 = vcmask 1039360   ;;  %vm685_vm8 = vcmask 252928   ;;  %s5925_s0 = inlined_call_operand.vmem [shape: s32[1,160], index: 0, kind: input, shape index: {}]   ;;  %s5926_s1 = inlined_call_operand.vmem [shape: f32[200,160], index: 1, kind: input, shape index: {}]   ;;  %s5927_s2 = inlined_call_operand.vmem [shape: s32[200,1], index: 2, kind: input, shape index: {}]   ;;  %s5928_s3 = inlined_call_operand.vmem [shape: f32[200,3], index: 3, kind: output, shape index: {}]  }
   0x1   :  { %v25_v0 = vld [vmem:[%s5926_s1 + $0x10] sm:$0xff]  ;;  %v23_v1 = vld [vmem:[%s5926_s1] sm:$0xff]  ;;  %v26_v6 = vld [vmem:[%s5926_s1 + $0x18] sm:$0xff] }
   0x2   :  { %v2865_v2 = vmul.f32 %v25_v0, %v25_v0  ;;  %v2867_v3 = vmul.f32 %v23_v1, %v23_v1  ;;  %v27_v4 = vld [vmem:[%s5926_s1 + $0x20] sm:$0xff]  ;;  %v24_v7 = vld [vmem:[%s5926_s1 + $0x8] sm:$0xff]  ;;  %v2889_v9 = vmul.f32 %v26_v6, %v26_v6  ;;  %v30_v12 = vld [vmem:[%s5926_s1 + $0x38] sm:$0xff]  ;;  %v2838_v1 = vmov 0  }
   0x3   :  { %v2872_v5 = vmul.f32 %v27_v4, %v27_v4  ;;  %v28_v8 = vld [vmem:[%s5926_s1 + $0x28] sm:$0xff]  ;;  %v2891_v10 = vmul.f32 %v24_v7, %v24_v7  ;;  %v29_v13 = vld [vmem:[%s5926_s1 + $0x30] sm:$0xff]  ;;  %v31_v14 = vld [vmem:[%s5926_s1 + $0x40] sm:$0xff]  ;;  %v2910_v15 = vmul.f32 %v30_v12, %v30_v12  ;;  %2579 = vset.pattern.permute.xlu2 %v2838_v1  ;;  %2577 = vset.pattern.permute.xlu0 %v2838_v1 }
   0x4   :  { %123 = vrot.lane.b32.xlu1 %v2865_v2, %s2837_s18  ;;  %119 = vrot.lane.b32.xlu0 %v2867_v3, %s2837_s18  ;;  %v2893_v11 = vmul.f32 %v28_v8, %v28_v8  ;;  %v2912_v16 = vmul.f32 %v29_v13, %v29_v13  ;;  %v2914_v17 = vmul.f32 %v31_v14, %v31_v14  ;;  %v33_v18 = vld [vmem:[%s5926_s1 + $0x50] sm:$0xff]  ;;  %v32_v19 = vld [vmem:[%s5926_s1 + $0x48] sm:$0xff] }
   0x5   :  { %127 = vrot.lane.b32.xlu2 %v2872_v5, %s2837_s18  ;;  %v34_v20 = vld [vmem:[%s5926_s1 + $0x58] sm:$0xff]  ;;  %v2931_v21 = vmul.f32 %v33_v18, %v33_v18  ;;  %v2933_v22 = vmul.f32 %v32_v19, %v32_v19  ;;  %v36_v24 = vld [vmem:[%s5926_s1 + $0x68] sm:$0xff]  ;;  %v35_v25 = vld [vmem:[%s5926_s1 + $0x60] sm:$0xff]  ;;  %2578 = vset.pattern.permute.xlu1 %v2838_v1 }
   0x6   :  { %v2935_v23 = vmul.f32 %v34_v20, %v34_v20  ;;  %v37_v26 = vld [vmem:[%s5926_s1 + $0x70] sm:$0xff]  ;;  %v2952_v27 = vmul.f32 %v36_v24, %v36_v24  ;;  %v2954_v28 = vmul.f32 %v35_v25, %v35_v25  ;;  %v39_v30 = vld [vmem:[%s5926_s1 + $0x80] sm:$0xff]  ;;  %v38_v31 = vld [vmem:[%s5926_s1 + $0x78] sm:$0xff] }
   0x7   :  { %v2956_v29 = vmul.f32 %v37_v26, %v37_v26  ;;  %v40_v32 = vld [vmem:[%s5926_s1 + $0x88] sm:$0xff]  ;;  %v2973_v33 = vmul.f32 %v39_v30, %v39_v30  ;;  %v2975_v34 = vmul.f32 %v38_v31, %v38_v31  ;;  %v42_v36 = vld [vmem:[%s5926_s1 + $0x98] sm:$0xff]  ;;  %v41_v37 = vld [vmem:[%s5926_s1 + $0x90] sm:$0xff] }
   0x8   :  { %v2977_v35 = vmul.f32 %v40_v32, %v40_v32  ;;  %v43_v38 = vld [vmem:[%s5926_s1 + $0xa0] sm:$0xff]  ;;  %v2994_v39 = vmul.f32 %v42_v36, %v42_v36  ;;  %v2996_v40 = vmul.f32 %v41_v37, %v41_v37  ;;  %v45_v42 = vld [vmem:[%s5926_s1 + $0xb0] sm:$0xff]  ;;  %v44_v43 = vld [vmem:[%s5926_s1 + $0xa8] sm:$0xff] }
   0x9   :  { %v2998_v41 = vmul.f32 %v43_v38, %v43_v38  ;;  %v46_v44 = vld [vmem:[%s5926_s1 + $0xb8] sm:$0xff]  ;;  %v3015_v45 = vmul.f32 %v45_v42, %v45_v42  ;;  %v3017_v46 = vmul.f32 %v44_v43, %v44_v43  ;;  %v48_v48 = vld [vmem:[%s5926_s1 + $0xc8] sm:$0xff]  ;;  %v47_v49 = vld [vmem:[%s5926_s1 + $0xc0] sm:$0xff] }
   0xa   :  { %v3019_v47 = vmul.f32 %v46_v44, %v46_v44  ;;  %v49_v50 = vld [vmem:[%s5926_s1 + $0xd0] sm:$0xff]  ;;  %v3036_v51 = vmul.f32 %v48_v48, %v48_v48  ;;  %v3038_v52 = vmul.f32 %v47_v49, %v47_v49  ;;  %v51_v54 = vld [vmem:[%s5926_s1 + $0xe0] sm:$0xff]  ;;  %v50_v55 = vld [vmem:[%s5926_s1 + $0xd8] sm:$0xff] }
   0xb   :  { %v3040_v53 = vmul.f32 %v49_v50, %v49_v50  ;;  %v52_v56 = vld [vmem:[%s5926_s1 + $0xe8] sm:$0xff]  ;;  %v3057_v57 = vmul.f32 %v51_v54, %v51_v54  ;;  %v3059_v58 = vmul.f32 %v50_v55, %v50_v55  ;;  %v54_v60 = vld [vmem:[%s5926_s1 + $0xf8] sm:$0xff]  ;;  %v53_v61 = vld [vmem:[%s5926_s1 + $0xf0] sm:$0xff] }
   0xc   :  { %125 = vrot.lane.b32.xlu1 %v2889_v9, %s2837_s18  ;;  %121 = vrot.lane.b32.xlu0 %v2891_v10, %s2837_s18  ;;  %v3061_v59 = vmul.f32 %v52_v56, %v52_v56  ;;  %v3075_v62 = vmul.f32 %v54_v60, %v54_v60  ;;  %v3077_v63 = vmul.f32 %v53_v61, %v53_v61  ;;  %v14_v14 = vld [vmem:[%s5925_s0] sm:$0x3]  ;;  %v5233_v60 = vld [vmem:[%s5926_s1 + $0x130] sm:$0xff] }
   0xd   :  { %129 = vrot.lane.b32.xlu2 %v2893_v11, %s2837_s18  ;;  %vm15_vm1 = vcmp.eq.s32.totalorder %v14_v14, 0 }
  0x14   :  { %133 = vrot.lane.b32.xlu1 %v2910_v15, %s2837_s18  ;;  %131 = vrot.lane.b32.xlu0 %v2912_v16, %s2837_s18 }
  0x15   :  { %135 = vrot.lane.b32.xlu2 %v2914_v17, %s2837_s18 }
  0x1c   :  { %139 = vrot.lane.b32.xlu1 %v2931_v21, %s2837_s18  ;;  %137 = vrot.lane.b32.xlu0 %v2933_v22, %s2837_s18 }
  0x1d   :  { %141 = vrot.lane.b32.xlu2 %v2935_v23, %s2837_s18 }
  0x24   :  { %145 = vrot.lane.b32.xlu1 %v2952_v27, %s2837_s18  ;;  %143 = vrot.lane.b32.xlu0 %v2954_v28, %s2837_s18 }
  0x25   :  { %147 = vrot.lane.b32.xlu2 %v2956_v29, %s2837_s18 }
  0x2c   :  { %151 = vrot.lane.b32.xlu1 %v2973_v33, %s2837_s18  ;;  %149 = vrot.lane.b32.xlu0 %v2975_v34, %s2837_s18 }
  0x2d   :  { %153 = vrot.lane.b32.xlu2 %v2977_v35, %s2837_s18 }
  0x34   :  { %157 = vrot.lane.b32.xlu1 %v2994_v39, %s2837_s18  ;;  %155 = vrot.lane.b32.xlu0 %v2996_v40, %s2837_s18 }
  0x35   :  { %159 = vrot.lane.b32.xlu2 %v2998_v41, %s2837_s18 }
  0x3c   :  { %163 = vrot.lane.b32.xlu1 %v3015_v45, %s2837_s18  ;;  %161 = vrot.lane.b32.xlu0 %v3017_v46, %s2837_s18 }
  0x3d   :  { %165 = vrot.lane.b32.xlu2 %v3019_v47, %s2837_s18 }
  0x44   :  { %169 = vrot.lane.b32.xlu1 %v3036_v51, %s2837_s18  ;;  %167 = vrot.lane.b32.xlu0 %v3038_v52, %s2837_s18 }
  0x45   :  { %171 = vrot.lane.b32.xlu2 %v3040_v53, %s2837_s18 }
  0x4c   :  { %175 = vrot.lane.b32.xlu1 %v3057_v57, %s2837_s18  ;;  %173 = vrot.lane.b32.xlu0 %v3059_v58, %s2837_s18 }
  0x4d   :  { %177 = vrot.lane.b32.xlu2 %v3061_v59, %s2837_s18 }
  0x54   :  { %181 = vrot.lane.b32.xlu1 %v3075_v62, %s2837_s18  ;;  %179 = vrot.lane.b32.xlu0 %v3077_v63, %s2837_s18 }
  0x5f   :  { %v128_v0 = vpop.permute.xlu2 %127 }
  0x67   :  { %v130_v4 = vpop.permute.xlu2 %129 }
  0x68   :  { %v186_v6 = vsel %vm183_vm0, %v128_v0, %v130_v4  ;;  %v237_v7 = vadd.f32 %v130_v4, %v2893_v11 }
  0x69   :  { %v236_v8 = vadd.f32 %v186_v6, %v2872_v5  ;;  %v648_v5 = vsel %vm15_vm1, 1, %v2838_v1 }
  0x6a   :  { %2580 = vrsqrt.f32 %v237_v7  ;;  %v649_v42 = vperm.slane %v648_v5, 0  ;;  %v650_v43 = vperm.slane %v648_v5, 1  ;;  %vm331_vm2 = vcmp.eq.f32.partialorder %v237_v7, inf }
  0x6b   :  { %2582 = vrsqrt.f32 %v236_v8  ;;  %v334_v49 = vand.u32 2147483648, %v237_v7  ;;  %vm319_vm3 = vcmp.eq.f32.partialorder %v236_v8, inf  ;;  %vm333_vm4 = vcmp.eq.f32.partialorder %v237_v7, 0.0 }
  0x6c   :  { %v322_v55 = vand.u32 2147483648, %v236_v8  ;;  %vm321_vm5 = vcmp.eq.f32.partialorder %v236_v8, 0.0  ;;  %vm3101_vm6 = vcmp.eq.s32.totalorder %v649_v42, 1  ;;  %vm3105_vm7 = vcmp.eq.s32.totalorder %v650_v43, 1 }
  0x6f   :  { %v3089_v12 = vpop.permute.xlu2 %135 }
  0x70   :  { %v2581_v13 = vpop.eup %2580 }
  0x71   :  { %v2583_v18 = vpop.eup %2582  ;;  %v325_v19 = vmul.f32 %v2581_v13, %v237_v7 }
  0x72   :  { %v313_v20 = vmul.f32 %v2583_v18, %v236_v8 }
  0x73   :  { %v326_v24 = vmul.f32 %v2581_v13, %v325_v19 }
  0x74   :  { %v314_v25 = vmul.f32 %v2583_v18, %v313_v20 }
  0x75   :  { %v327_v26 = vmul.f32 0.5, %v326_v24 }
  0x76   :  { %v124_v30 = vpop.permute.xlu1 %123  ;;  %v120_v11 = vpop.permute.xlu0 %119  ;;  %v315_v31 = vmul.f32 0.5, %v314_v25 }
  0x77   :  { %v3095_v32 = vpop.permute.xlu2 %141  ;;  %v328_v36 = vsub.f32 1.5, %v327_v26 }
  0x78   :  { %v316_v37 = vsub.f32 1.5, %v315_v31  ;;  %v3099_v44 = vadd.f32 %v3095_v32, %v2935_v23 }
  0x79   :  { %v329_v38 = vmul.f32 %v2581_v13, %v328_v36 }
  0x7a   :  { %v317_v48 = vmul.f32 %v2583_v18, %v316_v37  ;;  %2584 = vrsqrt.f32 %v3099_v44 }
  0x7b   :  { %v330_v50 = vmul.f32 %v329_v38, %v237_v7 }
  0x7c   :  { %v318_v54 = vmul.f32 %v317_v48, %v236_v8 }
  0x7d   :  { %v332_v56 = vsel %vm331_vm2, %v237_v7, %v330_v50 }
  0x7e   :  { %v126_v23 = vpop.permute.xlu1 %125  ;;  %v122_v0 = vpop.permute.xlu0 %121  ;;  %v320_v4 = vsel %vm319_vm3, %v236_v8, %v318_v54  ;;  %v335_v6 = vsel %vm333_vm4, %v334_v49, %v332_v56  ;;  %vm403_vm4 = vcmp.eq.f32.partialorder %v3099_v44, inf }
  0x7f   :  { %v185_v13 = vsel %vm183_vm0, %v124_v30, %v126_v23  ;;  %v3112_v14 = vadd.f32 %v126_v23, %v2889_v9  ;;  %v184_v7 = vsel %vm183_vm0, %v120_v11, %v122_v0  ;;  %v3116_v18 = vadd.f32 %v122_v0, %v2891_v10  ;;  %v3118_v19 = vpop.permute.xlu2 %147 }
  0x80   :  { %v3121_v20 = vadd.f32 %v185_v13, %v2865_v2  ;;  %v3124_v24 = vadd.f32 %v184_v7, %v2867_v3  ;;  %v323_v25 = vsel %vm321_vm5, %v322_v55, %v320_v4  ;;  %v658_v26 = vsel %vm3105_vm7, %v335_v6, 0.0  ;;  %v3135_v2 = vpop.eup %2584 }
  0x81   :  { %2586 = vrsqrt.f32 %v3112_v14  ;;  %v657_v9 = vsel %vm3101_vm6, %v323_v25, 0.0  ;;  %v694_v10 = vsel %vm685_vm8, %v658_v26, 0.0  ;;  %vm307_vm9 = vcmp.eq.f32.partialorder %v3112_v14, inf }
  0x82   :  { %2588 = vrsqrt.f32 %v3116_v18  ;;  %v695_v30 = vadd.f32 %v694_v10, %v657_v9  ;;  %v298_v56 = vand.u32 2147483648, %v3121_v20  ;;  %vm295_vm10 = vcmp.eq.f32.partialorder %v3121_v20, inf }
  0x83   :  { %2590 = vrsqrt.f32 %v3121_v20  ;;  %vm309_vm11 = vcmp.eq.f32.partialorder %v3112_v14, 0.0  ;;  %v397_v6 = vmul.f32 %v3135_v2, %v3099_v44  ;;  %vm297_vm12 = vcmp.eq.f32.partialorder %v3121_v20, 0.0 }
  0x84   :  { %696 = vadd.xlane.f32.xlu1 %v695_v30  ;;  %2592 = vrsqrt.f32 %v3124_v24  ;;  %v310_v9 = vand.u32 2147483648, %v3112_v14  ;;  %v274_v10 = vand.u32 2147483648, %v3124_v24  ;;  %vm271_vm13 = vcmp.eq.f32.partialorder %v3124_v24, inf }
  0x85   :  { %vm283_vm14 = vcmp.eq.f32.partialorder %v3116_v18, inf  ;;  %vm273_vm15 = vcmp.eq.f32.partialorder %v3124_v24, 0.0  ;;  %vm285_vm1 = vcmp.eq.f32.partialorder %v3116_v18, 0.0 }
  0x86   :  { %v134_v3 = vpop.permute.xlu1 %133  ;;  %v132_v8 = vpop.permute.xlu0 %131 }
  0x87   :  { %v2587_v11 = vpop.eup %2586  ;;  %v3139_v31 = vadd.f32 %v134_v3, %v2910_v15  ;;  %v187_v5 = vsel %vm183_vm0, %v132_v8, %v134_v3  ;;  %v3147_v43 = vpop.permute.xlu2 %153 }
  0x88   :  { %v2589_v36 = vpop.eup %2588  ;;  %v3143_v37 = vadd.f32 %v187_v5, %v2912_v16  ;;  %v301_v38 = vmul.f32 %v2587_v11, %v3112_v14  ;;  %v286_v5 = vand.u32 2147483648, %v3116_v18 }
  0x89   :  { %v2591_v42 = vpop.eup %2590  ;;  %2594 = vrsqrt.f32 %v3139_v31  ;;  %v277_v48 = vmul.f32 %v2589_v36, %v3116_v18  ;;  %vm355_vm3 = vcmp.eq.f32.partialorder %v3139_v31, inf  ;;  %vm357_vm5 = vcmp.eq.f32.partialorder %v3139_v31, 0.0 }
  0x8a   :  { %v2593_v49 = vpop.eup %2592  ;;  %2596 = vrsqrt.f32 %v3143_v37  ;;  %v289_v15 = vmul.f32 %v2591_v42, %v3121_v20  ;;  %v302_v50 = vmul.f32 %v2587_v11, %v301_v38  ;;  %vm343_vm2 = vcmp.eq.f32.partialorder %v3143_v37, inf }
  0x8b   :  { %v265_v54 = vmul.f32 %v2593_v49, %v3124_v24  ;;  %v278_v55 = vmul.f32 %v2589_v36, %v277_v48 }
  0x8c   :  { %v290_v16 = vmul.f32 %v2591_v42, %v289_v15  ;;  %v303_v23 = vmul.f32 0.5, %v302_v50 }
  0x8d   :  { %v266_v0 = vmul.f32 %v2593_v49, %v265_v54  ;;  %v279_v4 = vmul.f32 0.5, %v278_v55  ;;  %v406_v54 = vand.u32 2147483648, %v3099_v44 }
  0x8e   :  { %v140_v13 = vpop.permute.xlu1 %139  ;;  %v138_v7 = vpop.permute.xlu0 %137  ;;  %v291_v25 = vmul.f32 0.5, %v290_v16  ;;  %v304_v26 = vsub.f32 1.5, %v303_v23  ;;  %v398_v23 = vmul.f32 %v3135_v2, %v397_v6 }
  0x8f   :  { %v3162_v30 = vpop.eup %2594  ;;  %v189_v3 = vsel %vm183_vm0, %v140_v13, %v3095_v32  ;;  %v267_v8 = vmul.f32 0.5, %v266_v0  ;;  %v280_v55 = vsub.f32 1.5, %v279_v4  ;;  %v3183_v13 = vadd.f32 %v3147_v43, %v2977_v35 }
  0x90   :  { %v2597_v38 = vpop.eup %2596  ;;  %v3170_v48 = vadd.f32 %v189_v3, %v2931_v21  ;;  %v292_v15 = vsub.f32 1.5, %v291_v25  ;;  %v305_v50 = vmul.f32 %v2587_v11, %v304_v26  ;;  %v349_v11 = vmul.f32 %v3162_v30, %v3139_v31  ;;  %v3185_v3 = vpop.permute.xlu2 %159 }
  0x91   :  { %v268_v32 = vsub.f32 1.5, %v267_v8  ;;  %v337_v16 = vmul.f32 %v2597_v38, %v3143_v37  ;;  %v281_v26 = vmul.f32 %v2589_v36, %v280_v55  ;;  %v188_v6 = vsel %vm183_vm0, %v3089_v12, %v138_v7 }
  0x92   :  { %2598 = vrsqrt.f32 %v3170_v48  ;;  %v293_v0 = vmul.f32 %v2591_v42, %v292_v15  ;;  %v306_v21 = vmul.f32 %v305_v50, %v3112_v14  ;;  %v350_v15 = vmul.f32 %v3162_v30, %v349_v11 }
  0x93   :  { %v269_v25 = vmul.f32 %v2593_v49, %v268_v32  ;;  %v338_v4 = vmul.f32 %v2597_v38, %v337_v16  ;;  %v3195_v50 = vadd.f32 %v138_v7, %v2933_v22  ;;  %v282_v49 = vmul.f32 %v281_v26, %v3116_v18 }
  0x94   :  { %v294_v8 = vmul.f32 %v293_v0, %v3121_v20  ;;  %v308_v42 = vsel %vm307_vm9, %v3112_v14, %v306_v21  ;;  %v399_v21 = vmul.f32 0.5, %v398_v23  ;;  %v3207_v22 = vadd.f32 %v188_v6, %v2914_v17 }
  0x95   :  { %v311_v35 = vsel %vm309_vm11, %v310_v9, %v308_v42  ;;  %v270_v36 = vmul.f32 %v269_v25, %v3124_v24  ;;  %v339_v0 = vmul.f32 0.5, %v338_v4  ;;  %v351_v9 = vmul.f32 0.5, %v350_v15 }
  0x96   :  { %v146_v32 = vpop.permute.xlu1 %145  ;;  %v144_v12 = vpop.permute.xlu0 %143  ;;  %v296_v55 = vsel %vm295_vm10, %v3121_v20, %v294_v8  ;;  %v656_v16 = vsel %vm3105_vm7, %v311_v35, 0.0  ;;  %v284_v20 = vsel %vm283_vm14, %v3116_v18, %v282_v49  ;;  %2600 = vrsqrt.f32 %v3195_v50 }
  0x97   :  { %v299_v14 = vsel %vm297_vm12, %v298_v56, %v296_v55  ;;  %v690_v7 = vsel %vm685_vm8, %v656_v16, 0.0  ;;  %v190_v25 = vsel %vm183_vm0, %v144_v12, %v146_v32  ;;  %v272_v17 = vsel %vm271_vm13, %v3124_v24, %v270_v36 }
  0x98   :  { %v3213_v11 = vpop.eup %2598  ;;  %v655_v26 = vsel %vm3101_vm6, %v299_v14, 0.0  ;;  %v275_v23 = vsel %vm273_vm15, %v274_v10, %v272_v17  ;;  %v287_v4 = vsel %vm285_vm1, %v286_v5, %v284_v20  ;;  %vm405_vm9 = vcmp.eq.f32.partialorder %v3099_v44, 0.0 }
  0x99   :  { %v691_v56 = vadd.f32 %v690_v7, %v655_v26  ;;  %v3234_v6 = vadd.f32 %v146_v32, %v2952_v27  ;;  %v653_v8 = vsel %vm3101_vm6, %v275_v23, 0.0  ;;  %v654_v42 = vsel %vm3105_vm7, %v287_v4, 0.0 }
  0x9a   :  { %v340_v15 = vsub.f32 1.5, %v339_v0  ;;  %v3241_v24 = vadd.f32 %v190_v25, %v2954_v28  ;;  %v686_v18 = vsel %vm685_vm8, %v654_v42, 0.0  ;;  %v352_v10 = vsub.f32 1.5, %v351_v9  ;;  %v3250_v28 = vpop.permute.xlu2 %165 }
  0x9b   :  { %692 = vadd.xlane.f32.xlu0 %v691_v56  ;;  %v385_v5 = vmul.f32 %v3213_v11, %v3170_v48  ;;  %v687_v35 = vadd.f32 %v686_v18, %v653_v8  ;;  %v400_v36 = vsub.f32 1.5, %v399_v21  ;;  %2602 = vrsqrt.f32 %v3207_v22 }
  0x9c   :  { %v341_v27 = vmul.f32 %v2597_v38, %v340_v15  ;;  %2604 = vrsqrt.f32 %v3183_v13  ;;  %vm345_vm10 = vcmp.eq.f32.partialorder %v3143_v37, 0.0  ;;  %v353_v49 = vmul.f32 %v3162_v30, %v352_v10  ;;  %v3257_v14 = vpop.eup %2600 }
  0x9d   :  { %v386_v32 = vmul.f32 %v3213_v11, %v385_v5  ;;  %688 = vadd.xlane.f32.xlu2 %v687_v35  ;;  %v346_v38 = vand.u32 2147483648, %v3143_v37  ;;  %v358_v0 = vand.u32 2147483648, %v3139_v31  ;;  %v401_v21 = vmul.f32 %v3135_v2, %v400_v36 }
  0x9e   :  { %v152_v12 = vpop.permute.xlu1 %151  ;;  %v150_v55 = vpop.permute.xlu0 %149  ;;  %v342_v16 = vmul.f32 %v341_v27, %v3143_v37  ;;  %2606 = vrsqrt.f32 %v3241_v24  ;;  %v354_v7 = vmul.f32 %v353_v49, %v3139_v31  ;;  %vm391_vm11 = vcmp.eq.f32.partialorder %v3170_v48, inf }
  0x9f   :  { %v192_v30 = vsel %vm183_vm0, %v152_v12, %v3147_v43  ;;  %2608 = vrsqrt.f32 %v3234_v6  ;;  %v3270_v2 = vadd.f32 %v3250_v28, %v3019_v47  ;;  %v387_v25 = vmul.f32 0.5, %v386_v32 }
  0xa0   :  { %v344_v9 = vsel %vm343_vm2, %v3143_v37, %v342_v16  ;;  %vm393_vm12 = vcmp.eq.f32.partialorder %v3170_v48, 0.0  ;;  %v3274_v26 = vadd.f32 %v192_v30, %v2973_v33  ;;  %v356_v17 = vsel %vm355_vm3, %v3139_v31, %v354_v7 }
  0xa1   :  { %v347_v43 = vsel %vm345_vm10, %v346_v38, %v344_v9  ;;  %v402_v20 = vmul.f32 %v401_v21, %v3099_v44  ;;  %v2603_v56 = vpop.eup %2602  ;;  %v191_v47 = vsel %vm183_vm0, %v3118_v19, %v150_v55  ;;  %v359_v23 = vsel %vm357_vm5, %v358_v0, %v356_v17 }
  0xa2   :  { %v659_v33 = vsel %vm3101_vm6, %v347_v43, 0.0  ;;  %v388_v4 = vsub.f32 1.5, %v387_v25  ;;  %v3288_v8 = vpop.eup %2604  ;;  %v660_v37 = vsel %vm3105_vm7, %v359_v23, 0.0  ;;  %v361_v15 = vmul.f32 %v2603_v56, %v3207_v22  ;;  %v3328_v7 = vpop.permute.xlu2 %171 }
  0xa3   :  { %v404_v42 = vsel %vm403_vm4, %v3099_v44, %v402_v20  ;;  %v373_v19 = vmul.f32 %v3257_v14, %v3195_v50  ;;  %v3299_v31 = vadd.f32 %v150_v55, %v2975_v34  ;;  %v698_v18 = vsel %vm685_vm8, %v660_v37, 0.0 }
  0xa4   :  { %v389_v10 = vmul.f32 %v3213_v11, %v388_v4  ;;  %v407_v5 = vsel %vm405_vm9, %v406_v54, %v404_v42  ;;  %v3307_v35 = vpop.eup %2606  ;;  %2610 = vrsqrt.f32 %v3274_v26  ;;  %v699_v27 = vadd.f32 %v698_v18, %v659_v33 }
  0xa5   :  { %v362_v36 = vmul.f32 %v2603_v56, %v361_v15  ;;  %v374_v49 = vmul.f32 %v3257_v14, %v373_v19  ;;  %v3311_v32 = vpop.eup %2608  ;;  %2612 = vrsqrt.f32 %v3270_v2  ;;  %v394_v55 = vand.u32 2147483648, %v3170_v48 }
  0xa6   :  { %v158_v34 = vpop.permute.xlu1 %157  ;;  %v156_v12 = vpop.permute.xlu0 %155  ;;  %v390_v11 = vmul.f32 %v389_v10, %v3170_v48  ;;  %vm367_vm13 = vcmp.eq.f32.partialorder %v3207_v22, inf  ;;  %700 = vadd.xlane.f32.xlu2 %v699_v27  ;;  %v664_v44 = vsel %vm3105_vm7, %v407_v5, 0.0  ;;  %vm369_vm14 = vcmp.eq.f32.partialorder %v3207_v22, 0.0 }
  0xa7   :  { %v363_v54 = vmul.f32 0.5, %v362_v36  ;;  %v370_v16 = vand.u32 2147483648, %v3207_v22  ;;  %v375_v38 = vmul.f32 0.5, %v374_v49  ;;  %v3322_v0 = vadd.f32 %v191_v47, %v2956_v29 }
  0xa8   :  { %v193_v21 = vsel %vm183_vm0, %v156_v12, %v158_v34  ;;  %v392_v30 = vsel %vm391_vm11, %v3170_v48, %v390_v11  ;;  %v409_v9 = vmul.f32 %v3307_v35, %v3241_v24  ;;  %2614 = vrsqrt.f32 %v3299_v31 }
  0xa9   :  { %v395_v25 = vsel %vm393_vm12, %v394_v55, %v392_v30  ;;  %v364_v43 = vsub.f32 1.5, %v363_v54  ;;  %v376_v17 = vsub.f32 1.5, %v375_v38  ;;  %v3336_v29 = vadd.f32 %v158_v34, %v2994_v39 }
  0xaa   :  { %v663_v20 = vsel %vm3101_vm6, %v395_v25, 0.0  ;;  %v706_v47 = vsel %vm685_vm8, %v664_v44, 0.0  ;;  %v410_v23 = vmul.f32 %v3307_v35, %v409_v9  ;;  %v3342_v33 = vpop.eup %2610  ;;  %v3345_v4 = vadd.f32 %v193_v21, %v2996_v40 }
  0xab   :  { %v707_v37 = vadd.f32 %v706_v47, %v663_v20  ;;  %v365_v48 = vmul.f32 %v2603_v56, %v364_v43  ;;  %v377_v42 = vmul.f32 %v3257_v14, %v376_v17  ;;  %v3348_v15 = vpop.eup %2612  ;;  %vm379_vm15 = vcmp.eq.f32.partialorder %v3195_v50, inf }
  0xac   :  { %vm381_vm1 = vcmp.eq.f32.partialorder %v3195_v50, 0.0  ;;  %v411_v39 = vmul.f32 0.5, %v410_v23  ;;  %v421_v19 = vmul.f32 %v3311_v32, %v3234_v6  ;;  %v382_v10 = vand.u32 2147483648, %v3195_v50 }
  0xad   :  { %708 = vadd.xlane.f32.xlu0 %v707_v37  ;;  %v366_v18 = vmul.f32 %v365_v48, %v3207_v22  ;;  %v378_v40 = vmul.f32 %v377_v42, %v3195_v50  ;;  %vm415_vm2 = vcmp.eq.f32.partialorder %v3241_v24, inf  ;;  %2616 = vrsqrt.f32 %v3336_v29 }
  0xae   :  { %v164_v14 = vpop.permute.xlu1 %163  ;;  %v162_v56 = vpop.permute.xlu0 %161  ;;  %v412_v5 = vsub.f32 1.5, %v411_v39  ;;  %v422_v27 = vmul.f32 %v3311_v32, %v421_v19  ;;  %v457_v36 = vmul.f32 %v3342_v33, %v3274_v26  ;;  %2618 = vrsqrt.f32 %v3345_v4 }
  0xaf   :  { %v3362_v49 = vpop.eup %2614  ;;  %v368_v34 = vsel %vm367_vm13, %v3207_v22, %v366_v18  ;;  %v380_v12 = vsel %vm379_vm15, %v3195_v50, %v378_v40  ;;  %v195_v11 = vsel %vm183_vm0, %v164_v14, %v3250_v28  ;;  %vm417_vm3 = vcmp.eq.f32.partialorder %v3241_v24, 0.0 }
  0xb0   :  { %v371_v55 = vsel %vm369_vm14, %v370_v16, %v368_v34  ;;  %v383_v44 = vsel %vm381_vm1, %v382_v10, %v380_v12  ;;  %v418_v54 = vand.u32 2147483648, %v3241_v24  ;;  %v413_v30 = vmul.f32 %v3307_v35, %v412_v5  ;;  %v3389_v16 = vpop.permute.xlu2 %177 }
  0xb1   :  { %v661_v38 = vsel %vm3101_vm6, %v371_v55, 0.0  ;;  %v662_v21 = vsel %vm3105_vm7, %v383_v44, 0.0  ;;  %vm427_vm4 = vcmp.eq.f32.partialorder %v3234_v6, inf  ;;  %v3387_v28 = vadd.f32 %v195_v11, %v3015_v45 }
  0xb2   :  { %v702_v22 = vsel %vm685_vm8, %v662_v21, 0.0  ;;  %v423_v50 = vmul.f32 0.5, %v422_v27  ;;  %v458_v9 = vmul.f32 %v3342_v33, %v457_v36  ;;  %v194_v43 = vsel %vm183_vm0, %v3185_v3, %v162_v56 }
  0xb3   :  { %v703_v25 = vadd.f32 %v702_v22, %v661_v38  ;;  %v3395_v17 = vadd.f32 %v162_v56, %v3017_v46  ;;  %v414_v35 = vmul.f32 %v413_v30, %v3241_v24  ;;  %v3398_v20 = vpop.eup %2616  ;;  %vm429_vm5 = vcmp.eq.f32.partialorder %v3234_v6, 0.0 }
  0xb4   :  { %v424_v47 = vsub.f32 1.5, %v423_v50  ;;  %v430_v45 = vand.u32 2147483648, %v3234_v6  ;;  %v459_v23 = vmul.f32 0.5, %v458_v9  ;;  %v3402_v37 = vpop.eup %2618  ;;  %v3409_v46 = vadd.f32 %v3389_v16, %v3061_v59 }
  0xb5   :  { %704 = vadd.xlane.f32.xlu2 %v703_v25  ;;  %v416_v3 = vsel %vm415_vm2, %v3241_v24, %v414_v35  ;;  %vm463_vm9 = vcmp.eq.f32.partialorder %v3274_v26, inf  ;;  %v469_v48 = vmul.f32 %v3288_v8, %v3183_v13  ;;  %2620 = vrsqrt.f32 %v3387_v28 }
  0xb6   :  { %v3416_v42 = vadd.f32 %v194_v43, %v2998_v41  ;;  %v425_v39 = vmul.f32 %v3311_v32, %v424_v47  ;;  %v170_v19 = vpop.permute.xlu1 %169  ;;  %v168_v18 = vpop.permute.xlu0 %167  ;;  %v460_v40 = vsub.f32 1.5, %v459_v23  ;;  %2622 = vrsqrt.f32 %v3395_v17 }
  0xb7   :  { %v196_v59 = vsel %vm183_vm0, %v168_v18, %v170_v19  ;;  %vm465_vm10 = vcmp.eq.f32.partialorder %v3274_v26, 0.0  ;;  %v470_v10 = vmul.f32 %v3288_v8, %v469_v48  ;;  %v419_v14 = vsel %vm417_vm3, %v418_v54, %v416_v3 }
  0xb8   :  { %v426_v56 = vmul.f32 %v425_v39, %v3234_v6  ;;  %v461_v41 = vmul.f32 %v3342_v33, %v460_v40  ;;  %2624 = vrsqrt.f32 %v3322_v0  ;;  %v3429_v32 = vadd.f32 %v170_v19, %v3036_v51 }
  0xb9   :  { %2626 = vrsqrt.f32 %v3409_v46  ;;  %v466_v5 = vand.u32 2147483648, %v3274_v26  ;;  %v471_v27 = vmul.f32 0.5, %v470_v10  ;;  %v3437_v24 = vadd.f32 %v196_v59, %v3038_v52 }
  0xba   :  { %v428_v36 = vsel %vm427_vm4, %v3234_v6, %v426_v56  ;;  %v462_v34 = vmul.f32 %v461_v41, %v3274_v26  ;;  %vm475_vm11 = vcmp.eq.f32.partialorder %v3183_v13, inf  ;;  %v665_v33 = vsel %vm3101_vm6, %v419_v14, 0.0 }
  0xbb   :  { %v431_v51 = vsel %vm429_vm5, %v430_v45, %v428_v36  ;;  %v472_v12 = vsub.f32 1.5, %v471_v27  ;;  %v445_v11 = vmul.f32 %v3362_v49, %v3299_v31  ;;  %v3447_v55 = vpop.eup %2620  ;;  %vm477_vm12 = vcmp.eq.f32.partialorder %v3183_v13, 0.0 }
  0xbc   :  { %v666_v52 = vsel %vm3105_vm7, %v431_v51, 0.0  ;;  %v464_v44 = vsel %vm463_vm9, %v3274_v26, %v462_v34  ;;  %v478_v6 = vand.u32 2147483648, %v3183_v13  ;;  %v3456_v54 = vpop.eup %2622  ;;  %2628 = vrsqrt.f32 %v3429_v32 }
  0xbd   :  { %v710_v38 = vsel %vm685_vm8, %v666_v52, 0.0  ;;  %v473_v21 = vmul.f32 %v3288_v8, %v472_v12  ;;  %v446_v30 = vmul.f32 %v3362_v49, %v445_v11  ;;  %2630 = vrsqrt.f32 %v3437_v24 }
  0xbe   :  { %v2625_v22 = vpop.eup %2624  ;;  %v711_v50 = vadd.f32 %v710_v38, %v665_v33  ;;  %v467_v9 = vsel %vm465_vm10, %v466_v5, %v464_v44  ;;  %v176_v25 = vpop.permute.xlu1 %175  ;;  %v481_v35 = vmul.f32 %v3402_v37, %v3345_v4  ;;  %v442_v48 = vand.u32 2147483648, %v3322_v0 }
  0xbf   :  { %v174_v43 = vpop.permute.xlu0 %173  ;;  %v3467_v47 = vpop.eup %2626  ;;  %v474_v45 = vmul.f32 %v473_v21, %v3183_v13  ;;  %v433_v8 = vmul.f32 %v2625_v22, %v3322_v0  ;;  %v447_v23 = vmul.f32 0.5, %v446_v30  ;;  %v198_v3 = vsel %vm183_vm0, %v176_v25, %v3389_v16 }
  0xc0   :  { %712 = vadd.xlane.f32.xlu1 %v711_v50  ;;  %vm451_vm13 = vcmp.eq.f32.partialorder %v3299_v31, inf  ;;  %vm453_vm14 = vcmp.eq.f32.partialorder %v3299_v31, 0.0  ;;  %v482_v26 = vmul.f32 %v3402_v37, %v481_v35  ;;  %v454_v40 = vand.u32 2147483648, %v3299_v31 }
  0xc1   :  { %v476_v39 = vsel %vm475_vm11, %v3183_v13, %v474_v45  ;;  %v434_v19 = vmul.f32 %v2625_v22, %v433_v8  ;;  %v448_v18 = vsub.f32 1.5, %v447_v23  ;;  %v669_v59 = vsel %vm3101_vm6, %v467_v9, 0.0 }
  0xc2   :  { %v479_v16 = vsel %vm477_vm12, %v478_v6, %v476_v39  ;;  %vm439_vm15 = vcmp.eq.f32.partialorder %v3322_v0, inf  ;;  %v3487_v10 = vadd.f32 %v198_v3, %v3057_v57  ;;  %v483_v14 = vmul.f32 0.5, %v482_v26  ;;  %v3489_v56 = vpop.eup %2628 }
  0xc3   :  { %v670_v41 = vsel %vm3105_vm7, %v479_v16, 0.0  ;;  %v435_v5 = vmul.f32 0.5, %v434_v19  ;;  %vm441_vm1 = vcmp.eq.f32.partialorder %v3322_v0, 0.0  ;;  %v449_v13 = vmul.f32 %v3362_v49, %v448_v18  ;;  %v3497_v36 = vpop.eup %2630 }
  0xc4   :  { %v197_v27 = vsel %vm183_vm0, %v3328_v7, %v174_v43  ;;  %v718_v34 = vsel %vm685_vm8, %v670_v41, 0.0  ;;  %v484_v57 = vsub.f32 1.5, %v483_v14  ;;  %vm487_vm2 = vcmp.eq.f32.partialorder %v3345_v4, inf }
  0xc5   :  { %v493_v51 = vmul.f32 %v3398_v20, %v3336_v29  ;;  %v719_v33 = vadd.f32 %v718_v34, %v669_v59  ;;  %v436_v12 = vsub.f32 1.5, %v435_v5  ;;  %v450_v11 = vmul.f32 %v449_v13, %v3299_v31 }
  0xc6   :  { %v3505_v52 = vadd.f32 %v174_v43, %v3059_v58  ;;  %2632 = vrsqrt.f32 %v3487_v10  ;;  %v3509_v7 = vadd.f32 %v197_v27, %v3040_v53  ;;  %v485_v49 = vmul.f32 %v3402_v37, %v484_v57  ;;  %v182_v6 = vpop.permute.xlu1 %181 }
  0xc7   :  { %v494_v44 = vmul.f32 %v3398_v20, %v493_v51  ;;  %v180_v38 = vpop.permute.xlu0 %179  ;;  %720 = vadd.xlane.f32.xlu0 %v719_v33  ;;  %v437_v21 = vmul.f32 %v2625_v22, %v436_v12  ;;  %v452_v30 = vsel %vm451_vm13, %v3299_v31, %v450_v11  ;;  %vm489_vm3 = vcmp.eq.f32.partialorder %v3345_v4, 0.0 }
  0xc8   :  { %v199_v58 = vsel %vm183_vm0, %v180_v38, %v182_v6  ;;  %v455_v53 = vsel %vm453_vm14, %v454_v40, %v452_v30  ;;  %v486_v50 = vmul.f32 %v485_v49, %v3345_v4  ;;  %v3522_v9 = vadd.f32 %v182_v6, %v3075_v62 }
  0xc9   :  { %v495_v37 = vmul.f32 0.5, %v494_v44  ;;  %v438_v25 = vmul.f32 %v437_v21, %v3322_v0  ;;  %v668_v22 = vsel %vm3105_vm7, %v455_v53, 0.0  ;;  %2634 = vrsqrt.f32 %v3505_v52 }
  0xca   :  { %v529_v43 = vmul.f32 %v3447_v55, %v3387_v28  ;;  %v488_v31 = vsel %vm487_vm2, %v3345_v4, %v486_v50  ;;  %v490_v35 = vand.u32 2147483648, %v3345_v4  ;;  %v3535_v62 = vadd.f32 %v199_v58, %v3077_v63 }
  0xcb   :  { %v496_v45 = vsub.f32 1.5, %v495_v37  ;;  %v440_v8 = vsel %vm439_vm15, %v3322_v0, %v438_v25  ;;  %v714_v23 = vsel %vm685_vm8, %v668_v22, 0.0  ;;  %vm499_vm4 = vcmp.eq.f32.partialorder %v3336_v29, inf }
  0xcc   :  { %v530_v3 = vmul.f32 %v3447_v55, %v529_v43  ;;  %v3543_v26 = vpop.eup %2632  ;;  %v443_v39 = vsel %vm441_vm1, %v442_v48, %v440_v8  ;;  %vm501_vm5 = vcmp.eq.f32.partialorder %v3336_v29, 0.0  ;;  %2636 = vrsqrt.f32 %v3522_v9 }
  0xcd   :  { %v497_v19 = vmul.f32 %v3398_v20, %v496_v45  ;;  %v667_v63 = vsel %vm3101_vm6, %v443_v39, 0.0  ;;  %v491_v18 = vsel %vm489_vm3, %v490_v35, %v488_v31  ;;  %v541_v16 = vmul.f32 %v3348_v15, %v3270_v2 }
  0xce   :  { %v531_v40 = vmul.f32 0.5, %v530_v3  ;;  %v715_v59 = vadd.f32 %v714_v23, %v667_v63  ;;  %v502_v48 = vand.u32 2147483648, %v3336_v29  ;;  %2638 = vrsqrt.f32 %v3535_v62 }
  0xcf   :  { %v498_v0 = vmul.f32 %v497_v19, %v3336_v29  ;;  %v3559_v20 = vpop.eup %2634  ;;  %vm535_vm9 = vcmp.eq.f32.partialorder %v3387_v28, inf  ;;  %v542_v41 = vmul.f32 %v3348_v15, %v541_v16  ;;  %2640 = vrsqrt.f32 %v3416_v42 }
  0xd0   :  { %v532_v14 = vsub.f32 1.5, %v531_v40  ;;  %716 = vadd.xlane.f32.xlu2 %v715_v59  ;;  %v671_v5 = vsel %vm3101_vm6, %v491_v18, 0.0  ;;  %vm537_vm10 = vcmp.eq.f32.partialorder %v3387_v28, 0.0  ;;  %v538_v13 = vand.u32 2147483648, %v3387_v28 }
  0xd1   :  { %v500_v4 = vsel %vm499_vm4, %v3336_v29, %v498_v0  ;;  %v543_v57 = vmul.f32 0.5, %v542_v41  ;;  %v517_v51 = vmul.f32 %v3456_v54, %v3395_v17  ;;  %vm547_vm11 = vcmp.eq.f32.partialorder %v3270_v2, inf }
  0xd2   :  { %v503_v27 = vsel %vm501_vm5, %v502_v48, %v500_v4  ;;  %v533_v34 = vmul.f32 %v3447_v55, %v532_v14  ;;  %v3576_v33 = vpop.eup %2636  ;;  %vm549_vm12 = vcmp.eq.f32.partialorder %v3270_v2, 0.0  ;;  %v550_v11 = vand.u32 2147483648, %v3270_v2 }
  0xd3   :  { %v672_v12 = vsel %vm3105_vm7, %v503_v27, 0.0  ;;  %v544_v55 = vsub.f32 1.5, %v543_v57  ;;  %v518_v44 = vmul.f32 %v3456_v54, %v517_v51  ;;  %v514_v21 = vand.u32 2147483648, %v3416_v42 }
  0xd4   :  { %v722_v29 = vsel %vm685_vm8, %v672_v12, 0.0  ;;  %v534_v49 = vmul.f32 %v533_v34, %v3387_v28  ;;  %v3586_v6 = vpop.eup %2638  ;;  %vm523_vm13 = vcmp.eq.f32.partialorder %v3395_v17, inf  ;;  %v553_v30 = vmul.f32 %v3497_v36, %v3437_v24 }
  0xd5   :  { %v723_v38 = vadd.f32 %v722_v29, %v671_v5  ;;  %v2641_v58 = vpop.eup %2640  ;;  %v545_v50 = vmul.f32 %v3348_v15, %v544_v55  ;;  %v519_v37 = vmul.f32 0.5, %v518_v44  ;;  %vm525_vm14 = vcmp.eq.f32.partialorder %v3395_v17, 0.0 }
  0xd6   :  { %v536_v53 = vsel %vm535_vm9, %v3387_v28, %v534_v49  ;;  %v505_v22 = vmul.f32 %v2641_v58, %v3416_v42  ;;  %v554_v43 = vmul.f32 %v3497_v36, %v553_v30  ;;  %v565_v31 = vmul.f32 %v3489_v56, %v3429_v32 }
  0xd7   :  { %724 = vadd.xlane.f32.xlu1 %v723_v38  ;;  %v539_v25 = vsel %vm537_vm10, %v538_v13, %v536_v53  ;;  %v546_v35 = vmul.f32 %v545_v50, %v3270_v2  ;;  %v520_v45 = vsub.f32 1.5, %v519_v37  ;;  %v526_v8 = vand.u32 2147483648, %v3395_v17 }
  0xd8   :  { %vm559_vm15 = vcmp.eq.f32.partialorder %v3437_v24, inf  ;;  %v506_v15 = vmul.f32 %v2641_v58, %v505_v22  ;;  %v555_v23 = vmul.f32 0.5, %v554_v43  ;;  %vm561_vm1 = vcmp.eq.f32.partialorder %v3437_v24, 0.0 }
  0xd9   :  { %v562_v28 = vand.u32 2147483648, %v3437_v24  ;;  %v566_v3 = vmul.f32 %v3489_v56, %v565_v31  ;;  %v548_v39 = vsel %vm547_vm11, %v3270_v2, %v546_v35  ;;  %v675_v19 = vsel %vm3101_vm6, %v539_v25, 0.0 }
  0xda   :  { %vm511_vm2 = vcmp.eq.f32.partialorder %v3416_v42, inf  ;;  %v521_v63 = vmul.f32 %v3456_v54, %v520_v45  ;;  %v601_v18 = vmul.f32 %v3543_v26, %v3487_v10  ;;  %v551_v40 = vsel %vm549_vm12, %v550_v11, %v548_v39 }
  0xdb   :  { %v507_v16 = vmul.f32 0.5, %v506_v15  ;;  %vm513_vm3 = vcmp.eq.f32.partialorder %v3416_v42, 0.0  ;;  %v556_v59 = vsub.f32 1.5, %v555_v23  ;;  %v567_v0 = vmul.f32 0.5, %v566_v3 }
  0xdc   :  { %v676_v48 = vsel %vm3105_vm7, %v551_v40, 0.0  ;;  %v522_v14 = vmul.f32 %v521_v63, %v3395_v17  ;;  %vm571_vm4 = vcmp.eq.f32.partialorder %v3429_v32, inf  ;;  %v602_v54 = vmul.f32 %v3543_v26, %v601_v18 }
  0xdd   :  { %v730_v41 = vsel %vm685_vm8, %v676_v48, 0.0  ;;  %v508_v4 = vsub.f32 1.5, %v507_v16  ;;  %v557_v2 = vmul.f32 %v3497_v36, %v556_v59  ;;  %v568_v5 = vsub.f32 1.5, %v567_v0 }
  0xde   :  { %v731_v13 = vadd.f32 %v730_v41, %v675_v19  ;;  %v524_v27 = vsel %vm523_vm13, %v3395_v17, %v522_v14  ;;  %vm573_vm5 = vcmp.eq.f32.partialorder %v3429_v32, 0.0  ;;  %v603_v34 = vmul.f32 0.5, %v602_v54 }
  0xdf   :  { %v509_v57 = vmul.f32 %v2641_v58, %v508_v4  ;;  %v527_v51 = vsel %vm525_vm14, %v526_v8, %v524_v27  ;;  %v558_v12 = vmul.f32 %v557_v2, %v3437_v24  ;;  %v569_v11 = vmul.f32 %v3489_v56, %v568_v5  ;;  %v3709_v27 = vld [vmem:[%s5925_s0] sm:$0x3] }
  0xe0   :  { %732 = vadd.xlane.f32.xlu0 %v731_v13  ;;  %v674_v36 = vsel %vm3105_vm7, %v527_v51, 0.0  ;;  %v574_v29 = vand.u32 2147483648, %v3429_v32  ;;  %v604_v49 = vsub.f32 1.5, %v603_v34  ;;  %v613_v55 = vmul.f32 %v3467_v47, %v3409_v46 }
  0xe1   :  { %v510_v44 = vmul.f32 %v509_v57, %v3416_v42  ;;  %v560_v17 = vsel %vm559_vm15, %v3437_v24, %v558_v12  ;;  %v570_v38 = vmul.f32 %v569_v11, %v3429_v32  ;;  %vm607_vm9 = vcmp.eq.f32.partialorder %v3487_v10, inf }
  0xe2   :  { %v563_v56 = vsel %vm561_vm1, %v562_v28, %v560_v17  ;;  %v605_v30 = vmul.f32 %v3543_v26, %v604_v49  ;;  %vm609_vm10 = vcmp.eq.f32.partialorder %v3487_v10, 0.0  ;;  %v614_v58 = vmul.f32 %v3467_v47, %v613_v55 }
  0xe3   :  { %v512_v53 = vsel %vm511_vm2, %v3416_v42, %v510_v44  ;;  %v726_v50 = vsel %vm685_vm8, %v674_v36, 0.0  ;;  %v572_v37 = vsel %vm571_vm4, %v3429_v32, %v570_v38  ;;  %v677_v24 = vsel %vm3101_vm6, %v563_v56, 0.0 }
  0xe4   :  { %v515_v26 = vsel %vm513_vm3, %v514_v21, %v512_v53  ;;  %v575_v25 = vsel %vm573_vm5, %v574_v29, %v572_v37  ;;  %v606_v22 = vmul.f32 %v605_v30, %v3487_v10  ;;  %v615_v43 = vmul.f32 0.5, %v614_v58 }
  0xe5   :  { %v673_v31 = vsel %vm3101_vm6, %v515_v26, 0.0  ;;  %v678_v35 = vsel %vm3105_vm7, %v575_v25, 0.0  ;;  %v610_v45 = vand.u32 2147483648, %v3487_v10  ;;  %2642 = vrsqrt.f32 %v3509_v7  ;;  %v3744_v26 = vld [vmem:[%s5926_s1 + $0x18] sm:$0xff] }
  0xe6   :  { %v727_v8 = vadd.f32 %v726_v50, %v673_v31  ;;  %v734_v42 = vsel %vm685_vm8, %v678_v35, 0.0  ;;  %v608_v32 = vsel %vm607_vm9, %v3487_v10, %v606_v22  ;;  %v616_v21 = vsub.f32 1.5, %v615_v43 }
  0xe7   :  { %v735_v15 = vadd.f32 %v734_v42, %v677_v24  ;;  %v611_v23 = vsel %vm609_vm10, %v610_v45, %v608_v32  ;;  %v589_v3 = vmul.f32 %v3559_v20, %v3505_v52  ;;  %vm619_vm11 = vcmp.eq.f32.partialorder %v3409_v46, inf }
  0xe8   :  { %728 = vadd.xlane.f32.xlu2 %v727_v8  ;;  %v617_v28 = vmul.f32 %v3467_v47, %v616_v21  ;;  %v622_v39 = vand.u32 2147483648, %v3409_v46  ;;  %v625_v19 = vmul.f32 %v3586_v6, %v3535_v62  ;;  %vm621_vm12 = vcmp.eq.f32.partialorder %v3409_v46, 0.0 }
  0xe9   :  { %736 = vadd.xlane.f32.xlu1 %v735_v15  ;;  %v681_v10 = vsel %vm3101_vm6, %v611_v23, 0.0  ;;  %v590_v47 = vmul.f32 %v3559_v20, %v589_v3  ;;  %vm595_vm13 = vcmp.eq.f32.partialorder %v3505_v52, inf  ;;  %v598_v40 = vand.u32 2147483648, %v3505_v52 }
  0xea   :  { %v618_v63 = vmul.f32 %v617_v28, %v3409_v46  ;;  %v626_v16 = vmul.f32 %v3586_v6, %v625_v19  ;;  %v637_v59 = vmul.f32 %v3576_v33, %v3522_v9  ;;  %vm597_vm14 = vcmp.eq.f32.partialorder %v3505_v52, 0.0 }
  0xeb   :  { %v2643_v18 = vpop.eup %2642  ;;  %v591_v14 = vmul.f32 0.5, %v590_v47  ;;  %vm631_vm15 = vcmp.eq.f32.partialorder %v3535_v62, inf  ;;  %vm633_vm1 = vcmp.eq.f32.partialorder %v3535_v62, 0.0  ;;  %v634_v4 = vand.u32 2147483648, %v3535_v62 }
  0xec   :  { %v620_v0 = vsel %vm619_vm11, %v3409_v46, %v618_v63  ;;  %v577_v48 = vmul.f32 %v2643_v18, %v3509_v7  ;;  %v627_v41 = vmul.f32 0.5, %v626_v16  ;;  %v638_v2 = vmul.f32 %v3576_v33, %v637_v59  ;;  %v3797_v16 = vld [vmem:[%s5926_s1 + $0x40] sm:$0xff] }
  0xed   :  { %v623_v54 = vsel %vm621_vm12, %v622_v39, %v620_v0  ;;  %v592_v46 = vsub.f32 1.5, %v591_v14  ;;  %vm16_vm2 = vcmp.eq.s32.totalorder %v3709_v27, 2  ;;  %vm583_vm3 = vcmp.eq.f32.partialorder %v3509_v7, inf  ;;  %v3805_v0 = vld [vmem:[%s5926_s1 + $0x48] sm:$0xff] }
  0xee   :  { %v682_v5 = vsel %vm3105_vm7, %v623_v54, 0.0  ;;  %v578_v13 = vmul.f32 %v2643_v18, %v577_v48  ;;  %v628_v57 = vsub.f32 1.5, %v627_v41  ;;  %v639_v51 = vmul.f32 0.5, %v638_v2  ;;  %v3814_v54 = vld [vmem:[%s5926_s1] sm:$0xff] }
  0xef   :  { %v742_v34 = vsel %vm685_vm8, %v682_v5, 0.0  ;;  %v750_v12 = vsel %vm16_vm2, 1, %v2838_v1  ;;  %v593_v29 = vmul.f32 %v3559_v20, %v592_v46  ;;  %vm643_vm4 = vcmp.eq.f32.partialorder %v3522_v9, inf  ;;  %v3823_v2 = vld [vmem:[%s5926_s1 + $0x20] sm:$0xff] }
  0xf0   :  { %v743_v11 = vadd.f32 %v742_v34, %v681_v10  ;;  %v579_v36 = vmul.f32 0.5, %v578_v13  ;;  %v751_v49 = vperm.slane %v750_v12, 0  ;;  %v629_v55 = vmul.f32 %v3586_v6, %v628_v57  ;;  %v3732_v6 = vld [vmem:[%s5926_s1 + $0x10] sm:$0xff]  ;;  %v3789_v10 = vld [vmem:[%s5926_s1 + $0x28] sm:$0xff]  ;;  %v3832_v34 = vld [vmem:[%s5926_s1 + $0x78] sm:$0xff] }
  0xf1   :  { %v640_v44 = vsub.f32 1.5, %v639_v51  ;;  %v752_v17 = vperm.slane %v750_v12, 1  ;;  %v594_v56 = vmul.f32 %v593_v29, %v3505_v52  ;;  %vm5930_vm9 = vcmask 261120   ;;  %v3848_v29 = vld [vmem:[%s5926_s1 + $0x58] sm:$0xff] }
  0xf2   :  { %744 = vadd.xlane.f32.xlu0 %v743_v11  ;;  %v580_v38 = vsub.f32 1.5, %v579_v36  ;;  %vm3719_vm5 = vcmp.eq.s32.totalorder %v751_v49, 1  ;;  %v630_v58 = vmul.f32 %v629_v55, %v3535_v62  ;;  %vm585_vm11 = vcmp.eq.f32.partialorder %v3509_v7, 0.0  ;;  %v3840_v11 = vld [vmem:[%s5926_s1 + $0x38] sm:$0xff]  ;;  %v3856_v55 = vld [vmem:[%s5926_s1 + $0x70] sm:$0xff] }
  0xf3   :  { %v641_v20 = vmul.f32 %v3576_v33, %v640_v44  ;;  %vm3725_vm10 = vcmp.eq.s32.totalorder %v752_v17, 1  ;;  %v757_v50 = vsel %vm3719_vm5, %v3732_v6, 0.0  ;;  %v596_v24 = vsel %vm595_vm13, %v3505_v52, %v594_v56 }
  0xf4   :  { %v581_v37 = vmul.f32 %v2643_v18, %v580_v38  ;;  %v646_v33 = vand.u32 2147483648, %v3522_v9  ;;  %v758_v25 = vsel %vm3725_vm10, %v3744_v26, 0.0  ;;  %v599_v22 = vsel %vm597_vm14, %v598_v40, %v596_v24  ;;  %v3865_v38 = vld [vmem:[%s5926_s1 + $0x30] sm:$0xff] }
  0xf5   :  { %v632_v43 = vsel %vm631_vm15, %v3535_v62, %v630_v58  ;;  %v642_v31 = vmul.f32 %v641_v20, %v3522_v9  ;;  %v792_v35 = vsel %vm5930_vm9, %v758_v25, 0.0  ;;  %v680_v8 = vsel %vm3105_vm7, %v599_v22, 0.0  ;;  %v3874_v20 = vld [vmem:[%s5926_s1 + $0x50] sm:$0xff] }
  0xf6   :  { %v582_v45 = vmul.f32 %v581_v37, %v3509_v7  ;;  %v635_v42 = vsel %vm633_vm1, %v634_v4, %v632_v43  ;;  %v793_v32 = vadd.f32 %v792_v35, %v757_v50  ;;  %v586_v52 = vand.u32 2147483648, %v3509_v7 }
  0xf7   :  { %v644_v21 = vsel %vm643_vm4, %v3522_v9, %v642_v31  ;;  %vm645_vm12 = vcmp.eq.f32.partialorder %v3522_v9, 0.0  ;;  %v738_v23 = vsel %vm685_vm8, %v680_v8, 0.0  ;;  %v683_v62 = vsel %vm3101_vm6, %v635_v42, 0.0  ;;  %v3891_v31 = vld [vmem:[%s5926_s1 + $0x68] sm:$0xff]  ;;  %v3907_v42 = vld [vmem:[%s5926_s1 + $0xa0] sm:$0xff] }
  0xf8   :  { %v584_v15 = vsel %vm583_vm3, %v3509_v7, %v582_v45  ;;  %v647_v28 = vsel %vm645_vm12, %v646_v33, %v644_v21  ;;  %v3781_v7 = vld [vmem:[%s5926_s1 + $0x8] sm:$0xff]  ;;  %v760_v47 = vsel %vm3725_vm10, %v3789_v10, 0.0  ;;  %v763_v59 = vsel %vm3719_vm5, %v3797_v16, 0.0  ;;  %v3917_v21 = vld [vmem:[%s5926_s1 + $0x60] sm:$0xff] }
  0xf9   :  { %v587_v3 = vsel %vm585_vm11, %v586_v52, %v584_v15  ;;  %v684_v39 = vsel %vm3105_vm7, %v647_v28, 0.0  ;;  %v756_v9 = vsel %vm3725_vm10, %v3781_v7, 0.0  ;;  %v764_v48 = vsel %vm3725_vm10, %v3805_v0, 0.0  ;;  %v3883_v33 = vld [vmem:[%s5926_s1 + $0xa8] sm:$0xff] }
  0xfa   :  { %v679_v19 = vsel %vm3101_vm6, %v587_v3, 0.0  ;;  %v746_v63 = vsel %vm685_vm8, %v684_v39, 0.0  ;;  %794 = vadd.xlane.f32.xlu0 %v793_v32  ;;  %v804_v14 = vsel %vm5930_vm9, %v764_v48, 0.0  ;;  %v755_v41 = vsel %vm3719_vm5, %v3814_v54, 0.0  ;;  %v3899_v45 = vld [vmem:[%s5926_s1 + $0x88] sm:$0xff] }
  0xfb   :  { %v739_v18 = vadd.f32 %v738_v23, %v679_v19  ;;  %v747_v40 = vadd.f32 %v746_v63, %v683_v62  ;;  %v788_v4 = vsel %vm5930_vm9, %v756_v9, 0.0  ;;  %v759_v5 = vsel %vm3719_vm5, %v3823_v2, 0.0  ;;  %v3925_v23 = vld [vmem:[%s5926_s1 + $0x80] sm:$0xff]  ;;  %v3936_v19 = vld [vmem:[%s5926_s1 + $0xd8] sm:$0xff] }
  0xfc   :  { %v796_v13 = vsel %vm5930_vm9, %v760_v47, 0.0  ;;  %v805_v46 = vadd.f32 %v804_v14, %v763_v59  ;;  %v770_v57 = vsel %vm3725_vm10, %v3832_v34, 0.0  ;;  %v789_v51 = vadd.f32 %v788_v4, %v755_v41  ;;  %v3952_v59 = vld [vmem:[%s5926_s1 + $0xb8] sm:$0xff]  ;;  %v3960_v14 = vld [vmem:[%s5926_s1 + $0xd0] sm:$0xff] }
  0xfd   :  { %740 = vadd.xlane.f32.xlu2 %v739_v18  ;;  %748 = vadd.xlane.f32.xlu1 %v747_v40  ;;  %v797_v12 = vadd.f32 %v796_v13, %v759_v5  ;;  %v762_v36 = vsel %vm3725_vm10, %v3840_v11, 0.0  ;;  %v766_v49 = vsel %vm3725_vm10, %v3848_v29, 0.0  ;;  %v769_v44 = vsel %vm3719_vm5, %v3856_v55, 0.0  ;;  %v3944_v40 = vld [vmem:[%s5926_s1 + $0x98] sm:$0xff]  ;;  %v3969_v13 = vld [vmem:[%s5926_s1 + $0x90] sm:$0xff] }
  0xfe   :  { %v816_v17 = vsel %vm5930_vm9, %v770_v57, 0.0  ;;  %v761_v56 = vsel %vm3719_vm5, %v3865_v38, 0.0  ;;  %v800_v58 = vsel %vm5930_vm9, %v762_v36, 0.0  ;;  %v765_v50 = vsel %vm3719_vm5, %v3874_v20, 0.0 }
  0xff   :  { %v808_v37 = vsel %vm5930_vm9, %v766_v49, 0.0  ;;  %v817_v24 = vadd.f32 %v816_v17, %v769_v44  ;;  %v776_v25 = vsel %vm3725_vm10, %v3883_v33, 0.0  ;;  %v801_v22 = vadd.f32 %v800_v58, %v761_v56  ;;  %v956_v17 = vld [vmem:[%s5927_s2 + $0x18] sm:$0xff] }
 0x100   :  { %v809_v43 = vadd.f32 %v808_v37, %v765_v50  ;;  %v768_v35 = vsel %vm3725_vm10, %v3891_v31, 0.0  ;;  %v772_v8 = vsel %vm3725_vm10, %v3899_v45, 0.0  ;;  %v775_v32 = vsel %vm3719_vm5, %v3907_v42, 0.0  ;;  %v3998_v37 = vld [vmem:[%s5926_s1 + $0xc8] sm:$0xff] }
 0x101   :  { %v828_v52 = vsel %vm5930_vm9, %v776_v25, 0.0  ;;  %vm17_vm13 = vcmp.eq.s32.totalorder %v3709_v27, 3  ;;  %v767_v15 = vsel %vm3719_vm5, %v3917_v21, 0.0  ;;  %v771_v27 = vsel %vm3719_vm5, %v3925_v23, 0.0  ;;  %v4006_v25 = vld [vmem:[%s5926_s1 + $0xe8] sm:$0xff] }
 0x102   :  { %806 = vadd.xlane.f32.xlu0 %v805_v46  ;;  %v812_v28 = vsel %vm5930_vm9, %v768_v35, 0.0  ;;  %v820_v62 = vsel %vm5930_vm9, %v772_v8, 0.0  ;;  %v829_v3 = vadd.f32 %v828_v52, %v775_v32  ;;  %v852_v39 = vsel %vm17_vm13, 1, %v2838_v1  ;;  %v4018_v35 = vld [vmem:[%s5926_s1 + $0xc0] sm:$0xff] }
 0x103   :  { %v782_v63 = vsel %vm3725_vm10, %v3936_v19, 0.0  ;;  %v813_v9 = vadd.f32 %v812_v28, %v767_v15  ;;  %v821_v47 = vadd.f32 %v820_v62, %v771_v27  ;;  %v854_v18 = vperm.slane %v852_v39, 1  ;;  %v4027_v52 = vld [vmem:[%s5926_s1 + $0xe0] sm:$0xff] }
 0x104   :  { %v774_v1 = vsel %vm3725_vm10, %v3944_v40, 0.0  ;;  %v778_v48 = vsel %vm3725_vm10, %v3952_v59, 0.0  ;;  %v781_v41 = vsel %vm3719_vm5, %v3960_v14, 0.0  ;;  %v840_v4 = vsel %vm5930_vm9, %v782_v63, 0.0 }
 0x105   :  { %790 = vadd.xlane.f32.xlu2 %v789_v51  ;;  %798 = vadd.xlane.f32.xlu1 %v797_v12  ;;  %v853_v5 = vperm.slane %v852_v39, 0  ;;  %v773_v46 = vsel %vm3719_vm5, %v3969_v13, 0.0  ;;  %vm3974_vm14 = vcmp.eq.s32.totalorder %v854_v18, 1  ;;  %v824_v51 = vsel %vm5930_vm9, %v774_v1, 0.0  ;;  %v3982_v12 = vld [vmem:[%s5926_s1 + $0xb0] sm:$0xff]  ;;  %v4039_v39 = vld [vmem:[%s5926_s1 + $0xf8] sm:$0xff] }
 0x106   :  { %v777_v36 = vsel %vm3719_vm5, %v3982_v12, 0.0  ;;  %v832_v49 = vsel %vm5930_vm9, %v778_v48, 0.0  ;;  %v841_v44 = vadd.f32 %v840_v4, %v781_v41  ;;  %v858_v56 = vsel %vm3974_vm14, %v3781_v7, 0.0  ;;  %v4054_v18 = vld [vmem:[%s5926_s1 + $0xf0] sm:$0xff] }
 0x107   :  { %vm3988_vm15 = vcmp.eq.s32.totalorder %v853_v5, 1  ;;  %v825_v58 = vadd.f32 %v824_v51, %v773_v46  ;;  %v833_v50 = vadd.f32 %v832_v49, %v777_v36  ;;  %v784_v7 = vsel %vm3725_vm10, %v4006_v25, 0.0 }
 0x108   :  { %v779_v8 = vsel %vm3719_vm5, %v4018_v35, 0.0  ;;  %v844_v15 = vsel %vm5930_vm9, %v784_v7, 0.0  ;;  %v864_v28 = vsel %vm3974_vm14, %v3840_v11, 0.0  ;;  %v786_v63 = vsel %vm3725_vm10, %v4039_v39, 0.0 }
 0x109   :  { %v863_v11 = vsel %vm3988_vm15, %v3865_v38, 0.0  ;;  %v785_v1 = vsel %vm3719_vm5, %v4054_v18, 0.0  ;;  %v848_v48 = vsel %vm5930_vm9, %v786_v63, 0.0  ;;  %v870_v4 = vsel %vm3974_vm14, %v3891_v31, 0.0 }
 0x10a   :  { %818 = vadd.xlane.f32.xlu0 %v817_v24  ;;  %v780_v24 = vsel %vm3725_vm10, %v3998_v37, 0.0  ;;  %v849_v5 = vadd.f32 %v848_v48, %v785_v1  ;;  %v862_v51 = vsel %vm3974_vm14, %v3789_v10, 0.0  ;;  %v866_v36 = vsel %vm3974_vm14, %v3805_v0, 0.0 }
 0x10b   :  { %v836_v32 = vsel %vm5930_vm9, %v780_v24, 0.0  ;;  %v913_v49 = vsel %vm5930_vm9, %v870_v4, 0.0  ;;  %v861_v31 = vsel %vm3988_vm15, %v3823_v2, 0.0  ;;  %v865_v10 = vsel %vm3988_vm15, %v3797_v16, 0.0 }
 0x10c   :  { %v837_v62 = vadd.f32 %v836_v32, %v779_v8  ;;  %v905_v0 = vsel %vm5930_vm9, %v866_v36, 0.0  ;;  %v868_v2 = vsel %vm3974_vm14, %v3848_v29, 0.0  ;;  %v872_v24 = vsel %vm3974_vm14, %v3832_v34, 0.0 }
 0x10d   :  { %802 = vadd.xlane.f32.xlu2 %v801_v22  ;;  %810 = vadd.xlane.f32.xlu1 %v809_v43  ;;  %v857_v22 = vsel %vm3988_vm15, %v3814_v54, 0.0  ;;  %v889_v43 = vsel %vm5930_vm9, %v858_v56, 0.0  ;;  %v783_v54 = vsel %vm3719_vm5, %v4027_v52, 0.0  ;;  %v875_v16 = vsel %vm3988_vm15, %v3969_v13, 0.0 }
 0x10e   :  { %v890_v27 = vadd.f32 %v889_v43, %v857_v22  ;;  %v909_v22 = vsel %vm5930_vm9, %v868_v2, 0.0  ;;  %v871_v29 = vsel %vm3988_vm15, %v3856_v55, 0.0  ;;  %v917_v34 = vsel %vm5930_vm9, %v872_v24, 0.0  ;;  %v2530_v2 = vld [vmem:[%s5926_s1 + $0x118] sm:$0xff]  ;;  %v2535_v24 = vld [vmem:[%s5926_s1 + $0x140] sm:$0xff] }
 0x10f   :  { %v882_v13 = vsel %vm3974_vm14, %v3998_v37, 0.0  ;;  %v918_v32 = vadd.f32 %v917_v34, %v871_v29  ;;  %v881_v55 = vsel %vm3988_vm15, %v4018_v35, 0.0  ;;  %v873_v37 = vsel %vm3988_vm15, %v3925_v23, 0.0 }
 0x110   :  { %v888_v35 = vsel %vm3974_vm14, %v4039_v39, 0.0  ;;  %v880_v23 = vsel %vm3974_vm14, %v3952_v59, 0.0  ;;  %v884_v63 = vsel %vm3974_vm14, %v3936_v19, 0.0  ;;  %v4142_v39 = vpop.xlane.xlu0 %692  ;;  %v879_v59 = vsel %vm3988_vm15, %v3982_v12, 0.0 }
 0x111   :  { %5944 = vst [vmem:[#allocation4_spill] sm:$0xff] %v4142_v39  ;;  %v883_v19 = vsel %vm3988_vm15, %v3960_v14, 0.0  ;;  %v885_v14 = vsel %vm3988_vm15, %v4027_v52, 0.0  ;;  %v2527_v52 = vld [vmem:[%s5926_s1 + $0x100] sm:$0xff]  ;;  %v4217_v29 = vmul.f32 %v2535_v24, %v2535_v24  ;;  %v1945_v61 = vsel %vm3719_vm5, %v5233_v60, 0.0 }
 0x112   :  { %830 = vadd.xlane.f32.xlu0 %v829_v3  ;;  %v845_v3 = vadd.f32 %v844_v15, %v783_v54  ;;  %v878_v54 = vsel %vm3974_vm14, %v3883_v33, 0.0  ;;  %v937_v15 = vsel %vm5930_vm9, %v882_v13, 0.0  ;;  %v2533_v13 = vld [vmem:[%s5926_s1 + $0x130] sm:$0xff] }
 0x113   :  { %v929_v33 = vsel %vm5930_vm9, %v878_v54, 0.0 }
 0x115   :  { %814 = vadd.xlane.f32.xlu2 %v813_v9  ;;  %822 = vadd.xlane.f32.xlu1 %v821_v47  ;;  %v860_v9 = vsel %vm3974_vm14, %v3744_v26, 0.0  ;;  %v901_v47 = vsel %vm5930_vm9, %v864_v28, 0.0  ;;  %v859_v26 = vsel %vm3988_vm15, %v3732_v6, 0.0  ;;  %v869_v6 = vsel %vm3988_vm15, %v3917_v21, 0.0 }
 0x116   :  { %v893_v38 = vsel %vm5930_vm9, %v860_v9, 0.0  ;;  %v902_v41 = vadd.f32 %v901_v47, %v863_v11  ;;  %v914_v56 = vadd.f32 %v913_v49, %v869_v6  ;;  %v876_v21 = vsel %vm3974_vm14, %v3944_v40, 0.0  ;;  %v4140_v11 = vpop.xlane.xlu2 %688 }
 0x117   :  { %v894_v46 = vadd.f32 %v893_v38, %v859_v26  ;;  %v925_v7 = vsel %vm5930_vm9, %v876_v21, 0.0  ;;  %v867_v40 = vsel %vm3988_vm15, %v3874_v20, 0.0  ;;  %v874_v20 = vsel %vm3974_vm14, %v3899_v45, 0.0  ;;  %5943 = vst [vmem:[#allocation3_spill] sm:$0xff] %v4140_v11 }
 0x118   :  { %v926_v43 = vadd.f32 %v925_v7, %v875_v16  ;;  %v910_v8 = vadd.f32 %v909_v22, %v867_v40  ;;  %v877_v45 = vsel %vm3988_vm15, %v3907_v42, 0.0  ;;  %v938_v28 = vadd.f32 %v937_v15, %v881_v55 }
 0x119   :  { %v887_v42 = vsel %vm3988_vm15, %v4054_v18, 0.0  ;;  %v949_v9 = vsel %vm5930_vm9, %v888_v35, 0.0  ;;  %v933_v47 = vsel %vm5930_vm9, %v880_v23, 0.0  ;;  %v941_v18 = vsel %vm5930_vm9, %v884_v63, 0.0 }
 0x11a   :  { %842 = vadd.xlane.f32.xlu0 %v841_v44  ;;  %v897_v44 = vsel %vm5930_vm9, %v862_v51, 0.0  ;;  %v950_v1 = vadd.f32 %v949_v9, %v887_v42  ;;  %v934_v48 = vadd.f32 %v933_v47, %v879_v59  ;;  %v942_v26 = vadd.f32 %v941_v18, %v883_v19  ;;  %v2537_v42 = vld [vmem:[%s5926_s1 + $0x150] sm:$0xff]  ;;  %v2539_v9 = vld [vmem:[%s5926_s1 + $0x160] sm:$0xff]  ;;  %v2544_v59 = vld [vmem:[%s5926_s1 + $0x188] sm:$0xff] }
 0x11b   :  { %v886_v38 = vsel %vm3974_vm14, %v4006_v25, 0.0  ;;  %v2529_v25 = vld [vmem:[%s5926_s1 + $0x110] sm:$0xff]  ;;  %v4215_v22 = vmul.f32 %v2530_v2, %v2530_v2  ;;  %v4242_v55 = vmul.f32 %v2533_v13, %v2533_v13  ;;  %v4290_v18 = vmul.f32 %v2537_v42, %v2537_v42 }
 0x11c   :  { %v945_v4 = vsel %vm5930_vm9, %v886_v38, 0.0  ;;  %v4174_v49 = vmul.f32 %v2529_v25, %v2529_v25  ;;  %v2540_v38 = vld [vmem:[%s5926_s1 + $0x168] sm:$0xff]  ;;  %v18_v2 = vlaneseq  ;;  %v2545_v13 = vld [vmem:[%s5926_s1 + $0x190] sm:$0xff] }
 0x11d   :  { %826 = vadd.xlane.f32.xlu2 %v825_v58  ;;  %834 = vadd.xlane.f32.xlu1 %v833_v50  ;;  %v898_v58 = vadd.f32 %v897_v44, %v861_v31  ;;  %v906_v50 = vadd.f32 %v905_v0, %v865_v10  ;;  %v2532_v44 = vld [vmem:[%s5926_s1 + $0x128] sm:$0xff] }
 0x11e   :  { %v4157_v12 = vpop.xlane.xlu2 %700  ;;  %v4192_v21 = vmul.f32 %v2532_v44, %v2532_v44 }
 0x11f   :  { %5946 = vst [vmem:[#allocation6_spill] sm:$0xff] %v4157_v12 }
 0x122   :  { %891 = vadd.xlane.f32.xlu0 %v890_v27  ;;  %v921_v27 = vsel %vm5930_vm9, %v874_v20, 0.0 }
 0x125   :  { %838 = vadd.xlane.f32.xlu2 %v837_v62  ;;  %846 = vadd.xlane.f32.xlu1 %v845_v3  ;;  %v922_v62 = vadd.f32 %v921_v27, %v873_v37  ;;  %v930_v3 = vadd.f32 %v929_v33, %v877_v45  ;;  %v2534_v27 = vld [vmem:[%s5926_s1 + $0x138] sm:$0xff]  ;;  %v2536_v45 = vld [vmem:[%s5926_s1 + $0x148] sm:$0xff]  ;;  %v2541_v33 = vld [vmem:[%s5926_s1 + $0x170] sm:$0xff] }
 0x126   :  { %v4269_v23 = vmul.f32 %v2541_v33, %v2541_v33 }
 0x128   :  { %v4170_v36 = vpop.xlane.xlu2 %704 }
 0x129   :  { %5949 = vst [vmem:[#allocation9_spill] sm:$0xff] %v4170_v36 }
 0x12a   :  { %903 = vadd.xlane.f32.xlu0 %v902_v41  ;;  %v4155_v41 = vpop.xlane.xlu0 %708 }
 0x12b   :  { %5945 = vst [vmem:[#allocation5_spill] sm:$0xff] %v4155_v41 }
 0x12d   :  { %850 = vadd.xlane.f32.xlu2 %v849_v5  ;;  %895 = vadd.xlane.f32.xlu1 %v894_v46  ;;  %v4163_v5 = vpop.xlane.xlu1 %696  ;;  %v946_v46 = vadd.f32 %v945_v4, %v885_v14  ;;  %v2542_v14 = vld [vmem:[%s5926_s1 + $0x178] sm:$0xff]  ;;  %v2547_v4 = vld [vmem:[%s5926_s1 + $0x1a0] sm:$0xff] }
 0x12e   :  { %5947 = vst [vmem:[#allocation7_spill] sm:$0xff] %v4163_v5  ;;  %v4317_v44 = vmul.f32 %v2542_v14, %v2542_v14 }
 0x132   :  { %915 = vadd.xlane.f32.xlu0 %v914_v56  ;;  %v4190_v56 = vmul.f32 %v2527_v52, %v2527_v52  ;;  %v4315_v52 = vmul.f32 %v2540_v38, %v2540_v38 }
 0x135   :  { %899 = vadd.xlane.f32.xlu2 %v898_v58  ;;  %907 = vadd.xlane.f32.xlu1 %v906_v50  ;;  %v4172_v6 = vpop.xlane.xlu1 %712  ;;  %v2528_v50 = vld [vmem:[%s5926_s1 + $0x108] sm:$0xff] }
 0x136   :  { %5950 = vst [vmem:[#allocation10_spill] sm:$0xff] %v4172_v6  ;;  %v4213_v40 = vmul.f32 %v2528_v50, %v2528_v50  ;;  %v4319_v50 = vmul.f32 %v2547_v4, %v2547_v4  ;;  %v2546_v4 = vld [vmem:[%s5926_s1 + $0x198] sm:$0xff] }
 0x13a   :  { %927 = vadd.xlane.f32.xlu0 %v926_v43  ;;  %v4165_v51 = vpop.xlane.xlu0 %720  ;;  %v2531_v43 = vld [vmem:[%s5926_s1 + $0x120] sm:$0xff] }
 0x13b   :  { %5948 = vst [vmem:[#allocation8_spill] sm:$0xff] %v4165_v51  ;;  %v4240_v54 = vmul.f32 %v2531_v43, %v2531_v43  ;;  %v2543_v43 = vld [vmem:[%s5926_s1 + $0x180] sm:$0xff] }
 0x13c   :  { %v4342_v42 = vmul.f32 %v2543_v43, %v2543_v43  ;;  %v2553_v43 = vld [vmem:[%s5926_s1 + $0x1d0] sm:$0xff] }
 0x13d   :  { %911 = vadd.xlane.f32.xlu2 %v910_v8  ;;  %919 = vadd.xlane.f32.xlu1 %v918_v32  ;;  %v2538_v8 = vld [vmem:[%s5926_s1 + $0x158] sm:$0xff] }
 0x13e   :  { %v4244_v15 = vmul.f32 %v2538_v8, %v2538_v8  ;;  %v4335_v8 = vand.u32 127, %v18_v2  ;;  %v2548_v2 = vld [vmem:[%s5926_s1 + $0x1a8] sm:$0xff] }
 0x140   :  { %vm5929_vm1 = vcmp.eq.s32.totalorder %v4335_v8, 1 }
 0x142   :  { %939 = vadd.xlane.f32.xlu0 %v938_v28 }
 0x143   :  { %v4186_v10 = vpop.xlane.xlu2 %716 }
 0x144   :  { %5952 = vst [vmem:[#allocation12_spill] sm:$0xff] %v4186_v10 }
 0x145   :  { %923 = vadd.xlane.f32.xlu2 %v922_v62  ;;  %931 = vadd.xlane.f32.xlu1 %v930_v3  ;;  %v4265_v62 = vmul.f32 %v2534_v27, %v2534_v27  ;;  %v4267_v3 = vmul.f32 %v2536_v45, %v2536_v45  ;;  %v2550_v27 = vld [vmem:[%s5926_s1 + $0x1b8] sm:$0xff] }
 0x14a   :  { %951 = vadd.xlane.f32.xlu0 %v950_v1  ;;  %v4188_v0 = vpop.xlane.xlu1 %724  ;;  %v4292_v1 = vmul.f32 %v2539_v9, %v2539_v9  ;;  %v4344_v9 = vmul.f32 %v2545_v13, %v2545_v13 }
 0x14b   :  { %5953 = vst [vmem:[#allocation13_spill] sm:$0xff] %v4188_v0 }
 0x14d   :  { %935 = vadd.xlane.f32.xlu2 %v934_v48  ;;  %943 = vadd.xlane.f32.xlu1 %v942_v26  ;;  %v4294_v48 = vmul.f32 %v2544_v59, %v2544_v59  ;;  %v4346_v59 = vmul.f32 %v2550_v27, %v2550_v27 }
 0x153   :  { %v4176_v31 = vpop.xlane.xlu0 %732 }
 0x154   :  { %5951 = vst [vmem:[#allocation11_spill] sm:$0xff] %v4176_v31 }
 0x155   :  { %947 = vadd.xlane.f32.xlu2 %v946_v46 }
 0x15b   :  { %v4209_v16 = vpop.xlane.xlu2 %728 }
 0x15c   :  { %5955 = vst [vmem:[#allocation15_spill] sm:$0xff] %v4209_v16  ;;  %v4211_v7 = vpop.xlane.xlu1 %736 }
 0x15d   :  { %5956 = vst [vmem:[#allocation16_spill] sm:$0xff] %v4211_v7 }
 0x15e   :  { %1319 = vrot.lane.b32.xlu0 %v4174_v49, %s2837_s18 }
 0x165   :  { %v4194_v58 = vpop.xlane.xlu0 %744 }
 0x166   :  { %5954 = vst [vmem:[#allocation14_spill] sm:$0xff] %v4194_v58  ;;  %1315 = vrot.lane.b32.xlu1 %v4190_v56, %s2837_s18  ;;  %1325 = vrot.lane.b32.xlu0 %v4192_v21, %s2837_s18 }
 0x16d   :  { %v4219_v34 = vpop.xlane.xlu0 %794  ;;  %1317 = vrot.lane.b32.xlu2 %v4213_v40, %s2837_s18 }
 0x16e   :  { %1321 = vrot.lane.b32.xlu1 %v4215_v22, %s2837_s18  ;;  %1331 = vrot.lane.b32.xlu0 %v4217_v29, %s2837_s18 }
 0x170   :  { %v4236_v32 = vpop.xlane.xlu2 %740  ;;  %v4238_v20 = vpop.xlane.xlu1 %748 }
 0x171   :  { %5957 = vst [vmem:[#allocation17_spill] sm:$0xff] %v4236_v32  ;;  %v4368_v32 = vmul.f32 %v2546_v4, %v2546_v4  ;;  %v2549_v4 = vld [vmem:[%s5926_s1 + $0x1b0] sm:$0xff] }
 0x172   :  { %5958 = vst [vmem:[#allocation18_spill] sm:$0xff] %v4238_v20 }
 0x175   :  { %v4246_v37 = vpop.xlane.xlu0 %806  ;;  %1323 = vrot.lane.b32.xlu2 %v4240_v54, %s2837_s18 }
 0x176   :  { %1327 = vrot.lane.b32.xlu1 %v4242_v55, %s2837_s18  ;;  %1337 = vrot.lane.b32.xlu0 %v4244_v15, %s2837_s18 }
 0x178   :  { %v791_v28 = vpop.xlane.xlu2 %790  ;;  %v4263_v35 = vpop.xlane.xlu1 %798 }
 0x17d   :  { %v4271_v63 = vpop.xlane.xlu0 %818  ;;  %1329 = vrot.lane.b32.xlu2 %v4265_v62, %s2837_s18 }
 0x17e   :  { %1333 = vrot.lane.b32.xlu1 %v4267_v3, %s2837_s18  ;;  %1343 = vrot.lane.b32.xlu0 %v4269_v23, %s2837_s18 }
 0x180   :  { %v803_v47 = vpop.xlane.xlu2 %802  ;;  %v4288_v19 = vpop.xlane.xlu1 %810 }
 0x185   :  { %v4296_v26 = vpop.xlane.xlu0 %830  ;;  %1335 = vrot.lane.b32.xlu2 %v4290_v18, %s2837_s18 }
 0x186   :  { %1339 = vrot.lane.b32.xlu1 %v4292_v1, %s2837_s18  ;;  %1349 = vrot.lane.b32.xlu0 %v4294_v48, %s2837_s18 }
 0x188   :  { %v815_v46 = vpop.xlane.xlu2 %814  ;;  %v4313_v25 = vpop.xlane.xlu1 %822 }
 0x18d   :  { %v4321_v24 = vpop.xlane.xlu0 %842  ;;  %1341 = vrot.lane.b32.xlu2 %v4315_v52, %s2837_s18 }
 0x18e   :  { %1345 = vrot.lane.b32.xlu1 %v4317_v44, %s2837_s18  ;;  %1355 = vrot.lane.b32.xlu0 %v4319_v50, %s2837_s18 }
 0x190   :  { %v827_v45 = vpop.xlane.xlu2 %826  ;;  %v4340_v33 = vpop.xlane.xlu1 %834 }
 0x195   :  { %v892_v38 = vpop.xlane.xlu0 %891  ;;  %1347 = vrot.lane.b32.xlu2 %v4342_v42, %s2837_s18 }
 0x196   :  { %1351 = vrot.lane.b32.xlu1 %v4344_v9, %s2837_s18  ;;  %v4355_v14 = vsel %vm5929_vm1, %v791_v28, %v892_v38  ;;  %1361 = vrot.lane.b32.xlu0 %v4346_v59, %s2837_s18  ;;  %v4370_v28 = vmul.f32 %v2548_v2, %v2548_v2  ;;  %v4372_v38 = vmul.f32 %v2553_v43, %v2553_v43  ;;  %v2551_v2 = vld [vmem:[%s5926_s1 + $0x1c0] sm:$0xff]  ;;  %v2556_v43 = vld [vmem:[%s5926_s1 + $0x1e8] sm:$0xff] }
 0x197   :  { %5959 = vst [vmem:[#allocation19_spill] sm:$0xff] %v4355_v14  ;;  %v4400_v41 = vmul.f32 %v2551_v2, %v2551_v2  ;;  %v4402_v7 = vmul.f32 %v2556_v43, %v2556_v43 }
 0x198   :  { %v839_v13 = vpop.xlane.xlu2 %838  ;;  %v847_v27 = vpop.xlane.xlu1 %846 }
 0x19d   :  { %v904_v16 = vpop.xlane.xlu0 %903  ;;  %1353 = vrot.lane.b32.xlu2 %v4368_v32, %s2837_s18 }
 0x19e   :  { %1357 = vrot.lane.b32.xlu1 %v4370_v28, %s2837_s18  ;;  %v4380_v10 = vsel %vm5929_vm1, %v803_v47, %v904_v16  ;;  %1367 = vrot.lane.b32.xlu0 %v4372_v38, %s2837_s18  ;;  %v4398_v47 = vmul.f32 %v2549_v4, %v2549_v4 }
 0x19f   :  { %5960 = vst [vmem:[#allocation20_spill] sm:$0xff] %v4380_v10 }
 0x1a0   :  { %v851_v20 = vpop.xlane.xlu2 %850  ;;  %v896_v58 = vpop.xlane.xlu1 %895 }
 0x1a1   :  { %v4396_v16 = vsel %vm5929_vm1, %v4219_v34, %v896_v58  ;;  %v2552_v58 = vld [vmem:[%s5926_s1 + $0x1c8] sm:$0xff]  ;;  %v2554_v34 = vld [vmem:[%s5926_s1 + $0x1d8] sm:$0xff] }
 0x1a2   :  { %v4432_v10 = vmul.f32 %v2554_v34, %v2554_v34 }
 0x1a5   :  { %v916_v31 = vpop.xlane.xlu0 %915  ;;  %1359 = vrot.lane.b32.xlu2 %v4398_v47, %s2837_s18 }
 0x1a6   :  { %1363 = vrot.lane.b32.xlu1 %v4400_v41, %s2837_s18  ;;  %v4410_v12 = vsel %vm5929_vm1, %v815_v46, %v916_v31  ;;  %1373 = vrot.lane.b32.xlu0 %v4402_v7, %s2837_s18  ;;  %v4430_v46 = vmul.f32 %v2552_v58, %v2552_v58  ;;  %v2557_v58 = vld [vmem:[%s5926_s1 + $0x1f0] sm:$0xff] }
 0x1a7   :  { %5961 = vst [vmem:[#allocation21_spill] sm:$0xff] %v4410_v12 }
 0x1a8   :  { %v900_v4 = vpop.xlane.xlu2 %899  ;;  %v908_v2 = vpop.xlane.xlu1 %907 }
 0x1a9   :  { %v4423_v43 = vsel %vm5929_vm1, %v4263_v35, %v900_v4  ;;  %v4428_v31 = vsel %vm5929_vm1, %v4246_v37, %v908_v2  ;;  %v2555_v37 = vld [vmem:[%s5926_s1 + $0x1e0] sm:$0xff] }
 0x1aa   :  { %5962 = vst [vmem:[#allocation22_spill] sm:$0xff] %v4423_v43 }
 0x1ab   :  { %5963 = vst [vmem:[#allocation23_spill] sm:$0xff] %v4428_v31 }
 0x1ad   :  { %v928_v0 = vpop.xlane.xlu0 %927  ;;  %1365 = vrot.lane.b32.xlu2 %v4430_v46, %s2837_s18 }
 0x1ae   :  { %1369 = vrot.lane.b32.xlu1 %v4432_v10, %s2837_s18  ;;  %v4440_v35 = vsel %vm5929_vm1, %v827_v45, %v928_v0  ;;  %v4458_v45 = vmul.f32 %v2555_v37, %v2555_v37 }
 0x1af   :  { %5964 = vst [vmem:[#allocation24_spill] sm:$0xff] %v4440_v35  ;;  %v4460_v35 = vmul.f32 %v2557_v58, %v2557_v58 }
 0x1b0   :  { %v912_v34 = vpop.xlane.xlu2 %911  ;;  %v920_v4 = vpop.xlane.xlu1 %919 }
 0x1b1   :  { %v4451_v2 = vsel %vm5929_vm1, %v4288_v19, %v912_v34  ;;  %v4456_v0 = vsel %vm5929_vm1, %v4271_v63, %v920_v4  ;;  %v2558_v63 = vld [vmem:[%s5926_s1 + $0x1f8] sm:$0xff] }
 0x1b2   :  { %5965 = vst [vmem:[#allocation25_spill] sm:$0xff] %v4451_v2 }
 0x1b3   :  { %5966 = vst [vmem:[#allocation26_spill] sm:$0xff] %v4456_v0  ;;  %v4483_v0 = vmul.f32 %v2558_v63, %v2558_v63 }
 0x1b5   :  { %v940_v51 = vpop.xlane.xlu0 %939  ;;  %1371 = vrot.lane.b32.xlu2 %v4458_v45, %s2837_s18 }
 0x1b6   :  { %1375 = vrot.lane.b32.xlu1 %v4460_v35, %s2837_s18  ;;  %v4468_v19 = vsel %vm5929_vm1, %v839_v13, %v940_v51 }
 0x1b7   :  { %5967 = vst [vmem:[#allocation27_spill] sm:$0xff] %v4468_v19 }
 0x1b8   :  { %v924_v34 = vpop.xlane.xlu2 %923  ;;  %v932_v37 = vpop.xlane.xlu1 %931 }
 0x1b9   :  { %v4476_v58 = vsel %vm5929_vm1, %v4313_v25, %v924_v34  ;;  %v4481_v4 = vsel %vm5929_vm1, %v4296_v26, %v932_v37 }
 0x1ba   :  { %5968 = vst [vmem:[#allocation28_spill] sm:$0xff] %v4476_v58 }
 0x1bb   :  { %5969 = vst [vmem:[#allocation29_spill] sm:$0xff] %v4481_v4 }
 0x1bd   :  { %v952_v51 = vpop.xlane.xlu0 %951  ;;  %1377 = vrot.lane.b32.xlu2 %v4483_v0, %s2837_s18 }
 0x1be   :  { %v4489_v13 = vsel %vm5929_vm1, %v851_v20, %v952_v51 }
 0x1bf   :  { %5970 = vst [vmem:[#allocation30_spill] sm:$0xff] %v4489_v13 }
 0x1c0   :  { %v936_v2 = vpop.xlane.xlu2 %935  ;;  %v944_v19 = vpop.xlane.xlu1 %943 }
 0x1c1   :  { %v4494_v25 = vsel %vm5929_vm1, %v4340_v33, %v936_v2  ;;  %v4499_v26 = vsel %vm5929_vm1, %v4321_v24, %v944_v19 }
 0x1c2   :  { %5971 = vst [vmem:[#allocation31_spill] sm:$0xff] %v4494_v25 }
 0x1c3   :  { %5972 = vst [vmem:[#allocation32_spill] sm:$0xff] %v4499_v26 }
 0x1c8   :  { %v948_v63 = vpop.xlane.xlu2 %947 }
 0x1c9   :  { %v4503_v34 = vsel %vm5929_vm1, %v847_v27, %v948_v63 }
 0x1ca   :  { %5973 = vst [vmem:[#allocation33_spill] sm:$0xff] %v4503_v34 }
 0x1d0   :  { %v1318_v37 = vpop.permute.xlu2 %1317  ;;  %v1320_v20 = vpop.permute.xlu0 %1319 }
 0x1d1   :  { %v1428_v51 = vadd.f32 %v1318_v37, %v4213_v40 }
 0x1d3   :  { %2644 = vrsqrt.f32 %v1428_v51  ;;  %vm1478_vm2 = vcmp.eq.f32.partialorder %v1428_v51, inf  ;;  %vm1480_vm3 = vcmp.eq.f32.partialorder %v1428_v51, 0.0 }
 0x1d8   :  { %v1316_v4 = vpop.permute.xlu1 %1315  ;;  %v1324_v13 = vpop.permute.xlu2 %1323 }
 0x1d9   :  { %v2645_v58 = vpop.eup %2644  ;;  %v1379_v33 = vsel %vm183_vm0, %v1316_v4, %v1318_v37  ;;  %v1326_v2 = vpop.permute.xlu0 %1325 }
 0x1da   :  { %v4508_v25 = vadd.f32 %v1379_v33, %v4190_v56  ;;  %v1381_v24 = vsel %vm183_vm0, %v1324_v13, %v1326_v2  ;;  %v4512_v19 = vadd.f32 %v1326_v2, %v4192_v21  ;;  %v1472_v27 = vmul.f32 %v2645_v58, %v1428_v51 }
 0x1db   :  { %v4515_v63 = vadd.f32 %v1381_v24, %v4240_v54 }
 0x1dc   :  { %2646 = vrsqrt.f32 %v4508_v25  ;;  %v1473_v40 = vmul.f32 %v2645_v58, %v1472_v27  ;;  %vm1466_vm4 = vcmp.eq.f32.partialorder %v4508_v25, inf  ;;  %vm1468_vm11 = vcmp.eq.f32.partialorder %v4508_v25, 0.0 }
 0x1dd   :  { %2648 = vrsqrt.f32 %v4515_v63  ;;  %v1469_v43 = vand.u32 2147483648, %v4508_v25  ;;  %vm1514_vm12 = vcmp.eq.f32.partialorder %v4515_v63, inf  ;;  %vm1516_vm13 = vcmp.eq.f32.partialorder %v4515_v63, 0.0 }
 0x1de   :  { %2650 = vrsqrt.f32 %v4512_v19  ;;  %v1474_v4 = vmul.f32 0.5, %v1473_v40 }
 0x1e0   :  { %v1322_v37 = vpop.permute.xlu1 %1321  ;;  %v1330_v56 = vpop.permute.xlu2 %1329  ;;  %v1475_v2 = vsub.f32 1.5, %v1474_v4 }
 0x1e1   :  { %v1380_v33 = vsel %vm183_vm0, %v1320_v20, %v1322_v37  ;;  %v4522_v13 = vadd.f32 %v1322_v37, %v4215_v22  ;;  %v4524_v21 = vpop.permute.xlu0 %1331  ;;  %v4533_v20 = vadd.f32 %v1330_v56, %v4265_v62 }
 0x1e2   :  { %v2647_v54 = vpop.eup %2646  ;;  %v4527_v24 = vadd.f32 %v1380_v33, %v4174_v49  ;;  %v1476_v40 = vmul.f32 %v2645_v58, %v1475_v2  ;;  %v1481_v33 = vand.u32 2147483648, %v1428_v51 }
 0x1e3   :  { %v2649_v26 = vpop.eup %2648  ;;  %2652 = vrsqrt.f32 %v4522_v13  ;;  %v1460_v27 = vmul.f32 %v2647_v54, %v4508_v25  ;;  %vm1504_vm9 = vcmp.eq.f32.partialorder %v4522_v13, 0.0 }
 0x1e4   :  { %v2651_v34 = vpop.eup %2650  ;;  %2654 = vrsqrt.f32 %v4527_v24  ;;  %v1508_v22 = vmul.f32 %v2649_v26, %v4515_v63  ;;  %v1477_v37 = vmul.f32 %v1476_v40, %v1428_v51  ;;  %vm1490_vm1 = vcmp.eq.f32.partialorder %v4527_v24, inf }
 0x1e5   :  { %v1461_v4 = vmul.f32 %v2647_v54, %v1460_v27  ;;  %v1520_v49 = vmul.f32 %v2651_v34, %v4512_v19  ;;  %2656 = vrsqrt.f32 %v4533_v20 }
 0x1e6   :  { %v1509_v11 = vmul.f32 %v2649_v26, %v1508_v22  ;;  %v1479_v58 = vsel %vm1478_vm2, %v1428_v51, %v1477_v37  ;;  %vm1526_vm2 = vcmp.eq.f32.partialorder %v4512_v19, inf }
 0x1e7   :  { %v1462_v14 = vmul.f32 0.5, %v1461_v4  ;;  %v1521_v2 = vmul.f32 %v2651_v34, %v1520_v49  ;;  %v1517_v4 = vand.u32 2147483648, %v4515_v63  ;;  %v1482_v39 = vsel %vm1480_vm3, %v1481_v33, %v1479_v58 }
 0x1e8   :  { %v1328_v5 = vpop.permute.xlu1 %1327  ;;  %v1336_v62 = vpop.permute.xlu2 %1335  ;;  %v1510_v27 = vmul.f32 0.5, %v1509_v11  ;;  %vm1528_vm3 = vcmp.eq.f32.partialorder %v4512_v19, 0.0 }
 0x1e9   :  { %v4541_v40 = vpop.eup %2652  ;;  %v1382_v6 = vsel %vm183_vm0, %v1328_v5, %v1330_v56  ;;  %v1338_v12 = vpop.permute.xlu0 %1337  ;;  %v1463_v22 = vsub.f32 1.5, %v1462_v14  ;;  %v1522_v37 = vmul.f32 0.5, %v1521_v2 }
 0x1ea   :  { %v2655_v49 = vpop.eup %2654  ;;  %v4547_v36 = vadd.f32 %v1382_v6, %v4242_v55  ;;  %v1384_v31 = vsel %vm183_vm0, %v1336_v62, %v1338_v12  ;;  %v1511_v14 = vsub.f32 1.5, %v1510_v27  ;;  %v4558_v2 = vadd.f32 %v1338_v12, %v4244_v15 }
 0x1eb   :  { %v4554_v11 = vadd.f32 %v1384_v31, %v4290_v18  ;;  %v1464_v5 = vmul.f32 %v2647_v54, %v1463_v22  ;;  %v1523_v56 = vsub.f32 1.5, %v1522_v37  ;;  %v1484_v6 = vmul.f32 %v2655_v49, %v4527_v24  ;;  %v4565_v31 = vpop.eup %2656 }
 0x1ec   :  { %2658 = vrsqrt.f32 %v4547_v36  ;;  %v1496_v55 = vmul.f32 %v4541_v40, %v4522_v13  ;;  %v1512_v33 = vmul.f32 %v2649_v26, %v1511_v14  ;;  %v1844_v54 = vsel %vm3105_vm7, %v1482_v39, 0.0 }
 0x1ed   :  { %2660 = vrsqrt.f32 %v4554_v11  ;;  %v1465_v51 = vmul.f32 %v1464_v5, %v4508_v25  ;;  %v1524_v18 = vmul.f32 %v2651_v34, %v1523_v56  ;;  %v1485_v12 = vmul.f32 %v2655_v49, %v1484_v6 }
 0x1ee   :  { %v1497_v15 = vmul.f32 %v4541_v40, %v1496_v55  ;;  %v1513_v62 = vmul.f32 %v1512_v33, %v4515_v63  ;;  %v1529_v26 = vand.u32 2147483648, %v4512_v19  ;;  %2662 = vrsqrt.f32 %v4558_v2 }
 0x1ef   :  { %v1467_v58 = vsel %vm1466_vm4, %v4508_v25, %v1465_v51  ;;  %v1525_v27 = vmul.f32 %v1524_v18, %v4512_v19  ;;  %v1486_v37 = vmul.f32 0.5, %v1485_v12  ;;  %v1875_v6 = vsel %vm685_vm8, %v1844_v54, 0.0 }
 0x1f0   :  { %v1334_v34 = vpop.permute.xlu1 %1333  ;;  %v1342_v22 = vpop.permute.xlu2 %1341  ;;  %v1470_v39 = vsel %vm1468_vm11, %v1469_v43, %v1467_v58  ;;  %v1498_v5 = vmul.f32 0.5, %v1497_v15  ;;  %vm1492_vm4 = vcmp.eq.f32.partialorder %v4527_v24, 0.0  ;;  %v1493_v55 = vand.u32 2147483648, %v4527_v24 }
 0x1f1   :  { %v4581_v14 = vpop.permute.xlu0 %1343  ;;  %v1843_v56 = vsel %vm3101_vm6, %v1470_v39, 0.0  ;;  %v1544_v51 = vmul.f32 %v4565_v31, %v4533_v20  ;;  %v1383_v43 = vsel %vm183_vm0, %v4524_v21, %v1334_v34  ;;  %v1515_v18 = vsel %vm1514_vm12, %v4515_v63, %v1513_v62 }
 0x1f2   :  { %v2659_v25 = vpop.eup %2658  ;;  %v1876_v33 = vadd.f32 %v1875_v6, %v1843_v56  ;;  %v1527_v54 = vsel %vm1526_vm2, %v4512_v19, %v1525_v27  ;;  %vm1502_vm11 = vcmp.eq.f32.partialorder %v4522_v13, inf  ;;  %v1518_v15 = vsel %vm1516_vm13, %v1517_v4, %v1515_v18 }
 0x1f3   :  { %v4599_v12 = vpop.eup %2660  ;;  %v1530_v58 = vsel %vm1528_vm3, %v1529_v26, %v1527_v54  ;;  %v1487_v21 = vsub.f32 1.5, %v1486_v37  ;;  %v1505_v39 = vand.u32 2147483648, %v4522_v13  ;;  %v4608_v62 = vadd.f32 %v1334_v34, %v4267_v3 }
 0x1f4   :  { %1877 = vadd.xlane.f32.xlu0 %v1876_v33  ;;  %v1847_v27 = vsel %vm3101_vm6, %v1518_v15, 0.0  ;;  %v1848_v56 = vsel %vm3105_vm7, %v1530_v58, 0.0  ;;  %v1499_v63 = vsub.f32 1.5, %v1498_v5  ;;  %v4615_v4 = vadd.f32 %v1383_v43, %v4217_v29  ;;  %v4619_v6 = vpop.eup %2662 }
 0x1f5   :  { %v1883_v19 = vsel %vm685_vm8, %v1848_v56, 0.0  ;;  %v1488_v26 = vmul.f32 %v2655_v49, %v1487_v21  ;;  %v1532_v37 = vmul.f32 %v2659_v25, %v4547_v36  ;;  %v1545_v33 = vmul.f32 %v4565_v31, %v1544_v51 }
 0x1f6   :  { %v1884_v3 = vadd.f32 %v1883_v19, %v1847_v27  ;;  %v1500_v34 = vmul.f32 %v4541_v40, %v1499_v63  ;;  %v1580_v18 = vmul.f32 %v4599_v12, %v4554_v11  ;;  %v4626_v5 = vadd.f32 %v1342_v22, %v4315_v52 }
 0x1f7   :  { %v1489_v29 = vmul.f32 %v1488_v26, %v4527_v24  ;;  %v1533_v43 = vmul.f32 %v2659_v25, %v1532_v37  ;;  %vm1550_vm12 = vcmp.eq.f32.partialorder %v4533_v20, inf  ;;  %v1553_v49 = vand.u32 2147483648, %v4533_v20 }
 0x1f8   :  { %2664 = vrsqrt.f32 %v4608_v62  ;;  %1885 = vadd.xlane.f32.xlu2 %v1884_v3  ;;  %v1340_v54 = vpop.permute.xlu1 %1339  ;;  %v1348_v40 = vpop.permute.xlu2 %1347  ;;  %v1501_v51 = vmul.f32 %v1500_v34, %v4522_v13  ;;  %vm1538_vm13 = vcmp.eq.f32.partialorder %v4547_v36, inf  ;;  %v1546_v15 = vmul.f32 0.5, %v1545_v33 }
 0x1f9   :  { %vm1552_vm2 = vcmp.eq.f32.partialorder %v4533_v20, 0.0  ;;  %v1581_v52 = vmul.f32 %v4599_v12, %v1580_v18  ;;  %v1385_v58 = vsel %vm183_vm0, %v1340_v54, %v1342_v22  ;;  %v1350_v21 = vpop.permute.xlu0 %1349  ;;  %v1491_v27 = vsel %vm1490_vm1, %v4527_v24, %v1489_v29 }
 0x1fa   :  { %v1534_v56 = vmul.f32 0.5, %v1533_v43  ;;  %vm1540_vm3 = vcmp.eq.f32.partialorder %v4547_v36, 0.0  ;;  %v1592_v63 = vmul.f32 %v4619_v6, %v4558_v2  ;;  %2666 = vrsqrt.f32 %v4615_v4 }
 0x1fb   :  { %v1387_v19 = vsel %vm183_vm0, %v1348_v40, %v1350_v21  ;;  %v1494_v26 = vsel %vm1492_vm4, %v1493_v55, %v1491_v27  ;;  %v1541_v22 = vand.u32 2147483648, %v4547_v36  ;;  %2668 = vrsqrt.f32 %v4626_v5 }
 0x1fc   :  { %v4650_v37 = vadd.f32 %v1385_v58, %v4292_v1  ;;  %v1503_v3 = vsel %vm1502_vm11, %v4522_v13, %v1501_v51  ;;  %v1535_v34 = vsub.f32 1.5, %v1534_v56  ;;  %v1845_v18 = vsel %vm3101_vm6, %v1494_v26, 0.0 }
 0x1fd   :  { %v1506_v33 = vsel %vm1504_vm9, %v1505_v39, %v1503_v3  ;;  %v1547_v24 = vsub.f32 1.5, %v1546_v15  ;;  %v1582_v55 = vmul.f32 0.5, %v1581_v52  ;;  %v4660_v29 = vadd.f32 %v1387_v19, %v4342_v42 }
 0x1fe   :  { %v1846_v1 = vsel %vm3105_vm7, %v1506_v33, 0.0  ;;  %v1536_v43 = vmul.f32 %v2659_v25, %v1535_v34  ;;  %v1593_v54 = vmul.f32 %v4619_v6, %v1592_v63  ;;  %v4665_v40 = vpop.eup %2664  ;;  %vm1586_vm9 = vcmp.eq.f32.partialorder %v4554_v11, inf }
 0x1ff   :  { %v1879_v51 = vsel %vm685_vm8, %v1846_v1, 0.0  ;;  %v1548_v13 = vmul.f32 %v4565_v31, %v1547_v24  ;;  %v1583_v39 = vsub.f32 1.5, %v1582_v55  ;;  %vm1588_vm1 = vcmp.eq.f32.partialorder %v4554_v11, 0.0 }
 0x200   :  { %v1880_v15 = vadd.f32 %v1879_v51, %v1845_v18  ;;  %v1537_v52 = vmul.f32 %v1536_v43, %v4547_v36  ;;  %v1594_v42 = vmul.f32 0.5, %v1593_v54  ;;  %v4672_v58 = vpop.eup %2666  ;;  %2670 = vrsqrt.f32 %v4650_v37  ;;  %v1346_v25 = vpop.permute.xlu1 %1345 }
 0x201   :  { %v1354_v27 = vpop.permute.xlu2 %1353  ;;  %v1549_v56 = vmul.f32 %v1548_v13, %v4533_v20  ;;  %v1584_v63 = vmul.f32 %v4599_v12, %v1583_v39  ;;  %v1589_v31 = vand.u32 2147483648, %v4554_v11  ;;  %v4678_v19 = vpop.eup %2668  ;;  %v4681_v26 = vadd.f32 %v1350_v21, %v4294_v48 }
 0x202   :  { %2672 = vrsqrt.f32 %v4660_v29  ;;  %1881 = vadd.xlane.f32.xlu1 %v1880_v15  ;;  %v1386_v3 = vsel %vm183_vm0, %v4581_v14, %v1346_v25  ;;  %v4686_v34 = vpop.permute.xlu0 %1355  ;;  %v1539_v33 = vsel %vm1538_vm13, %v4547_v36, %v1537_v52  ;;  %v4692_v12 = vadd.f32 %v1346_v25, %v4317_v44 }
 0x203   :  { %v1542_v18 = vsel %vm1540_vm3, %v1541_v22, %v1539_v33  ;;  %v1551_v48 = vsel %vm1550_vm12, %v4533_v20, %v1549_v56  ;;  %v1585_v21 = vmul.f32 %v1584_v63, %v4554_v11  ;;  %v4701_v14 = vadd.f32 %v1386_v3, %v4269_v23 }
 0x204   :  { %v1554_v24 = vsel %vm1552_vm2, %v1553_v49, %v1551_v48  ;;  %v1849_v55 = vsel %vm3101_vm6, %v1542_v18, 0.0  ;;  %v1595_v44 = vsub.f32 1.5, %v1594_v42  ;;  %v4708_v1 = vadd.f32 %v1354_v27, %v4368_v32 }
 0x205   :  { %v1850_v36 = vsel %vm3105_vm7, %v1554_v24, 0.0  ;;  %v1587_v22 = vsel %vm1586_vm9, %v4554_v11, %v1585_v21  ;;  %v1556_v23 = vmul.f32 %v4672_v58, %v4615_v4  ;;  %2674 = vrsqrt.f32 %v4681_v26 }
 0x206   :  { %v1887_v20 = vsel %vm685_vm8, %v1850_v36, 0.0  ;;  %v1590_v49 = vsel %vm1588_vm1, %v1589_v31, %v1587_v22  ;;  %v1596_v32 = vmul.f32 %v4619_v6, %v1595_v44  ;;  %v4722_v43 = vpop.eup %2670  ;;  %2676 = vrsqrt.f32 %v4692_v12 }
 0x207   :  { %v1888_v54 = vadd.f32 %v1887_v20, %v1849_v55  ;;  %vm1598_vm4 = vcmp.eq.f32.partialorder %v4558_v2, inf  ;;  %v1557_v51 = vmul.f32 %v4672_v58, %v1556_v23  ;;  %2678 = vrsqrt.f32 %v4701_v14 }
 0x208   :  { %v4727_v13 = vpop.eup %2672  ;;  %v1597_v39 = vmul.f32 %v1596_v32, %v4558_v2  ;;  %vm1600_vm11 = vcmp.eq.f32.partialorder %v4558_v2, 0.0  ;;  %v1568_v11 = vmul.f32 %v4665_v40, %v4608_v62  ;;  %2680 = vrsqrt.f32 %v4708_v1  ;;  %v1352_v52 = vpop.permute.xlu1 %1351 }
 0x209   :  { %1889 = vadd.xlane.f32.xlu0 %v1888_v54  ;;  %v1601_v6 = vand.u32 2147483648, %v4558_v2  ;;  %v1853_v15 = vsel %vm3101_vm6, %v1590_v49, 0.0  ;;  %v1360_v42 = vpop.permute.xlu2 %1359  ;;  %v1558_v25 = vmul.f32 0.5, %v1557_v51  ;;  %v1388_v63 = vsel %vm183_vm0, %v1352_v52, %v1354_v27 }
 0x20a   :  { %v1599_v56 = vsel %vm1598_vm4, %v4558_v2, %v1597_v39  ;;  %v1362_v31 = vpop.permute.xlu0 %1361  ;;  %v1569_v3 = vmul.f32 %v4665_v40, %v1568_v11  ;;  %v1604_v33 = vmul.f32 %v4722_v43, %v4650_v37  ;;  %vm1562_vm12 = vcmp.eq.f32.partialorder %v4615_v4, inf }
 0x20b   :  { %v1602_v18 = vsel %vm1600_vm11, %v1601_v6, %v1599_v56  ;;  %v1390_v48 = vsel %vm183_vm0, %v1360_v42, %v1362_v31  ;;  %vm1564_vm13 = vcmp.eq.f32.partialorder %v4615_v4, 0.0  ;;  %v4746_v21 = vpop.eup %2674  ;;  %v4751_v27 = vadd.f32 %v1388_v63, %v4344_v9 }
 0x20c   :  { %v1854_v2 = vsel %vm3105_vm7, %v1602_v18, 0.0  ;;  %v1559_v24 = vsub.f32 1.5, %v1558_v25  ;;  %v1570_v55 = vmul.f32 0.5, %v1569_v3  ;;  %v4753_v44 = vpop.eup %2676  ;;  %v4757_v22 = vadd.f32 %v1390_v48, %v4398_v47 }
 0x20d   :  { %v1895_v36 = vsel %vm685_vm8, %v1854_v2, 0.0  ;;  %v1565_v23 = vand.u32 2147483648, %v4615_v4  ;;  %v1605_v20 = vmul.f32 %v4722_v43, %v1604_v33  ;;  %v4761_v49 = vpop.eup %2678  ;;  %v4764_v54 = vadd.f32 %v1362_v31, %v4346_v59 }
 0x20e   :  { %v1896_v32 = vadd.f32 %v1895_v36, %v1853_v15  ;;  %v1560_v9 = vmul.f32 %v4672_v58, %v1559_v24  ;;  %v1571_v51 = vsub.f32 1.5, %v1570_v55  ;;  %v4767_v39 = vpop.eup %2680  ;;  %vm1574_vm2 = vcmp.eq.f32.partialorder %v4608_v62, inf }
 0x20f   :  { %vm1576_vm3 = vcmp.eq.f32.partialorder %v4608_v62, 0.0  ;;  %v1577_v47 = vand.u32 2147483648, %v4608_v62  ;;  %v1606_v11 = vmul.f32 0.5, %v1605_v20  ;;  %2682 = vrsqrt.f32 %v4751_v27 }
 0x210   :  { %1897 = vadd.xlane.f32.xlu2 %v1896_v32  ;;  %v1561_v6 = vmul.f32 %v1560_v9, %v4615_v4  ;;  %v1572_v59 = vmul.f32 %v4665_v40, %v1571_v51  ;;  %v1616_v58 = vmul.f32 %v4678_v19, %v4626_v5  ;;  %2684 = vrsqrt.f32 %v4757_v22  ;;  %v1358_v15 = vpop.permute.xlu1 %1357 }
 0x211   :  { %v1366_v52 = vpop.permute.xlu2 %1365  ;;  %v1607_v42 = vsub.f32 1.5, %v1606_v11  ;;  %vm1610_vm9 = vcmp.eq.f32.partialorder %v4650_v37, inf  ;;  %v1652_v25 = vmul.f32 %v4727_v13, %v4660_v29  ;;  %2686 = vrsqrt.f32 %v4764_v54 }
 0x212   :  { %v1563_v56 = vsel %vm1562_vm12, %v4615_v4, %v1561_v6  ;;  %v1573_v40 = vmul.f32 %v1572_v59, %v4608_v62  ;;  %v1389_v63 = vsel %vm183_vm0, %v4686_v34, %v1358_v15  ;;  %v4788_v31 = vpop.permute.xlu0 %1367  ;;  %v4793_v33 = vadd.f32 %v1358_v15, %v4370_v28 }
 0x213   :  { %v1566_v3 = vsel %vm1564_vm13, %v1565_v23, %v1563_v56  ;;  %v1608_v18 = vmul.f32 %v4722_v43, %v1607_v42  ;;  %vm1612_vm1 = vcmp.eq.f32.partialorder %v4650_v37, 0.0  ;;  %v4801_v2 = vadd.f32 %v1389_v63, %v4319_v50 }
 0x214   :  { %v1575_v48 = vsel %vm1574_vm2, %v4608_v62, %v1573_v40  ;;  %v4804_v34 = vadd.f32 %v1366_v52, %v4430_v46  ;;  %v1617_v4 = vmul.f32 %v4678_v19, %v1616_v58  ;;  %v1851_v43 = vsel %vm3101_vm6, %v1566_v3, 0.0 }
 0x215   :  { %v1578_v28 = vsel %vm1576_vm3, %v1577_v47, %v1575_v48  ;;  %v1609_v24 = vmul.f32 %v1608_v18, %v4650_v37  ;;  %v1653_v55 = vmul.f32 %v4727_v13, %v1652_v25  ;;  %v4813_v36 = vpop.eup %2682  ;;  %v1613_v46 = vand.u32 2147483648, %v4650_v37 }
 0x216   :  { %v1852_v50 = vsel %vm3105_vm7, %v1578_v28, 0.0  ;;  %v1618_v23 = vmul.f32 0.5, %v1617_v4  ;;  %vm1622_vm4 = vcmp.eq.f32.partialorder %v4626_v5, inf  ;;  %v4819_v20 = vpop.eup %2684  ;;  %2688 = vrsqrt.f32 %v4793_v33 }
 0x217   :  { %v1891_v62 = vsel %vm685_vm8, %v1852_v50, 0.0  ;;  %v1611_v32 = vsel %vm1610_vm9, %v4650_v37, %v1609_v24  ;;  %v1654_v9 = vmul.f32 0.5, %v1653_v55  ;;  %v4826_v51 = vpop.eup %2686  ;;  %2690 = vrsqrt.f32 %v4801_v2 }
 0x218   :  { %v1892_v47 = vadd.f32 %v1891_v62, %v1851_v43  ;;  %v1619_v11 = vsub.f32 1.5, %v1618_v23  ;;  %vm1624_vm11 = vcmp.eq.f32.partialorder %v4626_v5, 0.0  ;;  %2692 = vrsqrt.f32 %v4804_v34  ;;  %v1364_v15 = vpop.permute.xlu1 %1363 }
 0x219   :  { %v1625_v6 = vand.u32 2147483648, %v4626_v5  ;;  %v1655_v59 = vsub.f32 1.5, %v1654_v9  ;;  %v1664_v58 = vmul.f32 %v4746_v21, %v4681_v26  ;;  %v1372_v42 = vpop.permute.xlu2 %1371  ;;  %v1614_v25 = vsel %vm1612_vm1, %v1613_v46, %v1611_v32 }
 0x21a   :  { %1893 = vadd.xlane.f32.xlu1 %v1892_v47  ;;  %v1620_v56 = vmul.f32 %v4678_v19, %v1619_v11  ;;  %vm1658_vm12 = vcmp.eq.f32.partialorder %v4660_v29, inf  ;;  %v1391_v40 = vsel %vm183_vm0, %v1364_v15, %v1366_v52  ;;  %v1374_v63 = vpop.permute.xlu0 %1373  ;;  %vm1660_vm13 = vcmp.eq.f32.partialorder %v4660_v29, 0.0 }
 0x21b   :  { %v1656_v3 = vmul.f32 %v4727_v13, %v1655_v59  ;;  %v1665_v18 = vmul.f32 %v4746_v21, %v1664_v58  ;;  %v1393_v48 = vsel %vm183_vm0, %v1372_v42, %v1374_v63  ;;  %v1661_v37 = vand.u32 2147483648, %v4660_v29 }
 0x21c   :  { %v1621_v4 = vmul.f32 %v1620_v56, %v4626_v5  ;;  %v4846_v28 = vadd.f32 %v1391_v40, %v4400_v41  ;;  %v1628_v19 = vmul.f32 %v4761_v49, %v4701_v14  ;;  %v4850_v52 = vpop.eup %2688  ;;  %v1855_v13 = vsel %vm3101_vm6, %v1614_v25, 0.0 }
 0x21d   :  { %v1657_v43 = vmul.f32 %v1656_v3, %v4660_v29  ;;  %v1666_v24 = vmul.f32 0.5, %v1665_v18  ;;  %vm1670_vm2 = vcmp.eq.f32.partialorder %v4681_v26, inf  ;;  %v4856_v55 = vpop.eup %2690  ;;  %vm1672_vm3 = vcmp.eq.f32.partialorder %v4681_v26, 0.0 }
 0x21e   :  { %v1623_v41 = vsel %vm1622_vm4, %v4626_v5, %v1621_v4  ;;  %v4863_v50 = vadd.f32 %v1393_v48, %v4458_v45  ;;  %v1629_v46 = vmul.f32 %v4761_v49, %v1628_v19  ;;  %v4866_v23 = vpop.eup %2692  ;;  %v1673_v47 = vand.u32 2147483648, %v4681_v26 }
 0x21f   :  { %v1626_v62 = vsel %vm1624_vm11, %v1625_v6, %v1623_v41  ;;  %v1659_v32 = vsel %vm1658_vm12, %v4660_v29, %v1657_v43  ;;  %v1667_v9 = vsub.f32 1.5, %v1666_v24  ;;  %2694 = vrsqrt.f32 %v4846_v28 }
 0x220   :  { %v1856_v11 = vsel %vm3105_vm7, %v1626_v62, 0.0  ;;  %v4878_v45 = vadd.f32 %v1374_v63, %v4402_v7  ;;  %v1630_v59 = vmul.f32 0.5, %v1629_v46  ;;  %v1662_v5 = vsel %vm1660_vm13, %v1661_v37, %v1659_v32  ;;  %v1370_v42 = vpop.permute.xlu1 %1369 }
 0x221   :  { %v1899_v58 = vsel %vm685_vm8, %v1856_v11, 0.0  ;;  %v1668_v6 = vmul.f32 %v4746_v21, %v1667_v9  ;;  %v1640_v15 = vmul.f32 %v4753_v44, %v4692_v12  ;;  %2696 = vrsqrt.f32 %v4863_v50  ;;  %v4902_v4 = vpop.permute.xlu2 %1377 }
 0x222   :  { %v1900_v25 = vadd.f32 %v1899_v58, %v1855_v13  ;;  %v1631_v56 = vsub.f32 1.5, %v1630_v59  ;;  %vm1634_vm9 = vcmp.eq.f32.partialorder %v4701_v14, inf  ;;  %vm1636_vm1 = vcmp.eq.f32.partialorder %v4701_v14, 0.0 }
 0x223   :  { %v1669_v7 = vmul.f32 %v1668_v6, %v4681_v26  ;;  %v1641_v40 = vmul.f32 %v4753_v44, %v1640_v15  ;;  %v1392_v29 = vsel %vm183_vm0, %v4788_v31, %v1370_v42  ;;  %v1859_v21 = vsel %vm3101_vm6, %v1662_v5, 0.0 }
 0x224   :  { %1901 = vadd.xlane.f32.xlu0 %v1900_v25  ;;  %2698 = vrsqrt.f32 %v4878_v45  ;;  %v1632_v63 = vmul.f32 %v4761_v49, %v1631_v56  ;;  %v1637_v3 = vand.u32 2147483648, %v4701_v14  ;;  %vm1646_vm4 = vcmp.eq.f32.partialorder %v4692_v12, inf }
 0x225   :  { %v1671_v18 = vsel %vm1670_vm2, %v4681_v26, %v1669_v7  ;;  %v1642_v48 = vmul.f32 0.5, %v1641_v40  ;;  %v1676_v31 = vmul.f32 %v4813_v36, %v4751_v27  ;;  %v4906_v37 = vpop.eup %2694  ;;  %vm1648_vm11 = vcmp.eq.f32.partialorder %v4692_v12, 0.0 }
 0x226   :  { %v1674_v19 = vsel %vm1672_vm3, %v1673_v47, %v1671_v18  ;;  %v1633_v49 = vmul.f32 %v1632_v63, %v4701_v14  ;;  %v4913_v13 = vadd.f32 %v1392_v29, %v4372_v38  ;;  %v4918_v41 = vadd.f32 %v1370_v42, %v4432_v10 }
 0x227   :  { %v1860_v43 = vsel %vm3105_vm7, %v1674_v19, 0.0  ;;  %v1643_v24 = vsub.f32 1.5, %v1642_v48  ;;  %v1677_v46 = vmul.f32 %v4813_v36, %v1676_v31  ;;  %v4921_v62 = vpop.eup %2696  ;;  %v1649_v38 = vand.u32 2147483648, %v4692_v12 }
 0x228   :  { %v1907_v26 = vsel %vm685_vm8, %v1860_v43, 0.0  ;;  %v1635_v32 = vsel %vm1634_vm9, %v4701_v14, %v1633_v49  ;;  %v4930_v9 = vadd.f32 %v4902_v4, %v4483_v0  ;;  %2700 = vrsqrt.f32 %v4913_v13  ;;  %v1376_v49 = vpop.permute.xlu1 %1375 }
 0x229   :  { %v1908_v47 = vadd.f32 %v1907_v26, %v1859_v21  ;;  %v1638_v10 = vsel %vm1636_vm1, %v1637_v3, %v1635_v32  ;;  %v1644_v11 = vmul.f32 %v4753_v44, %v1643_v24  ;;  %v1678_v59 = vmul.f32 0.5, %v1677_v46 }
 0x22a   :  { %v4935_v58 = vpop.eup %2698  ;;  %vm1682_vm12 = vcmp.eq.f32.partialorder %v4751_v27, inf  ;;  %vm1684_vm13 = vcmp.eq.f32.partialorder %v4751_v27, 0.0  ;;  %v1688_v5 = vmul.f32 %v4767_v39, %v4708_v1  ;;  %2702 = vrsqrt.f32 %v4918_v41 }
 0x22b   :  { %1909 = vadd.xlane.f32.xlu2 %v1908_v47  ;;  %v1645_v0 = vmul.f32 %v1644_v11, %v4692_v12  ;;  %v1679_v14 = vsub.f32 1.5, %v1678_v59  ;;  %v1724_v44 = vmul.f32 %v4819_v20, %v4757_v22  ;;  %v1857_v6 = vsel %vm3101_vm6, %v1638_v10, 0.0 }
 0x22c   :  { %2704 = vrsqrt.f32 %v4930_v9  ;;  %v1685_v15 = vand.u32 2147483648, %v4751_v27  ;;  %v1689_v42 = vmul.f32 %v4767_v39, %v1688_v5  ;;  %v1736_v40 = vmul.f32 %v4826_v51, %v4764_v54 }
 0x22d   :  { %v1647_v25 = vsel %vm1646_vm4, %v4692_v12, %v1645_v0  ;;  %v1680_v56 = vmul.f32 %v4813_v36, %v1679_v14  ;;  %v1725_v7 = vmul.f32 %v4819_v20, %v1724_v44  ;;  %vm1694_vm2 = vcmp.eq.f32.partialorder %v4708_v1, inf }
 0x22e   :  { %v1650_v29 = vsel %vm1648_vm11, %v1649_v38, %v1647_v25  ;;  %v1690_v21 = vmul.f32 0.5, %v1689_v42  ;;  %vm1696_vm3 = vcmp.eq.f32.partialorder %v4708_v1, 0.0  ;;  %v1737_v36 = vmul.f32 %v4826_v51, %v1736_v40  ;;  %v4966_v48 = vpop.eup %2700 }
 0x22f   :  { %v1858_v63 = vsel %vm3105_vm7, %v1650_v29, 0.0  ;;  %v1681_v3 = vmul.f32 %v1680_v56, %v4751_v27  ;;  %v1726_v18 = vmul.f32 0.5, %v1725_v7  ;;  %v1697_v12 = vand.u32 2147483648, %v4708_v1 }
 0x230   :  { %v1903_v31 = vsel %vm685_vm8, %v1858_v63, 0.0  ;;  %v1691_v19 = vsub.f32 1.5, %v1690_v21  ;;  %vm1730_vm9 = vcmp.eq.f32.partialorder %v4757_v22, inf  ;;  %v4971_v43 = vpop.eup %2702  ;;  %v1738_v32 = vmul.f32 0.5, %v1737_v36 }
 0x231   :  { %v1904_v24 = vadd.f32 %v1903_v31, %v1857_v6  ;;  %v1683_v46 = vsel %vm1682_vm12, %v4751_v27, %v1681_v3  ;;  %v1727_v26 = vsub.f32 1.5, %v1726_v18  ;;  %vm1732_vm1 = vcmp.eq.f32.partialorder %v4757_v22, 0.0 }
 0x232   :  { %v4976_v38 = vpop.eup %2704  ;;  %v1692_v47 = vmul.f32 %v4767_v39, %v1691_v19  ;;  %v1733_v10 = vand.u32 2147483648, %v4757_v22  ;;  %v1700_v11 = vmul.f32 %v4856_v55, %v4801_v2  ;;  %v1686_v59 = vsel %vm1684_vm13, %v1685_v15, %v1683_v46 }
 0x233   :  { %1905 = vadd.xlane.f32.xlu1 %v1904_v24  ;;  %v1728_v5 = vmul.f32 %v4819_v20, %v1727_v26  ;;  %v1739_v0 = vsub.f32 1.5, %v1738_v32  ;;  %v1394_v14 = vsel %vm183_vm0, %v1376_v49, %v4902_v4  ;;  %vm1742_vm4 = vcmp.eq.f32.partialorder %v4764_v54, inf }
 0x234   :  { %v1693_v44 = vmul.f32 %v1692_v47, %v4708_v1  ;;  %vm1744_vm11 = vcmp.eq.f32.partialorder %v4764_v54, 0.0  ;;  %v1701_v39 = vmul.f32 %v4856_v55, %v1700_v11  ;;  %v1745_v27 = vand.u32 2147483648, %v4764_v54 }
 0x235   :  { %v1729_v6 = vmul.f32 %v1728_v5, %v4757_v22  ;;  %v1740_v42 = vmul.f32 %v4826_v51, %v1739_v0  ;;  %v1712_v20 = vmul.f32 %v4850_v52, %v4793_v33  ;;  %v1861_v15 = vsel %vm3101_vm6, %v1686_v59, 0.0 }
 0x236   :  { %v1695_v4 = vsel %vm1694_vm2, %v4708_v1, %v1693_v44  ;;  %v5003_v25 = vadd.f32 %v1394_v14, %v4460_v35  ;;  %v1702_v56 = vmul.f32 0.5, %v1701_v39  ;;  %vm1706_vm0 = vcmp.eq.f32.partialorder %v4801_v2, inf }
 0x237   :  { %v1698_v7 = vsel %vm1696_vm3, %v1697_v12, %v1695_v4  ;;  %v1731_v51 = vsel %vm1730_vm9, %v4757_v22, %v1729_v6  ;;  %v1741_v40 = vmul.f32 %v1740_v42, %v4764_v54  ;;  %v1713_v29 = vmul.f32 %v4850_v52, %v1712_v20 }
 0x238   :  { %v1862_v21 = vsel %vm3105_vm7, %v1698_v7, 0.0  ;;  %v1734_v63 = vsel %vm1732_vm1, %v1733_v10, %v1731_v51  ;;  %v1703_v35 = vsub.f32 1.5, %v1702_v56  ;;  %v1748_v12 = vmul.f32 %v4906_v37, %v4846_v28 }
 0x239   :  { %v1911_v1 = vsel %vm685_vm8, %v1862_v21, 0.0  ;;  %v1743_v3 = vsel %vm1742_vm4, %v4764_v54, %v1741_v40  ;;  %v1865_v18 = vsel %vm3101_vm6, %v1734_v63, 0.0  ;;  %v1714_v36 = vmul.f32 0.5, %v1713_v29 }
 0x23a   :  { %v1912_v31 = vadd.f32 %v1911_v1, %v1861_v15  ;;  %v1746_v19 = vsel %vm1744_vm11, %v1745_v27, %v1743_v3  ;;  %v1704_v22 = vmul.f32 %v4856_v55, %v1703_v35  ;;  %2706 = vrsqrt.f32 %v5003_v25 }
 0x23b   :  { %v1866_v49 = vsel %vm3105_vm7, %v1746_v19, 0.0  ;;  %vm1708_vm12 = vcmp.eq.f32.partialorder %v4801_v2, 0.0  ;;  %v1715_v24 = vsub.f32 1.5, %v1714_v36  ;;  %v1709_v54 = vand.u32 2147483648, %v4801_v2 }
 0x23c   :  { %1913 = vadd.xlane.f32.xlu0 %v1912_v31  ;;  %v1919_v46 = vsel %vm685_vm8, %v1866_v49, 0.0  ;;  %v1705_v26 = vmul.f32 %v1704_v22, %v4801_v2  ;;  %v1749_v55 = vmul.f32 %v4906_v37, %v1748_v12  ;;  %vm1718_vm13 = vcmp.eq.f32.partialorder %v4793_v33, inf }
 0x23d   :  { %v1920_v32 = vadd.f32 %v1919_v46, %v1865_v18  ;;  %v1716_v47 = vmul.f32 %v4850_v52, %v1715_v24  ;;  %v1760_v10 = vmul.f32 %v4866_v23, %v4804_v34  ;;  %vm1720_vm2 = vcmp.eq.f32.partialorder %v4793_v33, 0.0 }
 0x23e   :  { %v1707_v11 = vsel %vm1706_vm0, %v4801_v2, %v1705_v26  ;;  %v1721_v59 = vand.u32 2147483648, %v4793_v33  ;;  %v1750_v5 = vmul.f32 0.5, %v1749_v55  ;;  %v1796_v44 = vmul.f32 %v4921_v62, %v4863_v50 }
 0x23f   :  { %1921 = vadd.xlane.f32.xlu2 %v1920_v32  ;;  %v1710_v0 = vsel %vm1708_vm12, %v1709_v54, %v1707_v11  ;;  %v1717_v52 = vmul.f32 %v1716_v47, %v4793_v33  ;;  %v1761_v14 = vmul.f32 %v4866_v23, %v1760_v10  ;;  %vm1754_vm3 = vcmp.eq.f32.partialorder %v4846_v28, inf }
 0x240   :  { %v1751_v39 = vsub.f32 1.5, %v1750_v5  ;;  %vm1756_vm9 = vcmp.eq.f32.partialorder %v4846_v28, 0.0  ;;  %v1757_v6 = vand.u32 2147483648, %v4846_v28  ;;  %v5054_v42 = vpop.eup %2706  ;;  %vm1766_vm1 = vcmp.eq.f32.partialorder %v4804_v34, inf }
 0x241   :  { %v1719_v2 = vsel %vm1718_vm13, %v4793_v33, %v1717_v52  ;;  %v1762_v27 = vmul.f32 0.5, %v1761_v14  ;;  %v1797_v20 = vmul.f32 %v4921_v62, %v1796_v44  ;;  %v1863_v15 = vsel %vm3101_vm6, %v1710_v0, 0.0 }
 0x242   :  { %v1722_v4 = vsel %vm1720_vm2, %v1721_v59, %v1719_v2  ;;  %v1752_v56 = vmul.f32 %v4906_v37, %v1751_v39  ;;  %v1808_v7 = vmul.f32 %v4935_v58, %v4878_v45  ;;  %vm1768_vm4 = vcmp.eq.f32.partialorder %v4804_v34, 0.0 }
 0x243   :  { %v1864_v51 = vsel %vm3105_vm7, %v1722_v4, 0.0  ;;  %v1763_v40 = vsub.f32 1.5, %v1762_v27  ;;  %v1798_v29 = vmul.f32 0.5, %v1797_v20  ;;  %v1769_v63 = vand.u32 2147483648, %v4804_v34 }
 0x244   :  { %v1915_v21 = vsel %vm685_vm8, %v1864_v51, 0.0  ;;  %v1753_v33 = vmul.f32 %v1752_v56, %v4846_v28  ;;  %v1809_v35 = vmul.f32 %v4935_v58, %v1808_v7  ;;  %v1772_v18 = vmul.f32 %v4966_v48, %v4913_v13 }
 0x245   :  { %v1916_v1 = vadd.f32 %v1915_v21, %v1863_v15  ;;  %v1764_v37 = vmul.f32 %v4866_v23, %v1763_v40  ;;  %v1799_v3 = vsub.f32 1.5, %v1798_v29  ;;  %vm1802_vm11 = vcmp.eq.f32.partialorder %v4863_v50, inf  ;;  %v5136_v29 = vld [vmem:[%s5926_s1 + $0x118] sm:$0xff] }
 0x246   :  { %v1755_v36 = vsel %vm1754_vm3, %v4846_v28, %v1753_v33  ;;  %vm1804_vm0 = vcmp.eq.f32.partialorder %v4863_v50, 0.0  ;;  %v1810_v31 = vmul.f32 0.5, %v1809_v35  ;;  %v1773_v12 = vmul.f32 %v4966_v48, %v1772_v18 }
 0x247   :  { %1917 = vadd.xlane.f32.xlu1 %v1916_v1  ;;  %v1758_v19 = vsel %vm1756_vm9, %v1757_v6, %v1755_v36  ;;  %v1765_v22 = vmul.f32 %v1764_v37, %v4804_v34  ;;  %v1800_v23 = vmul.f32 %v4921_v62, %v1799_v3  ;;  %v1805_v49 = vand.u32 2147483648, %v4863_v50 }
 0x248   :  { %v1811_v24 = vsub.f32 1.5, %v1810_v31  ;;  %vm1814_vm12 = vcmp.eq.f32.partialorder %v4878_v45, inf  ;;  %v1784_v46 = vmul.f32 %v4971_v43, %v4918_v41  ;;  %vm1816_vm13 = vcmp.eq.f32.partialorder %v4878_v45, 0.0 }
 0x249   :  { %v1767_v26 = vsel %vm1766_vm1, %v4804_v34, %v1765_v22  ;;  %v1801_v28 = vmul.f32 %v1800_v23, %v4863_v50  ;;  %v1774_v54 = vmul.f32 0.5, %v1773_v12  ;;  %v1867_v55 = vsel %vm3101_vm6, %v1758_v19, 0.0 }
 0x24a   :  { %v1770_v62 = vsel %vm1768_vm4, %v1769_v63, %v1767_v26  ;;  %v1812_v32 = vmul.f32 %v4935_v58, %v1811_v24  ;;  %v1785_v47 = vmul.f32 %v4971_v43, %v1784_v46  ;;  %v1817_v59 = vand.u32 2147483648, %v4878_v45  ;;  %v5149_v63 = vld [vmem:[%s5926_s1 + $0x110] sm:$0xff] }
 0x24b   :  { %v1868_v10 = vsel %vm3105_vm7, %v1770_v62, 0.0  ;;  %v1803_v11 = vsel %vm1802_vm11, %v4863_v50, %v1801_v28  ;;  %v1775_v5 = vsub.f32 1.5, %v1774_v54  ;;  %vm1778_vm2 = vcmp.eq.f32.partialorder %v4913_v13, inf  ;;  %v5175_v54 = vld [vmem:[%s5926_s1 + $0x148] sm:$0xff] }
 0x24c   :  { %v1923_v34 = vsel %vm685_vm8, %v1868_v10, 0.0  ;;  %v1806_v0 = vsel %vm1804_vm0, %v1805_v49, %v1803_v11  ;;  %v1813_v52 = vmul.f32 %v1812_v32, %v4878_v45  ;;  %v1786_v58 = vmul.f32 0.5, %v1785_v47  ;;  %v5166_v49 = vld [vmem:[%s5926_s1 + $0x108] sm:$0xff] }
 0x24d   :  { %v1924_v14 = vadd.f32 %v1923_v34, %v1867_v55  ;;  %v1776_v44 = vmul.f32 %v4966_v48, %v1775_v5  ;;  %v1871_v27 = vsel %vm3101_vm6, %v1806_v0, 0.0  ;;  %v1781_v48 = vand.u32 2147483648, %v4913_v13  ;;  %v5183_v55 = vld [vmem:[%s5926_s1 + $0x100] sm:$0xff] }
 0x24e   :  { %v1815_v39 = vsel %vm1814_vm12, %v4878_v45, %v1813_v52  ;;  %v1787_v6 = vsub.f32 1.5, %v1786_v58  ;;  %vm1780_vm3 = vcmp.eq.f32.partialorder %v4913_v13, 0.0  ;;  %v1820_v45 = vmul.f32 %v5054_v42, %v5003_v25  ;;  %v5200_v34 = vld [vmem:[%s5926_s1 + $0x140] sm:$0xff] }
 0x24f   :  { %1925 = vadd.xlane.f32.xlu0 %v1924_v14  ;;  %v1818_v2 = vsel %vm1816_vm13, %v1817_v59, %v1815_v39  ;;  %v1777_v50 = vmul.f32 %v1776_v44, %v4913_v13  ;;  %vm1790_vm9 = vcmp.eq.f32.partialorder %v4918_v41, inf  ;;  %vm1792_vm1 = vcmp.eq.f32.partialorder %v4918_v41, 0.0  ;;  %v5212_v39 = vld [vmem:[%s5926_s1 + $0x138] sm:$0xff] }
 0x250   :  { %v1872_v20 = vsel %vm3105_vm7, %v1818_v2, 0.0  ;;  %v1788_v4 = vmul.f32 %v4971_v43, %v1787_v6  ;;  %v1942_v43 = vsel %vm3725_vm10, %v5136_v29, 0.0  ;;  %v1821_v21 = vmul.f32 %v5054_v42, %v1820_v45 }
 0x251   :  { %v1931_v15 = vsel %vm685_vm8, %v1872_v20, 0.0  ;;  %v1779_v56 = vsel %vm1778_vm2, %v4913_v13, %v1777_v50  ;;  %v1793_v13 = vand.u32 2147483648, %v4918_v41  ;;  %v1941_v35 = vsel %vm3719_vm5, %v5149_v63, 0.0 }
 0x252   :  { %v1932_v7 = vadd.f32 %v1931_v15, %v1871_v27  ;;  %v1782_v51 = vsel %vm1780_vm3, %v1781_v48, %v1779_v56  ;;  %v1789_v40 = vmul.f32 %v1788_v4, %v4918_v41  ;;  %v1832_v1 = vmul.f32 %v4976_v38, %v4930_v9  ;;  %v5242_v56 = vld [vmem:[%s5926_s1 + $0x128] sm:$0xff] }
 0x253   :  { %v1869_v3 = vsel %vm3101_vm6, %v1782_v51, 0.0  ;;  %vm5974_vm4 = vcmask 261120   ;;  %v1822_v36 = vmul.f32 0.5, %v1821_v21  ;;  %v1940_v24 = vsel %vm3725_vm10, %v5166_v49, 0.0 }
 0x254   :  { %1933 = vadd.xlane.f32.xlu2 %v1932_v7  ;;  %v1791_v33 = vsel %vm1790_vm9, %v4918_v41, %v1789_v40  ;;  %v1975_v18 = vsel %vm5974_vm4, %v1942_v43, 0.0  ;;  %v1833_v31 = vmul.f32 %v4976_v38, %v1832_v1  ;;  %v1948_v62 = vsel %vm3725_vm10, %v5175_v54, 0.0  ;;  %vm5975_vm11 = vmmov %vm5974_vm4  ;;  %v5250_v7 = vld [vmem:[%s5926_s1 + $0x170] sm:$0xff]  ;;  %v5268_v1 = vld [vmem:[%s5926_s1 + $0x168] sm:$0xff] }
 0x255   :  { %v1794_v37 = vsel %vm1792_vm1, %v1793_v13, %v1791_v33  ;;  %v1823_v22 = vsub.f32 1.5, %v1822_v36  ;;  %v1976_v12 = vadd.f32 %v1975_v18, %v1941_v35  ;;  %v1971_v32 = vsel %vm5975_vm11, %v1940_v24, 0.0  ;;  %vm5976_vm2 = vmmov %vm5974_vm4  ;;  %v5259_v13 = vld [vmem:[%s5926_s1 + $0x120] sm:$0xff]  ;;  %v5276_v18 = vld [vmem:[%s5926_s1 + $0x1a8] sm:$0xff] }
 0x256   :  { %v1870_v41 = vsel %vm3105_vm7, %v1794_v37, 0.0  ;;  %v1834_v46 = vmul.f32 0.5, %v1833_v31  ;;  %vm1826_vm0 = vcmp.eq.f32.partialorder %v5003_v25, inf  ;;  %vm1828_vm12 = vcmp.eq.f32.partialorder %v5003_v25, 0.0  ;;  %vm5980_vm9 = vmmov %vm5976_vm2 }
 0x257   :  { %v1927_v19 = vsel %vm685_vm8, %v1870_v41, 0.0  ;;  %v1824_v26 = vmul.f32 %v5054_v42, %v1823_v22  ;;  %v1939_v42 = vsel %vm3719_vm5, %v5183_v55, 0.0  ;;  %v1829_v10 = vand.u32 2147483648, %v5003_v25  ;;  %v5284_v41 = vld [vmem:[%s5926_s1 + $0x160] sm:$0xff]  ;;  %v5293_v22 = vld [vmem:[%s5926_s1 + $0x158] sm:$0xff]  ;;  %vm5981_vm1 = vmmov %vm5976_vm2 }
 0x258   :  { %v1928_v23 = vadd.f32 %v1927_v19, %v1869_v3  ;;  %v1835_v28 = vsub.f32 1.5, %v1834_v46  ;;  %vm1838_vm13 = vcmp.eq.f32.partialorder %v4930_v9, inf  ;;  %v1841_v5 = vand.u32 2147483648, %v4930_v9  ;;  %vm5982_vm4 = vmmov %vm5981_vm1 }
 0x259   :  { %v1825_v47 = vmul.f32 %v1824_v26, %v5003_v25  ;;  %v1947_v0 = vsel %vm3719_vm5, %v5200_v34, 0.0  ;;  %v1987_v52 = vsel %vm5976_vm2, %v1948_v62, 0.0  ;;  %v1972_v58 = vadd.f32 %v1971_v32, %v1939_v42  ;;  %vm5983_vm11 = vmmov %vm5981_vm1 }
 0x25a   :  { %1929 = vadd.xlane.f32.xlu1 %v1928_v23  ;;  %v1836_v11 = vmul.f32 %v4976_v38, %v1835_v28  ;;  %vm1840_vm3 = vcmp.eq.f32.partialorder %v4930_v9, 0.0  ;;  %v1988_v44 = vadd.f32 %v1987_v52, %v1947_v0  ;;  %v1946_v6 = vsel %vm3725_vm10, %v5212_v39, 0.0  ;;  %v5310_v28 = vld [vmem:[%s5926_s1 + $0x150] sm:$0xff] }
 0x25b   :  { %v1827_v59 = vsel %vm1826_vm0, %v5003_v25, %v1825_v47  ;;  %v1944_v45 = vsel %vm3725_vm10, %v5242_v56, 0.0  ;;  %v1953_v51 = vsel %vm3719_vm5, %v5250_v7, 0.0  ;;  %v1943_v21 = vsel %vm3719_vm5, %v5259_v13, 0.0  ;;  %v5319_v47 = vld [vmem:[%s5926_s1 + $0x198] sm:$0xff]  ;;  %v5335_v0 = vld [vmem:[%s5926_s1 + $0x190] sm:$0xff]  ;;  %vm5984_vm0 = vmmov %vm5981_vm1 }
 0x25c   :  { %1977 = vadd.xlane.f32.xlu2 %v1976_v12  ;;  %v1830_v14 = vsel %vm1828_vm12, %v1829_v10, %v1827_v59  ;;  %v1837_v38 = vmul.f32 %v1836_v11, %v4930_v9  ;;  %v1952_v37 = vsel %vm3725_vm10, %v5268_v1, 0.0  ;;  %v1960_v36 = vsel %vm3725_vm10, %v5276_v18, 0.0  ;;  %v5301_v12 = vld [vmem:[%s5926_s1 + $0x1a0] sm:$0xff]  ;;  %v5327_v59 = vld [vmem:[%s5926_s1 + $0x1d8] sm:$0xff]  ;;  %vm5985_vm12 = vmmov %vm5984_vm0 }
 0x25d   :  { %v1873_v27 = vsel %vm3101_vm6, %v1830_v14, 0.0  ;;  %vm5977_vm6 = vmmov %vm5976_vm2  ;;  %v1951_v31 = vsel %vm3719_vm5, %v5284_v41, 0.0  ;;  %v1995_v19 = vsel %vm5980_vm9, %v1952_v37, 0.0  ;;  %v1950_v23 = vsel %vm3725_vm10, %v5293_v22, 0.0  ;;  %v5344_v14 = vld [vmem:[%s5926_s1 + $0x188] sm:$0xff] }
 0x25e   :  { %v1839_v25 = vsel %vm1838_vm13, %v4930_v9, %v1837_v38  ;;  %v5224_v9 = vld [vmem:[%s5926_s1 + $0x178] sm:$0xff]  ;;  %v1983_v4 = vsel %vm5977_vm6, %v1946_v6, 0.0  ;;  %v1959_v24 = vsel %vm3719_vm5, %v5301_v12, 0.0  ;;  %v2011_v46 = vsel %vm5981_vm1, %v1960_v36, 0.0  ;;  %vm5986_vm13 = vmmov %vm5984_vm0 }
 0x25f   :  { %v1842_v2 = vsel %vm1840_vm3, %v1841_v5, %v1839_v25  ;;  %v1954_v20 = vsel %vm3725_vm10, %v5224_v9, 0.0  ;;  %v1984_v43 = vadd.f32 %v1983_v4, %v1945_v61  ;;  %v1996_v26 = vadd.f32 %v1995_v19, %v1951_v31  ;;  %v5352_v25 = vld [vmem:[%s5926_s1 + $0x1d0] sm:$0xff]  ;;  %v5370_v61 = vld [vmem:[%s5926_s1 + $0x1c8] sm:$0xff]  ;;  %vm5988_vm3 = vmmov %vm5984_vm0 }
 0x260   :  { %v1874_v50 = vsel %vm3105_vm7, %v1842_v2, 0.0  ;;  %vm5978_vm7 = vmmov %vm5976_vm2  ;;  %v1949_v62 = vsel %vm3719_vm5, %v5310_v28, 0.0  ;;  %v1991_v42 = vsel %vm5982_vm4, %v1950_v23, 0.0  ;;  %v2012_v32 = vadd.f32 %v2011_v46, %v1959_v24 }
 0x261   :  { %v1935_v48 = vsel %vm685_vm8, %v1874_v50, 0.0  ;;  %v1999_v40 = vsel %vm5978_vm7, %v1954_v20, 0.0  ;;  %vm5979_vm8 = vmmov %vm5976_vm2  ;;  %v1958_v10 = vsel %vm3725_vm10, %v5319_v47, 0.0  ;;  %v1992_v11 = vadd.f32 %v1991_v42, %v1949_v62 }
 0x262   :  { %1973 = vadd.xlane.f32.xlu1 %v1972_v58  ;;  %v1936_v15 = vadd.f32 %v1935_v48, %v1873_v27  ;;  %v1979_v33 = vsel %vm5979_vm8, %v1944_v45, 0.0  ;;  %v2000_v35 = vadd.f32 %v1999_v40, %v1953_v51  ;;  %v1966_v5 = vsel %vm3725_vm10, %v5327_v59, 0.0  ;;  %v5361_v27 = vld [vmem:[%s5926_s1 + $0x180] sm:$0xff]  ;;  %vm5987_vm2 = vmmov %vm5984_vm0 }
 0x263   :  { %v1980_v3 = vadd.f32 %v1979_v33, %v1943_v21  ;;  %v1957_v52 = vsel %vm3719_vm5, %v5335_v0, 0.0  ;;  %v2007_v58 = vsel %vm5983_vm11, %v1958_v10, 0.0  ;;  %v1956_v38 = vsel %vm3725_vm10, %v5344_v14, 0.0  ;;  %v5381_v51 = vld [vmem:[%s5926_s1 + $0x1c0] sm:$0xff]  ;;  %v5390_v21 = vld [vmem:[%s5926_s1 + $0x1b8] sm:$0xff]  ;;  %vm5989_vm6 = vmmov %vm5984_vm0 }
 0x264   :  { %1989 = vadd.xlane.f32.xlu2 %v1988_v44  ;;  %1937 = vadd.xlane.f32.xlu0 %v1936_v15  ;;  %v1965_v44 = vsel %vm3719_vm5, %v5352_v25, 0.0  ;;  %v2023_v6 = vsel %vm5984_vm0, %v1966_v5, 0.0  ;;  %v2008_v2 = vadd.f32 %v2007_v58, %v1957_v52  ;;  %v1955_v50 = vsel %vm3719_vm5, %v5361_v27, 0.0  ;;  %vm5990_vm7 = vmmov %vm5984_vm0  ;;  %v5443_v52 = vld [vmem:[%s5926_s1 + $0x1e0] sm:$0xff] }
 0x265   :  { %v2003_v20 = vsel %vm5985_vm12, %v1956_v38, 0.0  ;;  %v2024_v48 = vadd.f32 %v2023_v6, %v1965_v44  ;;  %v1964_v4 = vsel %vm3725_vm10, %v5370_v61, 0.0  ;;  %v2036_v45 = vsel %vm3974_vm14, %v5166_v49, 0.0  ;;  %vm5991_vm8 = vmmov %vm5984_vm0 }
 0x266   :  { %v2004_v15 = vadd.f32 %v2003_v20, %v1955_v50  ;;  %v1963_v40 = vsel %vm3719_vm5, %v5381_v51, 0.0  ;;  %v1962_v49 = vsel %vm3725_vm10, %v5390_v21, 0.0  ;;  %v2035_v33 = vsel %vm3988_vm15, %v5183_v55, 0.0  ;;  %v5411_v55 = vld [vmem:[%s5926_s1 + $0x1f8] sm:$0xff]  ;;  %vm5994_vm9 = vmmov %vm5984_vm0 }
 0x267   :  { %v2015_v31 = vsel %vm5988_vm3, %v1962_v49, 0.0  ;;  %v1970_v23 = vsel %vm3725_vm10, %v5411_v55, 0.0  ;;  %v2042_v46 = vsel %vm3974_vm14, %v5212_v39, 0.0  ;;  %v2041_v10 = vsel %vm3988_vm15, %v5233_v60, 0.0  ;;  %vm5995_vm1 = vmmov %vm5984_vm0 }
 0x268   :  { %v2031_v42 = vsel %vm5989_vm6, %v1970_v23, 0.0  ;;  %v1967_v58 = vsel %vm3719_vm5, %v5443_v52, 0.0  ;;  %v2040_v60 = vsel %vm3974_vm14, %v5242_v56, 0.0  ;;  %v2048_v6 = vsel %vm3974_vm14, %v5268_v1, 0.0  ;;  %vm5996_vm4 = vmmov %vm5984_vm0 }
 0x269   :  { %v2038_v50 = vsel %vm3974_vm14, %v5136_v29, 0.0  ;;  %v2047_v56 = vsel %vm3988_vm15, %v5284_v41, 0.0  ;;  %v2037_v1 = vsel %vm3988_vm15, %v5149_v63, 0.0  ;;  %v2054_v41 = vsel %vm3974_vm14, %v5319_v47, 0.0  ;;  %vm5997_vm11 = vmmov %vm5984_vm0 }
 0x26a   :  { %1985 = vadd.xlane.f32.xlu1 %v1984_v43  ;;  %v2019_v43 = vsel %vm5986_vm13, %v1964_v4, 0.0  ;;  %v2044_v63 = vsel %vm3974_vm14, %v5175_v54, 0.0  ;;  %v2043_v47 = vsel %vm3988_vm15, %v5200_v34, 0.0  ;;  %v2050_v34 = vsel %vm3974_vm14, %v5224_v9, 0.0  ;;  %vm5998_vm12 = vmmov %vm5984_vm0 }
 0x26b   :  { %v2020_v37 = vadd.f32 %v2019_v43, %v1963_v40  ;;  %v2103_v43 = vsel %vm5996_vm4, %v2054_v41, 0.0  ;;  %vm5999_vm13 = vmmov %vm5984_vm0 }
 0x26c   :  { %2001 = vadd.xlane.f32.xlu2 %v2000_v35  ;;  %1981 = vadd.xlane.f32.xlu0 %v1980_v3  ;;  %v2067_v35 = vsel %vm5987_vm2, %v2036_v45, 0.0  ;;  %v5402_v3 = vld [vmem:[%s5926_s1 + $0x1b0] sm:$0xff]  ;;  %v2045_v45 = vsel %vm3988_vm15, %v5310_v28, 0.0  ;;  %v2083_v28 = vsel %vm5997_vm11, %v2044_v63, 0.0  ;;  %vm6000_vm2 = vmmov %vm5984_vm0  ;;  %v972_v63 = vcvt.s32.f32 %v956_v17 }
 0x26d   :  { %v1961_v36 = vsel %vm3719_vm5, %v5402_v3, 0.0  ;;  %v2068_v19 = vadd.f32 %v2067_v35, %v2035_v33  ;;  %v2052_v35 = vsel %vm3974_vm14, %v5344_v14, 0.0  ;;  %v2084_v54 = vadd.f32 %v2083_v28, %v2043_v47  ;;  %vm6001_vm3 = vmmov %vm5984_vm0 }
 0x26e   :  { %v2016_v24 = vadd.f32 %v2015_v31, %v1961_v36  ;;  %v2099_v36 = vsel %vm5984_vm0, %v2052_v35, 0.0  ;;  %v2059_v14 = vsel %vm3988_vm15, %v5381_v51, 0.0  ;;  %v2066_v51 = vsel %vm3974_vm14, %v5411_v55, 0.0  ;;  %vm6002_vm6 = vmmov %vm5984_vm0  ;;  %v965_v35 = vld [vmem:[%s5927_s2 + $0x60] sm:$0xff] }
 0x26f   :  { %v2127_v55 = vsel %vm6001_vm3, %v2066_v51, 0.0 }
 0x272   :  { %1997 = vadd.xlane.f32.xlu1 %v1996_v26  ;;  %v5422_v26 = vld [vmem:[%s5926_s1 + $0x1f0] sm:$0xff] }
 0x273   :  { %v1969_v62 = vsel %vm3719_vm5, %v5422_v26, 0.0  ;;  %vm5993_vm5 = vmmov %vm5984_vm0 }
 0x274   :  { %2013 = vadd.xlane.f32.xlu2 %v2012_v32  ;;  %1993 = vadd.xlane.f32.xlu0 %v1992_v11  ;;  %v5431_v32 = vld [vmem:[%s5926_s1 + $0x1e8] sm:$0xff]  ;;  %v2079_v11 = vsel %vm5990_vm7, %v2042_v46, 0.0  ;;  %v2032_v5 = vadd.f32 %v2031_v42, %v1969_v62  ;;  %v2091_v20 = vsel %vm5993_vm5, %v2048_v6, 0.0  ;;  %v2057_v46 = vsel %vm3988_vm15, %v5402_v3, 0.0  ;;  %v5532_v3 = vpop.xlane.xlu2 %1885  ;;  %vm6003_vm7 = vmmov %vm5984_vm0  ;;  %v957_v6 = vld [vmem:[%s5927_s2 + $0x20] sm:$0xff] }
 0x275   :  { %v1968_v39 = vsel %vm3725_vm10, %v5431_v32, 0.0  ;;  %v2080_v38 = vadd.f32 %v2079_v11, %v2041_v10  ;;  %vm5992_vm10 = vmmov %vm5984_vm0  ;;  %v2092_v4 = vadd.f32 %v2091_v20, %v2047_v56  ;;  %v2065_v42 = vsel %vm3988_vm15, %v5422_v26, 0.0 }
 0x276   :  { %v2027_v53 = vsel %vm5991_vm8, %v1968_v39, 0.0  ;;  %v2075_v30 = vsel %vm5992_vm10, %v2040_v60, 0.0  ;;  %v2055_v10 = vsel %vm3988_vm15, %v5301_v12, 0.0  ;;  %v2061_v20 = vsel %vm3988_vm15, %v5352_v25, 0.0  ;;  %vm6004_vm8 = vmmov %vm5984_vm0  ;;  %v959_v25 = vld [vmem:[%s5927_s2 + $0x30] sm:$0xff] }
 0x277   :  { %v2028_v44 = vadd.f32 %v2027_v53, %v1967_v58  ;;  %v2064_v58 = vsel %vm3974_vm14, %v5431_v32, 0.0  ;;  %v955_v53 = vld [vmem:[%s5927_s2 + $0x10] sm:$0xff]  ;;  %v2062_v32 = vsel %vm3974_vm14, %v5327_v59, 0.0  ;;  %v973_v57 = vcvt.s32.f32 %v957_v6  ;;  %v5565_v59 = vpop.xlane.xlu0 %1877 }
 0x278   :  { %v2123_v12 = vsel %vm6003_vm7, %v2064_v58, 0.0  ;;  %vm1065_vm0 = vcmp.eq.s32.totalorder %v4335_v8, 0 }
 0x27a   :  { %2009 = vadd.xlane.f32.xlu1 %v2008_v2  ;;  %v2039_v2 = vsel %vm3988_vm15, %v5259_v13, 0.0  ;;  %v2071_v13 = vsel %vm5994_vm9, %v2038_v50, 0.0 }
 0x27b   :  { %v2072_v29 = vadd.f32 %v2071_v13, %v2037_v1 }
 0x27c   :  { %2025 = vadd.xlane.f32.xlu2 %v2024_v48  ;;  %2005 = vadd.xlane.f32.xlu0 %v2004_v15  ;;  %v2076_v48 = vadd.f32 %v2075_v30, %v2039_v2  ;;  %v2046_v15 = vsel %vm3974_vm14, %v5293_v22, 0.0  ;;  %v2053_v22 = vsel %vm3988_vm15, %v5335_v0, 0.0  ;;  %v2060_v0 = vsel %vm3974_vm14, %v5370_v61, 0.0  ;;  %v5557_v2 = vpop.xlane.xlu1 %1881 }
 0x27d   :  { %v2087_v40 = vsel %vm5995_vm1, %v2046_v15, 0.0  ;;  %v2104_v33 = vadd.f32 %v2103_v43, %v2053_v22  ;;  %v2115_v31 = vsel %vm5998_vm12, %v2060_v0, 0.0  ;;  %v2049_v61 = vsel %vm3988_vm15, %v5250_v7, 0.0  ;;  %v962_v15 = vld [vmem:[%s5927_s2 + $0x48] sm:$0xff] }
 0x27e   :  { %v2088_v49 = vadd.f32 %v2087_v40, %v2045_v45  ;;  %v2116_v23 = vadd.f32 %v2115_v31, %v2059_v14  ;;  %v2056_v7 = vsel %vm3974_vm14, %v5276_v18, 0.0  ;;  %v971_v30 = vcvt.s32.f32 %v955_v53  ;;  %v961_v14 = vld [vmem:[%s5927_s2 + $0x40] sm:$0xff]  ;;  %v964_v53 = vld [vmem:[%s5927_s2 + $0x58] sm:$0xff] }
 0x27f   :  { %v2107_v18 = vsel %vm6002_vm6, %v2056_v7, 0.0  ;;  %v978_v40 = vcvt.s32.f32 %v962_v15  ;;  %v975_v43 = vcvt.s32.f32 %v959_v25  ;;  %v5580_v47 = vpop.xlane.xlu0 %1889  ;;  %v977_v51 = vcvt.s32.f32 %v961_v14 }
 0x280   :  { %v2108_v26 = vadd.f32 %v2107_v18, %v2055_v10  ;;  %v987_v1 = vmax.f32 %v971_v30, 1.0 }
 0x281   :  { %v994_v28 = vmax.f32 %v978_v40, 1.0  ;;  %v991_v0 = vmax.f32 %v975_v43, 1.0  ;;  %v963_v40 = vld [vmem:[%s5927_s2 + $0x50] sm:$0xff] }
 0x282   :  { %2021 = vadd.xlane.f32.xlu1 %v2020_v37  ;;  %v2051_v37 = vsel %vm3988_vm15, %v5361_v27, 0.0  ;;  %v2095_v27 = vsel %vm5999_vm13, %v2050_v34, 0.0  ;;  %vm1199_vm13 = vcmask 23552  }
 0x283   :  { %v2096_v9 = vadd.f32 %v2095_v27, %v2049_v61  ;;  %v5559_v56 = vpop.xlane.xlu2 %1897  ;;  %v981_v61 = vcvt.s32.f32 %v965_v35 }
 0x284   :  { %2069 = vadd.xlane.f32.xlu2 %v2068_v19  ;;  %2017 = vadd.xlane.f32.xlu0 %v2016_v24  ;;  %v2100_v19 = vadd.f32 %v2099_v36, %v2051_v37  ;;  %v2058_v24 = vsel %vm3974_vm14, %v5390_v21, 0.0  ;;  %v954_v21 = vld [vmem:[%s5927_s2 + $0x8] sm:$0xff]  ;;  %vm6005_vm14 = vcmp.eq.s32.totalorder %v4335_v8, 1 }
 0x285   :  { %v2111_v62 = vsel %vm6000_vm2, %v2058_v24, 0.0  ;;  %v970_v11 = vcvt.s32.f32 %v954_v21  ;;  %v958_v37 = vld [vmem:[%s5927_s2 + $0x28] sm:$0xff]  ;;  %v997_v21 = vmax.f32 %v981_v61, 1.0  ;;  %vm6007_vm10 = vmmov %vm6005_vm14 }
 0x286   :  { %v2112_v39 = vadd.f32 %v2111_v62, %v2057_v46  ;;  %vm6008_vm5 = vmmov %vm6007_vm10 }
 0x287   :  { %v986_v60 = vmax.f32 %v970_v11, 1.0  ;;  %v993_v11 = vmax.f32 %v977_v51, 1.0  ;;  %vm6009_vm9 = vmmov %vm6008_vm5 }
 0x288   :  { %vm6010_vm1 = vmmov %vm6008_vm5 }
 0x289   :  { %2708 = vrcp.f32 %v986_v60  ;;  %vm6011_vm4 = vmmov %vm6010_vm1 }
 0x28a   :  { %2033 = vadd.xlane.f32.xlu1 %v2032_v5  ;;  %v2128_v5 = vadd.f32 %v2127_v55, %v2065_v42  ;;  %2710 = vrcp.f32 %v987_v1  ;;  %vm6012_vm11 = vmmov %vm6010_vm1 }
 0x28b   :  { %vm6013_vm12 = vmmov %vm6010_vm1 }
 0x28c   :  { %2081 = vadd.xlane.f32.xlu2 %v2080_v38  ;;  %2029 = vadd.xlane.f32.xlu0 %v2028_v44  ;;  %v2063_v38 = vsel %vm3988_vm15, %v5443_v52, 0.0  ;;  %v953_v44 = vld [vmem:[%s5927_s2] sm:$0xff]  ;;  %vm6006_vm15 = vmmov %vm6005_vm14 }
 0x28d   :  { %v2124_v52 = vadd.f32 %v2123_v12, %v2063_v38  ;;  %v969_v50 = vcvt.s32.f32 %v953_v44  ;;  %v5576_v45 = vpop.xlane.xlu1 %1893 }
 0x28f   :  { %v2709_v41 = vpop.eup %2708 }
 0x292   :  { %2077 = vadd.xlane.f32.xlu1 %v2076_v48  ;;  %v2119_v48 = vsel %vm6004_vm8, %v2062_v32, 0.0 }
 0x293   :  { %v2120_v13 = vadd.f32 %v2119_v48, %v2061_v20  ;;  %v980_v20 = vcvt.s32.f32 %v964_v53 }
 0x294   :  { %2093 = vadd.xlane.f32.xlu2 %v2092_v4  ;;  %2073 = vadd.xlane.f32.xlu0 %v2072_v29  ;;  %v985_v4 = vmax.f32 %v969_v50, 1.0  ;;  %v989_v29 = vmax.f32 %v973_v57, 1.0 }
 0x296   :  { %2712 = vrcp.f32 %v985_v4 }
 0x297   :  { %2714 = vrcp.f32 %v989_v29  ;;  %v5593_v7 = vpop.xlane.xlu0 %1901 }
 0x298   :  { %2716 = vrcp.f32 %v994_v28 }
 0x29a   :  { %2089 = vadd.xlane.f32.xlu1 %v2088_v49  ;;  %v1018_v49 = vmul.f32 %v2709_v41, %v986_v60 }
 0x29c   :  { %2105 = vadd.xlane.f32.xlu2 %v2104_v33  ;;  %2085 = vadd.xlane.f32.xlu0 %v2084_v54  ;;  %v988_v33 = vmax.f32 %v972_v63, 1.0  ;;  %v2711_v54 = vpop.eup %2710  ;;  %v1034_v34 = vsub.f32 2.0, %v1018_v49  ;;  %v967_v49 = vld [vmem:[%s5927_s2 + $0x70] sm:$0xff] }
 0x29d   :  { %v2713_v36 = vpop.eup %2712  ;;  %v1019_v27 = vmul.f32 %v2711_v54, %v987_v1 }
 0x29e   :  { %v5578_v22 = vpop.xlane.xlu2 %1909  ;;  %v2715_v31 = vpop.eup %2714  ;;  %2718 = vrcp.f32 %v988_v33  ;;  %v1050_v46 = vmul.f32 %v2709_v41, %v1034_v34  ;;  %v996_v41 = vmax.f32 %v980_v20, 1.0 }
 0x29f   :  { %2720 = vrcp.f32 %v991_v0  ;;  %v1021_v62 = vmul.f32 %v2715_v31, %v989_v29  ;;  %v1035_v42 = vsub.f32 2.0, %v1019_v27  ;;  %v2717_v10 = vpop.eup %2716  ;;  %v2559_v29 = vld [vmem:[%s5927_s2 + $0x80] sm:$0xff] }
 0x2a0   :  { %2722 = vrcp.f32 %v997_v21  ;;  %v1026_v32 = vmul.f32 %v2717_v10, %v994_v28  ;;  %v2148_v35 = vcvt.s32.f32 %v2559_v29 }
 0x2a1   :  { %v1051_v44 = vmul.f32 %v2711_v54, %v1035_v42 }
 0x2a2   :  { %2101 = vadd.xlane.f32.xlu1 %v2100_v19 }
 0x2a4   :  { %2117 = vadd.xlane.f32.xlu2 %v2116_v23  ;;  %2097 = vadd.xlane.f32.xlu0 %v2096_v9  ;;  %v974_v23 = vcvt.s32.f32 %v958_v37  ;;  %v1017_v9 = vmul.f32 %v2713_v36, %v985_v4  ;;  %v2719_v58 = vpop.eup %2718  ;;  %v1042_v4 = vsub.f32 2.0, %v1026_v32  ;;  %v979_v37 = vcvt.s32.f32 %v963_v40 }
 0x2a5   :  { %v2721_v38 = vpop.eup %2720  ;;  %v1020_v50 = vmul.f32 %v2719_v58, %v988_v33 }
 0x2a6   :  { %v5591_v19 = vpop.xlane.xlu1 %1905  ;;  %v990_v55 = vmax.f32 %v974_v23, 1.0  ;;  %v1033_v18 = vsub.f32 2.0, %v1017_v9  ;;  %v1023_v57 = vmul.f32 %v2721_v38, %v991_v0  ;;  %v2723_v17 = vpop.eup %2722  ;;  %v1058_v54 = vmul.f32 %v2717_v10, %v1042_v4 }
 0x2a7   :  { %v1036_v25 = vsub.f32 2.0, %v1020_v50  ;;  %v1029_v0 = vmul.f32 %v2723_v17, %v997_v21  ;;  %v995_v51 = vmax.f32 %v979_v37, 1.0 }
 0x2a8   :  { %2724 = vrcp.f32 %v990_v55  ;;  %v1039_v43 = vsub.f32 2.0, %v1023_v57  ;;  %v2564_v57 = vld [vmem:[%s5927_s2 + $0xa8] sm:$0xff] }
 0x2a9   :  { %2726 = vrcp.f32 %v993_v11  ;;  %v1052_v34 = vmul.f32 %v2719_v58, %v1036_v25  ;;  %v1045_v9 = vsub.f32 2.0, %v1029_v0  ;;  %v2565_v25 = vld [vmem:[%s5927_s2 + $0xb0] sm:$0xff] }
 0x2aa   :  { %2113 = vadd.xlane.f32.xlu1 %v2112_v39  ;;  %v968_v39 = vld [vmem:[%s5927_s2 + $0x78] sm:$0xff]  ;;  %v1055_v61 = vmul.f32 %v2721_v38, %v1039_v43  ;;  %v2154_v0 = vcvt.s32.f32 %v2565_v25 }
 0x2ab   :  { %v984_v60 = vcvt.s32.f32 %v968_v39 }
 0x2ac   :  { %2129 = vadd.xlane.f32.xlu2 %v2128_v5  ;;  %2109 = vadd.xlane.f32.xlu0 %v2108_v26  ;;  %v960_v5 = vld [vmem:[%s5927_s2 + $0x38] sm:$0xff]  ;;  %v1037_v26 = vsub.f32 2.0, %v1021_v62 }
 0x2ad   :  { %v976_v6 = vcvt.s32.f32 %v960_v5 }
 0x2ae   :  { %v1053_v48 = vmul.f32 %v2715_v31, %v1037_v26  ;;  %v2725_v63 = vpop.eup %2724  ;;  %v983_v31 = vcvt.s32.f32 %v967_v49  ;;  %v1061_v26 = vmul.f32 %v2723_v17, %v1045_v9 }
 0x2af   :  { %v1914_v1 = vpop.xlane.xlu0 %1913  ;;  %v992_v15 = vmax.f32 %v976_v6, 1.0  ;;  %v2727_v28 = vpop.eup %2726  ;;  %v1022_v14 = vmul.f32 %v2725_v63, %v990_v55  ;;  %v966_v55 = vld [vmem:[%s5927_s2 + $0x68] sm:$0xff] }
 0x2b0   :  { %v1025_v27 = vmul.f32 %v2727_v28, %v993_v11  ;;  %v999_v42 = vmax.f32 %v983_v31, 1.0  ;;  %v982_v38 = vcvt.s32.f32 %v966_v55 }
 0x2b1   :  { %v1038_v21 = vsub.f32 2.0, %v1022_v14 }
 0x2b2   :  { %2125 = vadd.xlane.f32.xlu1 %v2124_v52  ;;  %v1922_v24 = vpop.xlane.xlu2 %1921  ;;  %v1049_v52 = vmul.f32 %v2713_v36, %v1033_v18  ;;  %v1041_v10 = vsub.f32 2.0, %v1025_v27  ;;  %v2561_v18 = vld [vmem:[%s5927_s2 + $0x90] sm:$0xff] }
 0x2b3   :  { %v2164_v24 = vmax.f32 %v2148_v35, 1.0  ;;  %v2150_v32 = vcvt.s32.f32 %v2561_v18 }
 0x2b4   :  { %2121 = vadd.xlane.f32.xlu0 %v2120_v13  ;;  %v1000_v13 = vmax.f32 %v984_v60, 1.0  ;;  %v1054_v60 = vmul.f32 %v2725_v63, %v1038_v21  ;;  %v1057_v6 = vmul.f32 %v2727_v28, %v1041_v10  ;;  %v2153_v63 = vcvt.s32.f32 %v2564_v57  ;;  %v2570_v57 = vld [vmem:[%s5927_s2 + $0xd8] sm:$0xff] }
 0x2b5   :  { %v2166_v4 = vmax.f32 %v2150_v32, 1.0 }
 0x2b6   :  { %2728 = vrcp.f32 %v1000_v13  ;;  %v2169_v31 = vmax.f32 %v2153_v63, 1.0 }
 0x2b7   :  { %2730 = vrcp.f32 %v992_v15 }
 0x2b8   :  { %2732 = vrcp.f32 %v996_v41 }
 0x2b9   :  { %2734 = vrcp.f32 %v2164_v24 }
 0x2ba   :  { %v1918_v12 = vpop.xlane.xlu1 %1917  ;;  %2736 = vrcp.f32 %v995_v51 }
 0x2bb   :  { %2738 = vrcp.f32 %v999_v42 }
 0x2bc   :  { %v2729_v62 = vpop.eup %2728 }
 0x2bd   :  { %v2731_v39 = vpop.eup %2730  ;;  %v1032_v53 = vmul.f32 %v2729_v62, %v1000_v13 }
 0x2be   :  { %v2733_v11 = vpop.eup %2732 }
 0x2bf   :  { %v1048_v20 = vsub.f32 2.0, %v1032_v53  ;;  %v2735_v1 = vpop.eup %2734 }
 0x2c0   :  { %v2737_v29 = vpop.eup %2736  ;;  %v2196_v49 = vmul.f32 %v2735_v1, %v2164_v24 }
 0x2c1   :  { %v1064_v43 = vmul.f32 %v2729_v62, %v1048_v20 }
 0x2c2   :  { %v1926_v23 = vpop.xlane.xlu0 %1925 }
 0x2c3   :  { %v2567_v23 = vld [vmem:[%s5927_s2 + $0xc0] sm:$0xff] }
 0x2c4   :  { %1110 = vperm.xlu2 %2579, %v1050_v46   ;;  %v2562_v46 = vld [vmem:[%s5927_s2 + $0x98] sm:$0xff]  ;;  %v2156_v10 = vcvt.s32.f32 %v2567_v23 }
 0x2c5   :  { %v2151_v58 = vcvt.s32.f32 %v2562_v46  ;;  %v2170_v46 = vmax.f32 %v2154_v0, 1.0 }
 0x2c7   :  { %v1934_v30 = vpop.xlane.xlu2 %1933  ;;  %v2167_v50 = vmax.f32 %v2151_v58, 1.0 }
 0x2c8   :  { %1115 = vperm.xlu0 %2577, %v1051_v44   ;;  %v1024_v44 = vmul.f32 %v2731_v39, %v992_v15  ;;  %v1028_v30 = vmul.f32 %v2733_v11, %v996_v41  ;;  %v2560_v15 = vld [vmem:[%s5927_s2 + $0x88] sm:$0xff]  ;;  %v2739_v41 = vpop.eup %2738 }
 0x2c9   :  { %2740 = vrcp.f32 %v2167_v50  ;;  %v2149_v28 = vcvt.s32.f32 %v2560_v15 }
 0x2ca   :  { %v1040_v13 = vsub.f32 2.0, %v1024_v44  ;;  %v1044_v17 = vsub.f32 2.0, %v1028_v30  ;;  %v2172_v30 = vmax.f32 %v2156_v10, 1.0 }
 0x2cb   :  { %1105 = vperm.xlu1 %2578, %v1049_v52   ;;  %v2165_v27 = vmax.f32 %v2149_v28, 1.0 }
 0x2cc   :  { %1125 = vperm.xlu2 %2579, %v1053_v48   ;;  %v998_v48 = vmax.f32 %v982_v38, 1.0  ;;  %v1056_v35 = vmul.f32 %v2731_v39, %v1040_v13  ;;  %v1060_v37 = vmul.f32 %v2733_v11, %v1044_v17 }
 0x2cd   :  { %v1930_v33 = vpop.xlane.xlu1 %1929 }
 0x2ce   :  { %2742 = vrcp.f32 %v998_v48 }
 0x2cf   :  { %v5613_v36 = vpop.xlane.xlu2 %1977  ;;  %2744 = vrcp.f32 %v2166_v4  ;;  %v2741_v24 = vpop.eup %2740 }
 0x2d0   :  { %1150 = vperm.xlu0 %2577, %v1058_v54   ;;  %v1027_v54 = vmul.f32 %v2737_v29, %v995_v51  ;;  %v2563_v51 = vld [vmem:[%s5927_s2 + $0xa0] sm:$0xff]  ;;  %2746 = vrcp.f32 %v2169_v31  ;;  %v2199_v11 = vmul.f32 %v2741_v24, %v2167_v50 }
 0x2d1   :  { %2748 = vrcp.f32 %v2165_v27  ;;  %v2152_v58 = vcvt.s32.f32 %v2563_v51 }
 0x2d2   :  { %v1043_v9 = vsub.f32 2.0, %v1027_v54  ;;  %2750 = vrcp.f32 %v2170_v46 }
 0x2d3   :  { %1120 = vperm.xlu1 %2578, %v1052_v34   ;;  %v1031_v34 = vmul.f32 %v2739_v41, %v999_v42  ;;  %v2568_v42 = vld [vmem:[%s5927_s2 + $0xc8] sm:$0xff]  ;;  %v2168_v20 = vmax.f32 %v2152_v58, 1.0  ;;  %2752 = vrcp.f32 %v2172_v30 }
 0x2d4   :  { %1135 = vperm.xlu2 %2579, %v1055_v61   ;;  %v2212_v61 = vsub.f32 2.0, %v2196_v49  ;;  %v2743_v62 = vpop.eup %2742  ;;  %v1059_v53 = vmul.f32 %v2737_v29, %v1043_v9  ;;  %v2571_v29 = vld [vmem:[%s5927_s2 + $0xe0] sm:$0xff] }
 0x2d5   :  { %v5624_v5 = vpop.xlane.xlu1 %1973  ;;  %v1047_v21 = vsub.f32 2.0, %v1031_v34  ;;  %v2745_v55 = vpop.eup %2744  ;;  %v1030_v38 = vmul.f32 %v2743_v62, %v998_v48  ;;  %v2566_v48 = vld [vmem:[%s5927_s2 + $0xb8] sm:$0xff]  ;;  %2754 = vrcp.f32 %v2168_v20  ;;  %v2160_v0 = vcvt.s32.f32 %v2571_v29 }
 0x2d6   :  { %v2228_v18 = vmul.f32 %v2735_v1, %v2212_v61  ;;  %v2198_v32 = vmul.f32 %v2745_v55, %v2166_v4  ;;  %v2747_v50 = vpop.eup %2746  ;;  %v2155_v49 = vcvt.s32.f32 %v2566_v48 }
 0x2d7   :  { %v5626_v12 = vpop.xlane.xlu2 %1989  ;;  %v1938_v52 = vpop.xlane.xlu0 %1937  ;;  %v1063_v44 = vmul.f32 %v2739_v41, %v1047_v21  ;;  %v1046_v1 = vsub.f32 2.0, %v1030_v38  ;;  %v2159_v41 = vcvt.s32.f32 %v2570_v57 }
 0x2d8   :  { %1165 = vperm.xlu0 %2577, %v1061_v26   ;;  %v2215_v52 = vsub.f32 2.0, %v2199_v11  ;;  %v2749_v15 = vpop.eup %2748  ;;  %v2214_v4 = vsub.f32 2.0, %v2198_v32  ;;  %v2171_v51 = vmax.f32 %v2155_v49, 1.0 }
 0x2d9   :  { %v2751_v17 = vpop.eup %2750  ;;  %v2197_v54 = vmul.f32 %v2749_v15, %v2165_v27  ;;  %v2175_v23 = vmax.f32 %v2159_v41, 1.0  ;;  %v2569_v27 = vld [vmem:[%s5927_s2 + $0xd0] sm:$0xff] }
 0x2da   :  { %v2231_v63 = vmul.f32 %v2741_v24, %v2215_v52  ;;  %v2202_v34 = vmul.f32 %v2751_v17, %v2170_v46  ;;  %v2573_v24 = vld [vmem:[%s5927_s2 + $0xf0] sm:$0xff] }
 0x2db   :  { %1130 = vperm.xlu1 %2578, %v1054_v60   ;;  %v2157_v60 = vcvt.s32.f32 %v2568_v42  ;;  %v2213_v21 = vsub.f32 2.0, %v2197_v54  ;;  %v2176_v42 = vmax.f32 %v2160_v0, 1.0  ;;  %v2162_v11 = vcvt.s32.f32 %v2573_v24 }
 0x2dc   :  { %1145 = vperm.xlu2 %2579, %v1057_v6   ;;  %v2218_v46 = vsub.f32 2.0, %v2202_v34 }
 0x2dd   :  { %v5637_v40 = vpop.xlane.xlu1 %1985  ;;  %v2173_v13 = vmax.f32 %v2157_v60, 1.0  ;;  %v2229_v60 = vmul.f32 %v2749_v15, %v2213_v21 }
 0x2de   :  { %v2234_v57 = vmul.f32 %v2751_v17, %v2218_v46 }
 0x2df   :  { %v5639_v33 = vpop.xlane.xlu2 %2001  ;;  %v5641_v14 = vpop.xlane.xlu0 %1981  ;;  %2756 = vrcp.f32 %v2173_v13 }
 0x2e0   :  { %1180 = vperm.xlu0 %2577, %v1064_v43   ;;  %v2201_v43 = vmul.f32 %v2747_v50, %v2169_v31  ;;  %v2753_v31 = vpop.eup %2752  ;;  %2758 = vrcp.f32 %v2175_v23 }
 0x2e1   :  { %2760 = vrcp.f32 %v2171_v51 }
 0x2e2   :  { %v2217_v9 = vsub.f32 2.0, %v2201_v43  ;;  %2762 = vrcp.f32 %v2176_v42 }
 0x2e3   :  { %1140 = vperm.xlu1 %2578, %v1056_v35   ;;  %v1062_v35 = vmul.f32 %v2743_v62, %v1046_v1  ;;  %v2755_v62 = vpop.eup %2754 }
 0x2e4   :  { %1160 = vperm.xlu2 %2579, %v1060_v37   ;;  %v2230_v37 = vmul.f32 %v2745_v55, %v2214_v4  ;;  %v2574_v55 = vld [vmem:[%s5927_s2 + $0xf8] sm:$0xff]  ;;  %v2233_v58 = vmul.f32 %v2747_v50, %v2217_v9  ;;  %v2178_v4 = vmax.f32 %v2162_v11, 1.0 }
 0x2e5   :  { %v5652_v39 = vpop.xlane.xlu1 %1997  ;;  %v2757_v10 = vpop.eup %2756  ;;  %v2163_v32 = vcvt.s32.f32 %v2574_v55 }
 0x2e6   :  { %v2205_v1 = vmul.f32 %v2757_v10, %v2173_v13  ;;  %2764 = vrcp.f32 %v2178_v4 }
 0x2e7   :  { %v2014_v26 = vpop.xlane.xlu2 %2013  ;;  %v5654_v6 = vpop.xlane.xlu0 %1993  ;;  %v2179_v41 = vmax.f32 %v2163_v32, 1.0 }
 0x2e8   :  { %2278 = vperm.xlu0 %2577, %v2228_v18   ;;  %v2204_v26 = vmul.f32 %v2753_v31, %v2172_v30  ;;  %v2759_v30 = vpop.eup %2758 }
 0x2e9   :  { %v2761_v15 = vpop.eup %2760  ;;  %v2207_v17 = vmul.f32 %v2759_v30, %v2175_v23 }
 0x2ea   :  { %v2220_v29 = vsub.f32 2.0, %v2204_v26  ;;  %v2203_v54 = vmul.f32 %v2761_v15, %v2171_v51 }
 0x2eb   :  { %1155 = vperm.xlu1 %2578, %v1059_v53   ;;  %v2158_v53 = vcvt.s32.f32 %v2569_v27  ;;  %v2223_v24 = vsub.f32 2.0, %v2207_v17 }
 0x2ec   :  { %1175 = vperm.xlu2 %2579, %v1063_v44   ;;  %v2200_v44 = vmul.f32 %v2755_v62, %v2168_v20  ;;  %v2572_v20 = vld [vmem:[%s5927_s2 + $0xe8] sm:$0xff]  ;;  %v2236_v13 = vmul.f32 %v2753_v31, %v2220_v29  ;;  %v2219_v23 = vsub.f32 2.0, %v2203_v54 }
 0x2ed   :  { %v2010_v25 = vpop.xlane.xlu1 %2009  ;;  %v2174_v50 = vmax.f32 %v2158_v53, 1.0  ;;  %v2161_v49 = vcvt.s32.f32 %v2572_v20 }
 0x2ee   :  { %v2216_v25 = vsub.f32 2.0, %v2200_v44 }
 0x2ef   :  { %v2026_v28 = vpop.xlane.xlu2 %2025  ;;  %v5665_v61 = vpop.xlane.xlu0 %2005  ;;  %2766 = vrcp.f32 %v2174_v50  ;;  %v2177_v21 = vmax.f32 %v2161_v49, 1.0 }
 0x2f0   :  { %2293 = vperm.xlu0 %2577, %v2231_v63   ;;  %v2221_v63 = vsub.f32 2.0, %v2205_v1  ;;  %2768 = vrcp.f32 %v2179_v41 }
 0x2f1   :  { %2770 = vrcp.f32 %v2177_v21 }
 0x2f3   :  { %1170 = vperm.xlu1 %2578, %v1062_v35   ;;  %v2232_v35 = vmul.f32 %v2755_v62, %v2216_v25 }
 0x2f4   :  { %2288 = vperm.xlu2 %2579, %v2230_v37   ;;  %v2237_v37 = vmul.f32 %v2757_v10, %v2221_v63 }
 0x2f5   :  { %v2022_v18 = vpop.xlane.xlu1 %2021 }
 0x2f6   :  { %v2235_v18 = vmul.f32 %v2761_v15, %v2219_v23  ;;  %v6018_v23 = vld [vmem:[#allocation10_spill] sm:$0xff] }
 0x2f7   :  { %v2070_v38 = vpop.xlane.xlu2 %2069  ;;  %v2018_v48 = vpop.xlane.xlu0 %2017 }
 0x2f8   :  { %v5679_v52 = vsel %vm6005_vm14, %v5624_v5, %v2070_v38  ;;  %2303 = vperm.xlu0 %2577, %v2233_v58   ;;  %v2763_v5 = vpop.eup %2762 }
 0x2f9   :  { %v2208_v34 = vmul.f32 %v2763_v5, %v2176_v42  ;;  %v2765_v27 = vpop.eup %2764 }
 0x2fa   :  { %v2767_v31 = vpop.eup %2766  ;;  %v2210_v10 = vmul.f32 %v2765_v27, %v2178_v4 }
 0x2fb   :  { %2283 = vperm.xlu1 %2578, %v2229_v60   ;;  %v2224_v46 = vsub.f32 2.0, %v2208_v34  ;;  %v2769_v62 = vpop.eup %2768  ;;  %v2206_v11 = vmul.f32 %v2767_v31, %v2174_v50  ;;  %v6015_v34 = vld [vmem:[#allocation23_spill] sm:$0xff] }
 0x2fc   :  { %2308 = vperm.xlu2 %2579, %v2234_v57   ;;  %v2211_v53 = vmul.f32 %v2769_v62, %v2179_v41  ;;  %v2771_v32 = vpop.eup %2770 }
 0x2fd   :  { %v2034_v43 = vpop.xlane.xlu1 %2033  ;;  %v2240_v26 = vmul.f32 %v2763_v5, %v2224_v46  ;;  %v2222_v44 = vsub.f32 2.0, %v2206_v11  ;;  %v2209_v50 = vmul.f32 %v2771_v32, %v2177_v21 }
 0x2fe   :  { %v2227_v57 = vsub.f32 2.0, %v2211_v53  ;;  %v6021_v53 = vld [vmem:[#allocation19_spill] sm:$0xff] }
 0x2ff   :  { %v2082_v28 = vpop.xlane.xlu2 %2081  ;;  %v2030_v9 = vpop.xlane.xlu0 %2029  ;;  %v2238_v29 = vmul.f32 %v2767_v31, %v2222_v44  ;;  %v2225_v41 = vsub.f32 2.0, %v2209_v50  ;;  %v6025_v50 = vld [vmem:[#allocation24_spill] sm:$0xff] }
 0x300   :  { %v5687_v0 = vsel %vm6006_vm15, %v5637_v40, %v2082_v28  ;;  %2318 = vperm.xlu0 %2577, %v2236_v13   ;;  %v2239_v40 = vmul.f32 %v2759_v30, %v2223_v24  ;;  %v2243_v30 = vmul.f32 %v2769_v62, %v2227_v57  ;;  %v6014_v28 = vld [vmem:[#allocation4_spill] sm:$0xff]  ;;  %v6016_v9 = vld [vmem:[#allocation9_spill] sm:$0xff] }
 0x301   :  { %v2241_v63 = vmul.f32 %v2771_v32, %v2225_v41  ;;  %v6023_v32 = vld [vmem:[#allocation28_spill] sm:$0xff] }
 0x302   :  { %v6024_v57 = vld [vmem:[#allocation8_spill] sm:$0xff] }
 0x303   :  { %2298 = vperm.xlu1 %2578, %v2232_v35  }
 0x304   :  { %2323 = vperm.xlu2 %2579, %v2237_v37  }
 0x305   :  { %v2078_v51 = vpop.xlane.xlu1 %2077 }
 0x306   :  { %v5692_v55 = vsel %vm6007_vm10, %v5641_v14, %v2078_v51  ;;  %v2226_v14 = vsub.f32 2.0, %v2210_v10  ;;  %v6020_v10 = vld [vmem:[#allocation7_spill] sm:$0xff] }
 0x307   :  { %v2094_v42 = vpop.xlane.xlu2 %2093  ;;  %v2074_v38 = vpop.xlane.xlu0 %2073 }
 0x308   :  { %v5697_v58 = vsel %vm6008_vm5, %v5652_v39, %v2094_v42  ;;  %v5702_v60 = vsel %vm6009_vm9, %v5613_v36, %v2074_v38  ;;  %2333 = vperm.xlu0 %2577, %v2239_v40   ;;  %v2242_v48 = vmul.f32 %v2765_v27, %v2226_v14  ;;  %v6019_v40 = vld [vmem:[#allocation22_spill] sm:$0xff]  ;;  %v6022_v38 = vld [vmem:[#allocation3_spill] sm:$0xff] }
 0x309   :  { %v1089_v42 = vsel %vm1065_vm0, %v6020_v10, %v6019_v40  ;;  %v1087_v14 = vsel %vm1065_vm0, %v6022_v38, %v6021_v53  ;;  %v6036_v40 = vld [vmem:[#allocation14_spill] sm:$0xff] }
 0x30a   :  { %v6037_v38 = vld [vmem:[#allocation30_spill] sm:$0xff] }
 0x30b   :  { %2313 = vperm.xlu1 %2578, %v2235_v18  }
 0x30c   :  { %2338 = vperm.xlu2 %2579, %v2240_v26  }
 0x30d   :  { %v2090_v1 = vpop.xlane.xlu1 %2089 }
 0x30e   :  { %v5707_v39 = vsel %vm6010_vm1, %v5654_v6, %v2090_v1  ;;  %v1095_v1 = vsel %vm1065_vm0, %v6024_v57, %v6023_v32 }
 0x30f   :  { %v2106_v4 = vpop.xlane.xlu2 %2105  ;;  %v2086_v36 = vpop.xlane.xlu0 %2085 }
 0x310   :  { %v5712_v25 = vsel %vm6011_vm4, %v5626_v12, %v2086_v36  ;;  %2348 = vperm.xlu0 %2577, %v2242_v48  }
 0x313   :  { %2328 = vperm.xlu1 %2578, %v2238_v29  }
 0x314   :  { %2353 = vperm.xlu2 %2579, %v2243_v30   ;;  %v6026_v30 = vld [vmem:[#allocation13_spill] sm:$0xff] }
 0x315   :  { %v2102_v20 = vpop.xlane.xlu1 %2101  ;;  %v1096_v36 = vsel %vm1065_vm0, %v6026_v30, %v6025_v50 }
 0x316   :  { %v5717_v6 = vsel %vm6012_vm11, %v5665_v61, %v2102_v20  ;;  %v1088_v61 = vsel %vm1065_vm0, %v6014_v28, %v4396_v16  ;;  %v6017_v16 = vld [vmem:[#allocation21_spill] sm:$0xff]  ;;  %v6029_v28 = vld [vmem:[#allocation31_spill] sm:$0xff] }
 0x317   :  { %v2118_v15 = vpop.xlane.xlu2 %2117  ;;  %v2098_v5 = vpop.xlane.xlu0 %2097  ;;  %v1093_v31 = vsel %vm1065_vm0, %v6018_v23, %v6017_v16  ;;  %v6033_v23 = vld [vmem:[#allocation25_spill] sm:$0xff] }
 0x318   :  { %v5723_v12 = vsel %vm6013_vm12, %v5639_v33, %v2098_v5  ;;  %v1091_v33 = vsel %vm1065_vm0, %v6016_v9, %v6015_v34  ;;  %v6028_v5 = vld [vmem:[#allocation6_spill] sm:$0xff]  ;;  %v6031_v9 = vld [vmem:[#allocation27_spill] sm:$0xff] }
 0x31b   :  { %2343 = vperm.xlu1 %2578, %v2241_v63   ;;  %v6027_v63 = vld [vmem:[#allocation20_spill] sm:$0xff] }
 0x31d   :  { %v2114_v43 = vpop.xlane.xlu1 %2113 }
 0x31e   :  { %v1090_v43 = vsel %vm1065_vm0, %v6028_v5, %v6027_v63 }
 0x31f   :  { %v2130_v13 = vpop.xlane.xlu2 %2129  ;;  %v2110_v17 = vpop.xlane.xlu0 %2109 }
 0x325   :  { %v2126_v49 = vpop.xlane.xlu1 %2125 }
 0x327   :  { %v1111_v35 = vpop.permute.xlu2 %1110  ;;  %v2122_v37 = vpop.xlane.xlu0 %2121 }
 0x328   :  { %v1184_v54 = vmul.f32 %v1111_v35, %v1088_v61  ;;  %v6030_v61 = vld [vmem:[#allocation11_spill] sm:$0xff] }
 0x329   :  { %v1098_v35 = vsel %vm1065_vm0, %v6030_v61, %v6029_v28  ;;  %v2266_v61 = vsel %vm1065_vm0, %v5593_v7, %v5697_v58  ;;  %v2263_v58 = vsel %vm1065_vm0, %v5580_v47, %v5687_v0 }
 0x32a   :  { %1201 = vst.msk [vmem:[#allocation2 + $0x8] sm:$0xff] %vm1199_vm13, %v1184_v54 }
 0x32f   :  { %v1126_v24 = vpop.permute.xlu2 %1125 }
 0x330   :  { %v1187_v21 = vmul.f32 %v1126_v24, %v1091_v33  ;;  %v6032_v33 = vld [vmem:[#allocation16_spill] sm:$0xff] }
 0x331   :  { %v2469_v27 = vld [vmem:[#allocation2 + $0x8] sm:$0xff]  ;;  %v1099_v24 = vsel %vm1065_vm0, %v6032_v33, %v6031_v9 }
 0x332   :  { %2470 = vst [vmem:[%s5928_s3 + $0x8] sm:$0xff] %v2469_v27  ;;  %v6043_v33 = vld [vmem:[#allocation32_spill] sm:$0xff] }
 0x333   :  { %1204 = vst.msk [vmem:[#allocation2 + $0x20] sm:$0xff] %vm1199_vm13, %v1187_v21 }
 0x337   :  { %v1136_v46 = vpop.permute.xlu2 %1135 }
 0x338   :  { %v1189_v62 = vmul.f32 %v1136_v46, %v1093_v31  ;;  %v6034_v31 = vld [vmem:[#allocation5_spill] sm:$0xff] }
 0x339   :  { %v1092_v46 = vsel %vm1065_vm0, %v6034_v31, %v6033_v23 }
 0x33a   :  { %v2475_v51 = vld [vmem:[#allocation2 + $0x20] sm:$0xff]  ;;  %1206 = vst.msk [vmem:[#allocation2 + $0x30] sm:$0xff] %vm1199_vm13, %v1189_v62  ;;  %v1116_v18 = vpop.permute.xlu0 %1115 }
 0x33b   :  { %2476 = vst [vmem:[%s5928_s3 + $0x20] sm:$0xff] %v2475_v51  ;;  %v1185_v11 = vmul.f32 %v1116_v18, %v1089_v42  ;;  %v6035_v51 = vld [vmem:[#allocation33_spill] sm:$0xff] }
 0x33c   :  { %v1101_v10 = vsel %vm1065_vm0, %v6036_v40, %v6035_v51  ;;  %v2261_v40 = vsel %vm1065_vm0, %v5557_v2, %v5702_v60  ;;  %v2268_v2 = vsel %vm1065_vm0, %v5578_v22, %v5717_v6 }
 0x33d   :  { %v1106_v26 = vpop.permute.xlu1 %1105  ;;  %1202 = vst.msk [vmem:[#allocation2 + $0x10] sm:$0xff] %vm1199_vm13, %v1185_v11 }
 0x33e   :  { %v1183_v44 = vmul.f32 %v1106_v26, %v1087_v14  ;;  %v6038_v14 = vld [vmem:[#allocation18_spill] sm:$0xff] }
 0x33f   :  { %v1146_v48 = vpop.permute.xlu2 %1145 }
 0x340   :  { %1200 = vst.msk [vmem:[#allocation2] sm:$0xff] %vm1199_vm13, %v1183_v44  ;;  %v1191_v4 = vmul.f32 %v1146_v48, %v1095_v1  ;;  %v1102_v44 = vsel %vm1065_vm0, %v6038_v14, %v6037_v38  ;;  %v6039_v48 = vld [vmem:[#allocation26_spill] sm:$0xff] }
 0x341   :  { %v2479_v29 = vld [vmem:[#allocation2 + $0x30] sm:$0xff] }
 0x342   :  { %2480 = vst [vmem:[%s5928_s3 + $0x30] sm:$0xff] %v2479_v29  ;;  %v1151_v41 = vpop.permute.xlu0 %1150 }
 0x343   :  { %1208 = vst.msk [vmem:[#allocation2 + $0x40] sm:$0xff] %vm1199_vm13, %v1191_v4  ;;  %v1192_v20 = vmul.f32 %v1151_v41, %v1096_v36  ;;  %v6040_v4 = vld [vmem:[#allocation12_spill] sm:$0xff]  ;;  %v2262_v41 = vsel %vm1065_vm0, %v5532_v3, %v5692_v55  ;;  %v2260_v3 = vsel %vm1065_vm0, %v5565_v59, %v5679_v52 }
 0x344   :  { %v2471_v13 = vld [vmem:[#allocation2 + $0x10] sm:$0xff]  ;;  %v1094_v29 = vsel %vm1065_vm0, %v6040_v4, %v6039_v48 }
 0x345   :  { %v1121_v15 = vpop.permute.xlu1 %1120  ;;  %2472 = vst [vmem:[%s5928_s3 + $0x10] sm:$0xff] %v2471_v13  ;;  %v6041_v13 = vld [vmem:[#allocation29_spill] sm:$0xff] }
 0x346   :  { %v1186_v17 = vmul.f32 %v1121_v15, %v1090_v43  ;;  %1209 = vst.msk [vmem:[#allocation2 + $0x48] sm:$0xff] %vm1199_vm13, %v1192_v20 }
 0x347   :  { %v2467_v49 = vld [vmem:[#allocation2] sm:$0xff]  ;;  %v1161_v54 = vpop.permute.xlu2 %1160 }
 0x348   :  { %2468 = vst [vmem:[%s5928_s3] sm:$0xff] %v2467_v49  ;;  %v1194_v37 = vmul.f32 %v1161_v54, %v1098_v35 }
 0x349   :  { %1203 = vst.msk [vmem:[#allocation2 + $0x18] sm:$0xff] %vm1199_vm13, %v1186_v17  ;;  %v6042_v17 = vld [vmem:[#allocation15_spill] sm:$0xff] }
 0x34a   :  { %v2483_v34 = vld [vmem:[#allocation2 + $0x40] sm:$0xff]  ;;  %v1166_v21 = vpop.permute.xlu0 %1165  ;;  %1211 = vst.msk [vmem:[#allocation2 + $0x58] sm:$0xff] %vm1199_vm13, %v1194_v37  ;;  %v1097_v49 = vsel %vm1065_vm0, %v6042_v17, %v6041_v13 }
 0x34b   :  { %2484 = vst [vmem:[%s5928_s3 + $0x40] sm:$0xff] %v2483_v34  ;;  %v1195_v27 = vmul.f32 %v1166_v21, %v1099_v24  ;;  %v6044_v24 = vld [vmem:[#allocation17_spill] sm:$0xff] }
 0x34c   :  { %v1100_v21 = vsel %vm1065_vm0, %v6044_v24, %v6043_v33 }
 0x34d   :  { %v1131_v16 = vpop.permute.xlu1 %1130  ;;  %1212 = vst.msk [vmem:[#allocation2 + $0x60] sm:$0xff] %vm1199_vm13, %v1195_v27  ;;  %v2485_v18 = vld [vmem:[#allocation2 + $0x48] sm:$0xff] }
 0x34e   :  { %v1188_v62 = vmul.f32 %v1131_v16, %v1092_v46  ;;  %2486 = vst [vmem:[%s5928_s3 + $0x48] sm:$0xff] %v2485_v18  ;;  %v2265_v46 = vsel %vm1065_vm0, %v5559_v56, %v5707_v39 }
 0x34f   :  { %v1176_v42 = vpop.permute.xlu2 %1175 }
 0x350   :  { %1205 = vst.msk [vmem:[#allocation2 + $0x28] sm:$0xff] %vm1199_vm13, %v1188_v62  ;;  %v1197_v11 = vmul.f32 %v1176_v42, %v1101_v10  ;;  %v2473_v26 = vld [vmem:[#allocation2 + $0x18] sm:$0xff] }
 0x351   :  { %2474 = vst [vmem:[%s5928_s3 + $0x18] sm:$0xff] %v2473_v26  ;;  %v2489_v53 = vld [vmem:[#allocation2 + $0x58] sm:$0xff]  ;;  %v2264_v26 = vsel %vm1065_vm0, %v5576_v45, %v5712_v25  ;;  %v2267_v45 = vsel %vm1065_vm0, %v5591_v19, %v5723_v12 }
 0x352   :  { %1214 = vst.msk [vmem:[#allocation2 + $0x70] sm:$0xff] %vm1199_vm13, %v1197_v11  ;;  %v1181_v32 = vpop.permute.xlu0 %1180 }
 0x353   :  { %2490 = vst [vmem:[%s5928_s3 + $0x58] sm:$0xff] %v2489_v53  ;;  %v1198_v57 = vmul.f32 %v1181_v32, %v1102_v44 }
 0x354   :  { %v2491_v50 = vld [vmem:[#allocation2 + $0x60] sm:$0xff] }
 0x355   :  { %v1141_v1 = vpop.permute.xlu1 %1140  ;;  %2492 = vst [vmem:[%s5928_s3 + $0x60] sm:$0xff] %v2491_v50 }
 0x356   :  { %v1190_v30 = vmul.f32 %v1141_v1, %v1094_v29  ;;  %1215 = vst.msk [vmem:[#allocation2 + $0x78] sm:$0xff] %vm1199_vm13, %v1198_v57 }
 0x357   :  { %v2477_v36 = vld [vmem:[#allocation2 + $0x28] sm:$0xff]  ;;  %v2289_v20 = vpop.permute.xlu2 %2288 }
 0x358   :  { %2478 = vst [vmem:[%s5928_s3 + $0x28] sm:$0xff] %v2477_v36  ;;  %v2358_v15 = vmul.f32 %v2289_v20, %v2262_v41 }
 0x359   :  { %v2495_v63 = vld [vmem:[#allocation2 + $0x70] sm:$0xff]  ;;  %1207 = vst.msk [vmem:[#allocation2 + $0x38] sm:$0xff] %vm1199_vm13, %v1190_v30 }
 0x35a   :  { %2496 = vst [vmem:[%s5928_s3 + $0x70] sm:$0xff] %v2495_v63  ;;  %v2279_v5 = vpop.permute.xlu0 %2278 }
 0x35b   :  { %2375 = vst.msk [vmem:[#allocation2 + $0x90] sm:$0xff] %vm1199_vm13, %v2358_v15  ;;  %v2356_v55 = vmul.f32 %v2279_v5, %v2260_v3 }
 0x35d   :  { %v1156_v43 = vpop.permute.xlu1 %1155  ;;  %2373 = vst.msk [vmem:[#allocation2 + $0x80] sm:$0xff] %vm1199_vm13, %v2356_v55  ;;  %v2497_v54 = vld [vmem:[#allocation2 + $0x78] sm:$0xff] }
 0x35e   :  { %v1193_v28 = vmul.f32 %v1156_v43, %v1097_v49  ;;  %2498 = vst [vmem:[%s5928_s3 + $0x78] sm:$0xff] %v2497_v54 }
 0x35f   :  { %v2309_v35 = vpop.permute.xlu2 %2308 }
 0x360   :  { %1210 = vst.msk [vmem:[#allocation2 + $0x50] sm:$0xff] %vm1199_vm13, %v1193_v28  ;;  %v2362_v59 = vmul.f32 %v2309_v35, %v2266_v61  ;;  %v2481_v52 = vld [vmem:[#allocation2 + $0x38] sm:$0xff] }
 0x361   :  { %2482 = vst [vmem:[%s5928_s3 + $0x38] sm:$0xff] %v2481_v52 }
 0x362   :  { %v2503_v37 = vld [vmem:[#allocation2 + $0x90] sm:$0xff]  ;;  %2379 = vst.msk [vmem:[#allocation2 + $0xb0] sm:$0xff] %vm1199_vm13, %v2362_v59  ;;  %v2294_v7 = vpop.permute.xlu0 %2293 }
 0x363   :  { %2504 = vst [vmem:[%s5928_s3 + $0x90] sm:$0xff] %v2503_v37  ;;  %v2359_v34 = vmul.f32 %v2294_v7, %v2263_v58 }
 0x364   :  { %v2499_v27 = vld [vmem:[#allocation2 + $0x80] sm:$0xff] }
 0x365   :  { %v1171_v9 = vpop.permute.xlu1 %1170  ;;  %2500 = vst [vmem:[%s5928_s3 + $0x80] sm:$0xff] %v2499_v27 }
 0x366   :  { %v1196_v16 = vmul.f32 %v1171_v9, %v1100_v21  ;;  %2376 = vst.msk [vmem:[#allocation2 + $0x98] sm:$0xff] %vm1199_vm13, %v2359_v34 }
 0x367   :  { %v2487_v23 = vld [vmem:[#allocation2 + $0x50] sm:$0xff]  ;;  %v2324_v31 = vpop.permute.xlu2 %2323 }
 0x368   :  { %2488 = vst [vmem:[%s5928_s3 + $0x50] sm:$0xff] %v2487_v23 }
 0x369   :  { %v2511_v47 = vld [vmem:[#allocation2 + $0xb0] sm:$0xff]  ;;  %1213 = vst.msk [vmem:[#allocation2 + $0x68] sm:$0xff] %vm1199_vm13, %v1196_v16 }
 0x36a   :  { %2512 = vst [vmem:[%s5928_s3 + $0xb0] sm:$0xff] %v2511_v47  ;;  %v2304_v0 = vpop.permute.xlu0 %2303 }
 0x36b   :  { %v2361_v62 = vmul.f32 %v2304_v0, %v2265_v46 }
 0x36d   :  { %v2284_v51 = vpop.permute.xlu1 %2283  ;;  %2378 = vst.msk [vmem:[#allocation2 + $0xa8] sm:$0xff] %vm1199_vm13, %v2361_v62  ;;  %v2505_v18 = vld [vmem:[#allocation2 + $0x98] sm:$0xff] }
 0x36e   :  { %v2357_v10 = vmul.f32 %v2284_v51, %v2261_v40  ;;  %2506 = vst [vmem:[%s5928_s3 + $0x98] sm:$0xff] %v2505_v18 }
 0x36f   :  { %v2339_v42 = vpop.permute.xlu2 %2338 }
 0x370   :  { %2374 = vst.msk [vmem:[#allocation2 + $0x88] sm:$0xff] %vm1199_vm13, %v2357_v10  ;;  %v2493_v11 = vld [vmem:[#allocation2 + $0x68] sm:$0xff] }
 0x371   :  { %2494 = vst [vmem:[%s5928_s3 + $0x68] sm:$0xff] %v2493_v11 }
 0x372   :  { %v2319_v56 = vpop.permute.xlu0 %2318 }
 0x373   :  { %v2364_v60 = vmul.f32 %v2319_v56, %v2268_v2 }
 0x374   :  { %v2509_v53 = vld [vmem:[#allocation2 + $0xa8] sm:$0xff] }
 0x375   :  { %v2299_v39 = vpop.permute.xlu1 %2298  ;;  %2510 = vst [vmem:[%s5928_s3 + $0xa8] sm:$0xff] %v2509_v53 }
 0x376   :  { %v2360_v38 = vmul.f32 %v2299_v39, %v2264_v26  ;;  %2381 = vst.msk [vmem:[#allocation2 + $0xc0] sm:$0xff] %vm1199_vm13, %v2364_v60 }
 0x377   :  { %v2501_v14 = vld [vmem:[#allocation2 + $0x88] sm:$0xff]  ;;  %v2354_v44 = vpop.permute.xlu2 %2353 }
 0x378   :  { %2502 = vst [vmem:[%s5928_s3 + $0x88] sm:$0xff] %v2501_v14 }
 0x379   :  { %2377 = vst.msk [vmem:[#allocation2 + $0xa0] sm:$0xff] %vm1199_vm13, %v2360_v38 }
 0x37a   :  { %v2334_v22 = vpop.permute.xlu0 %2333 }
 0x37d   :  { %v2314_v6 = vpop.permute.xlu1 %2313  ;;  %v2515_v32 = vld [vmem:[#allocation2 + $0xc0] sm:$0xff] }
 0x37e   :  { %v2363_v25 = vmul.f32 %v2314_v6, %v2267_v45  ;;  %2516 = vst [vmem:[%s5928_s3 + $0xc0] sm:$0xff] %v2515_v32 }
 0x380   :  { %2380 = vst.msk [vmem:[#allocation2 + $0xb8] sm:$0xff] %vm1199_vm13, %v2363_v25  ;;  %v2507_v57 = vld [vmem:[#allocation2 + $0xa0] sm:$0xff] }
 0x381   :  { %2508 = vst [vmem:[%s5928_s3 + $0xa0] sm:$0xff] %v2507_v57 }
 0x382   :  { %v2349_v1 = vpop.permute.xlu0 %2348 }
 0x385   :  { %v2329_v48 = vpop.permute.xlu1 %2328 }
 0x387   :  { %v2513_v4 = vld [vmem:[#allocation2 + $0xb8] sm:$0xff] }
 0x388   :  { %2514 = vst [vmem:[%s5928_s3 + $0xb8] sm:$0xff] %v2513_v4 }
 0x38d   :  { %v2344_v8 = vpop.permute.xlu1 %2343 }

</bundles_post_ra>
